<compile_context>
chip_gen: v7x
topology: tpu7x:2x2x1
jax: 0.10.0
libtpu: 0.0.40
codegen_flags: <defaults>
</compile_context>

<pallas_src>
import functools

import jax
import jax.numpy as jnp
from jax.experimental import pallas as pl
from jax.experimental.pallas import tpu as pltpu


# ----------------------------------------------------------------------------
# Fused Pallas kernel: one (batch image, TH output rows) tile per grid step.
# ----------------------------------------------------------------------------

def _fused_mbconv_kernel(x_ref, w1_ref, b1_ref, w2_ref, b2_ref, w3_ref, b3_ref,
                         o_ref, hid_ref, *,
                         K, stride, P, H, W, Wo, TH, TH_in, residual):
    """Fused expand -> depthwise -> project for TH output rows of one image.

    x_ref  : (1, H, W, Cin)        full input image for this batch element (VMEM)
    w1_ref : (Cin, Chid)           1x1 expand weights, BN1 scale folded in
    b1_ref : (1, Chid)             BN1 bias
    w2_ref : (K*K, Chid)           depthwise weights, BN2 scale folded in
    b2_ref : (1, Chid)             BN2 bias
    w3_ref : (Chid, Cout)          1x1 project weights, BN3 scale folded in
    b3_ref : (1, Cout)             BN3 bias
    o_ref  : (1, TH, Wo, Cout)     output row tile
    hid_ref: (TH_in, W+2P, Chid)   VMEM scratch: zero-padded expanded hidden rows
    """
    t = pl.program_id(1)
    Chid = w1_ref.shape[1]
    Cout = w3_ref.shape[1]
    Wp = W + 2 * P

    w2 = w2_ref[...]                      # (K*K, Chid)
    b2 = b2_ref[0]                        # (Chid,)

    # ---- stage 1: 1x1 expand + BN1 + ReLU6 into zero-padded hidden scratch ----
    # Output rows [t*TH, t*TH+TH) need padded-hidden rows [r0, r0 + TH_in).
    hid_ref[...] = jnp.zeros_like(hid_ref)          # spatial zero padding
    r0 = t * (TH * stride)
    for j in range(TH_in):                          # static unrolled, TH_in is small
        hrow = r0 + j - P                           # hidden (== input) row index

        @pl.when(jnp.logical_and(hrow >= 0, hrow < H))
        def _(j=j, hrow=hrow):
            xr = x_ref[0, pl.ds(hrow, 1), :, :][0]              # (W, Cin)
            h = jnp.dot(xr, w1_ref[...], preferred_element_type=jnp.float32)
            h = jnp.clip(h + b1_ref[...], 0.0, 6.0)             # (W, Chid)
            hid_ref[j, P:P + W, :] = h

    # ---- stage 2: depthwise KxK + BN2 + ReLU6 (VPU broadcast-MAC per tap) ----
    if stride == 1:
        # contiguous windows: one (TH, Wo, Chid) slab per tap, no strided slices
        acc = jnp.zeros((TH, Wo, Chid), jnp.float32)
        for kh in range(K):
            for kw in range(K):
                win = hid_ref[kh:kh + TH, kw:kw + Wo, :]
                acc = acc + win * w2[kh * K + kw, :]
    else:
        # stride >= 2: extract the `stride` column phases of each hidden row ONCE,
        # then every tap is a contiguous slice of a phase plane.
        rows = []
        for i in range(TH):
            acc_i = jnp.zeros((Wo, Chid), jnp.float32)
            for kh in range(K):
                row = hid_ref[i * stride + kh]                  # (Wp, Chid), static index
                phases = [jax.lax.slice(row, (p, 0), (Wp, Chid), (stride, 1))
                          for p in range(stride)]
                for kw in range(K):
                    off, ph = divmod(kw, stride)
                    win = phases[ph][off:off + Wo, :]
                    acc_i = acc_i + win * w2[kh * K + kw, :]
            rows.append(acc_i)
        acc = jnp.stack(rows, axis=0)                           # (TH, Wo, Chid)

    h2 = jnp.clip(acc + b2, 0.0, 6.0)                           # (TH, Wo, Chid)

    # ---- stage 3: 1x1 project + BN3 (+ residual) ----
    y = jnp.dot(h2.reshape(TH * Wo, Chid), w3_ref[...],
                preferred_element_type=jnp.float32) + b3_ref[...]
    y = y.reshape(TH, Wo, Cout)
    if residual:                                                # static flag
        row0 = pl.multiple_of(t * TH, TH)
        y = y + x_ref[0, pl.ds(row0, TH), :, :]                 # (TH, W==Wo, Cin==Cout)
    o_ref[0] = y.astype(o_ref.dtype)


def fused_super_mobile_block(x_nhwc, folded, *, K, stride, padding, row_tile=8):
    """Launch the fused MBConv kernel over grid = (batch, output-row tiles)."""
    N, H, W, Cin = x_nhwc.shape
    Chid = folded["w1"].shape[1]
    Cout = folded["w3"].shape[1]
    P = padding
    Ho = (H + 2 * P - K) // stride + 1
    Wo = (W + 2 * P - K) // stride + 1

    # Largest row tile <= row_tile that divides Ho exactly (keeps every output
    # block full; re-derive row_tile for v7x's smaller VMEM if shapes grow).
    TH = 1
    for cand in range(min(row_tile, Ho), 0, -1):
        if Ho % cand == 0:
            TH = cand
            break
    TH_in = (TH - 1) * stride + K              # padded hidden rows needed per tile
    Wp = W + 2 * P

    residual = (stride == 1) and (Cin == Cout) and (Ho == H) and (Wo == W)

    kernel = functools.partial(
        _fused_mbconv_kernel, K=K, stride=stride, P=P, H=H, W=W, Wo=Wo,
        TH=TH, TH_in=TH_in, residual=residual)

    return pl.pallas_call(
        kernel,
        out_shape=jax.ShapeDtypeStruct((N, Ho, Wo, Cout), x_nhwc.dtype),
        grid=(N, Ho // TH),
        in_specs=[
            # input image: same block across the row-tile axis -> DMA'd once per n
            pl.BlockSpec((1, H, W, Cin), lambda n, t: (n, 0, 0, 0)),
            pl.BlockSpec((Cin, Chid), lambda n, t: (0, 0)),
            pl.BlockSpec((1, Chid), lambda n, t: (0, 0)),
            pl.BlockSpec((K * K, Chid), lambda n, t: (0, 0)),
            pl.BlockSpec((1, Chid), lambda n, t: (0, 0)),
            pl.BlockSpec((Chid, Cout), lambda n, t: (0, 0)),
            pl.BlockSpec((1, Cout), lambda n, t: (0, 0)),
        ],
        out_specs=pl.BlockSpec((1, TH, Wo, Cout), lambda n, t: (n, t, 0, 0)),
        scratch_shapes=[pltpu.VMEM((TH_in, Wp, Chid), jnp.float32)],
        compiler_params=pltpu.CompilerParams(
            dimension_semantics=("parallel", "parallel")),
    )(x_nhwc, folded["w1"], folded["b1"], folded["w2"], folded["b2"],
      folded["w3"], folded["b3"])


# ----------------------------------------------------------------------------
# SuperConv2d mask semantics + BN folding (parameter preprocessing, JAX glue)
# ----------------------------------------------------------------------------

def build_channel_masks(out_channels_list, max_out):
    masks, prev = [], None
    for oc in out_channels_list:
        idx = jnp.arange(max_out)
        m = (idx < oc).astype(jnp.float32)
        if prev:
            m = m * (idx >= prev).astype(jnp.float32)
        prev = oc
        masks.append(m.reshape(max_out, 1, 1, 1))
    return masks


def build_kernel_masks(kernel_size_list, max_k):
    masks, prev = [], None
    for ks in kernel_size_list:
        pad = (max_k - ks) // 2
        m = jnp.zeros((max_k, max_k), jnp.float32)
        m = m.at[pad:max_k - pad, pad:max_k - pad].set(1.0)
        if prev:
            ppad = (max_k - prev) // 2
            inner = jnp.ones((max_k, max_k), jnp.float32)
            inner = inner.at[ppad:max_k - ppad, ppad:max_k - ppad].set(0.0)
            m = m * inner
        prev = ks
        masks.append(m.reshape(1, 1, max_k, max_k))
    return masks


def parametrized_mask(weight, masks, thresholds):
    """Forward value of SuperConv2d.parametrized_mask (sigmoid STE terms cancel)."""
    def rec(i):
        if i == len(masks):
            return jnp.asarray(0.0, weight.dtype)
        norm = jnp.sqrt(jnp.sum((weight * masks[i]) ** 2))
        indicator = (norm > thresholds[i]).astype(weight.dtype)
        return indicator * (masks[i] + rec(i + 1))
    return rec(0)


def fold_bn(gamma, beta, running_mean, running_var, eps=1e-5):
    scale = gamma / jnp.sqrt(running_var + eps)
    bias = beta - running_mean * scale
    return scale, bias


def prepare_folded_weights(params, cfg):
    """Apply SuperConv2d masks and fold BN scales into the conv weights."""
    Chid, K = cfg["max_hidden"], cfg["max_k"]

    ch_masks = build_channel_masks(cfg["hidden_list"], Chid)
    ch_thr = [jnp.float32(0.0)] * len(ch_masks)      # channel_thresholds buffer (zeros)
    w1 = params["w1_raw"] * parametrized_mask(params["w1_raw"], ch_masks, ch_thr)

    k_masks = build_kernel_masks(cfg["kernel_size_list"], K)
    k_thr = [jnp.float32(0.0)] * len(k_masks)        # kernel_thresholds buffer (zeros)
    w2 = params["w2_raw"] * parametrized_mask(params["w2_raw"], k_masks, k_thr)
    w3 = params["w3_raw"]

    s1, b1 = fold_bn(params["bn1_gamma"], params["bn1_beta"], params["bn1_rm"], params["bn1_rv"])
    s2, b2 = fold_bn(params["bn2_gamma"], params["bn2_beta"], params["bn2_rm"], params["bn2_rv"])
    s3, b3 = fold_bn(params["bn3_gamma"], params["bn3_beta"], params["bn3_rm"], params["bn3_rv"])

    # Conv is linear in its weights -> BN scale folds into the weights; only bias stays.
    w1_mat = jnp.transpose(w1[:, :, 0, 0], (1, 0)) * s1[None, :]                       # (Cin,  Chid)
    w2_flat = jnp.transpose(w2[:, 0, :, :].reshape(Chid, K * K), (1, 0)) * s2[None, :]  # (K*K,  Chid)
    w3_mat = jnp.transpose(w3[:, :, 0, 0], (1, 0)) * s3[None, :]                       # (Chid, Cout)
    return dict(w1=w1_mat, b1=b1.reshape(1, -1),
                w2=w2_flat, b2=b2.reshape(1, -1),
                w3=w3_mat, b3=b3.reshape(1, -1))


# ----------------------------------------------------------------------------
# Module: parameter init + forward (NCHW in / NCHW out, like PyTorch)
# ----------------------------------------------------------------------------

def init_params(key, in_channels, out_channels, expand_ratio_list, kernel_size_list):
    hidden_list = [in_channels * r for r in expand_ratio_list]
    max_hidden = max(hidden_list)
    max_k = max(kernel_size_list)
    ks = jax.random.split(key, 9)

    p = {}
    p["w1_raw"] = jax.random.normal(ks[0], (max_hidden, in_channels, 1, 1), jnp.float32) * 0.1
    p["w2_raw"] = jax.random.normal(ks[1], (max_hidden, 1, max_k, max_k), jnp.float32) * 0.1
    p["w3_raw"] = jax.random.normal(ks[2], (out_channels, max_hidden, 1, 1), jnp.float32) * 0.1
    for i, (name, C) in enumerate([("bn1", max_hidden), ("bn2", max_hidden), ("bn3", out_channels)]):
        p[name + "_gamma"] = 1.0 + 0.05 * jax.random.normal(ks[3 + i], (C,), jnp.float32)
        p[name + "_beta"] = 0.05 * jax.random.normal(ks[6 + i], (C,), jnp.float32)
        p[name + "_rm"] = jnp.zeros((C,), jnp.float32)
        p[name + "_rv"] = jnp.ones((C,), jnp.float32)

    cfg = dict(in_channels=in_channels, out_channels=out_channels,
               hidden_list=hidden_list, max_hidden=max_hidden,
               kernel_size_list=list(kernel_size_list), max_k=max_k)
    return p, cfg


def super_mobile_conv_block(x_nchw, params, cfg, *, stride):
    folded = prepare_folded_weights(params, cfg)
    K = cfg["max_k"]
    padding = (K - 1) // 2
    # NCHW -> NHWC so channels ride the 128-lane axis inside the kernel.
    # TODO(synk): a caller keeping activations NHWC end-to-end can skip both transposes.
    x = jnp.transpose(x_nchw, (0, 2, 3, 1))
    y = fused_super_mobile_block(x, folded, K=K, stride=stride, padding=padding)
    return jnp.transpose(y, (0, 3, 1, 2))


def reference_forward(x_nchw, params, cfg, *, stride):
    """Plain JAX/XLA reference using the SAME folded weights (checks the kernel)."""
    folded = prepare_folded_weights(params, cfg)
    K = cfg["max_k"]
    P = (K - 1) // 2
    Chid = folded["w1"].shape[1]
    x = jnp.transpose(x_nchw, (0, 2, 3, 1))
    h1 = jnp.clip(jnp.einsum("nhwc,cd->nhwd", x, folded["w1"])
                  + folded["b1"].reshape(1, 1, 1, -1), 0.0, 6.0)
    dw = folded["w2"].reshape(K, K, 1, Chid)
    h2 = jax.lax.conv_general_dilated(
        h1, dw, window_strides=(stride, stride), padding=((P, P), (P, P)),
        dimension_numbers=("NHWC", "HWIO", "NHWC"), feature_group_count=Chid)
    h2 = jnp.clip(h2 + folded["b2"].reshape(1, 1, 1, -1), 0.0, 6.0)
    y = jnp.einsum("nhwc,cd->nhwd", h2, folded["w3"]) + folded["b3"].reshape(1, 1, 1, -1)
    if y.shape == x.shape:
        y = y + x
    return jnp.transpose(y, (0, 3, 1, 2))


# ----------------------------------------------------------------------------
# Main
# ----------------------------------------------------------------------------

if __name__ == "__main__":
    key = jax.random.PRNGKey(0)
    k_param, k_x = jax.random.split(key)

    N, Cin, H, W = 2, 4, 16, 16
    out_channels = 4
    expand_ratio_list = [3, 6]      # hidden = [12, 24] -> max_hidden = 24
    kernel_size_list = [3, 5]       # max_k = 5 -> padding = 2
    stride = 1                      # stride 1 + Cin == Cout -> residual path active

    params, cfg = init_params(k_param, Cin, out_channels, expand_ratio_list, kernel_size_list)
    x = jax.random.normal(k_x, (N, Cin, H, W), jnp.float32)

    fwd = jax.jit(lambda xx, pp: super_mobile_conv_block(xx, pp, cfg, stride=stride))
    y = fwd(x, params)
    jax.block_until_ready(y)
    assert y.shape == (N, out_channels, H, W), y.shape

    # Numerical check of the fused Pallas kernel against the XLA reference
    # (same folded weights; loose tol absorbs MXU vs XLA matmul precision).
    y_ref = reference_forward(x, params, cfg, stride=stride)
    err = float(jnp.max(jnp.abs(y - y_ref)))
    assert err < 5e-2, f"Pallas vs reference mismatch: max abs err {err}"

    print("KERNEL_OK")
</pallas_src>

<mosaic_0001>
module attributes {stable_mosaic.version = 11 : i64} {
  func.func @_fused_mbconv_kernel(%arg0: i32, %arg1: i32, %arg2: memref<1x16x16x4xf32, #tpu.memory_space<vmem>>, %arg3: memref<4x24xf32, #tpu.memory_space<vmem>>, %arg4: memref<1x24xf32, #tpu.memory_space<vmem>>, %arg5: memref<25x24xf32, #tpu.memory_space<vmem>>, %arg6: memref<1x24xf32, #tpu.memory_space<vmem>>, %arg7: memref<24x4xf32, #tpu.memory_space<vmem>>, %arg8: memref<1x4xf32, #tpu.memory_space<vmem>>, %arg9: memref<1x8x16x4xf32, #tpu.memory_space<vmem>>, %arg10: memref<12x20x24xf32, #tpu.memory_space<vmem>>) attributes {dimension_semantics = [#tpu.dimension_semantics<parallel>, #tpu.dimension_semantics<parallel>], iteration_bounds = array<i64: 2, 2>, scalar_prefetch = 0 : i64, scratch_operands = 1 : i64, tpu.core_type = #tpu.core_type<tc>, window_params = [{transform_indices = @transform_0, window_bounds = array<i64: 1, 16, 16, 4>}, {pipeline_mode = #tpu.pipeline_mode<synchronous>, transform_indices = @transform_1, window_bounds = array<i64: 4, 24>}, {pipeline_mode = #tpu.pipeline_mode<synchronous>, transform_indices = @transform_2, window_bounds = array<i64: 1, 24>}, {pipeline_mode = #tpu.pipeline_mode<synchronous>, transform_indices = @transform_3, window_bounds = array<i64: 25, 24>}, {pipeline_mode = #tpu.pipeline_mode<synchronous>, transform_indices = @transform_4, window_bounds = array<i64: 1, 24>}, {pipeline_mode = #tpu.pipeline_mode<synchronous>, transform_indices = @transform_5, window_bounds = array<i64: 24, 4>}, {pipeline_mode = #tpu.pipeline_mode<synchronous>, transform_indices = @transform_6, window_bounds = array<i64: 1, 4>}, {transform_indices = @transform_7, window_bounds = array<i64: 1, 8, 16, 4>}]} {
    %c0 = arith.constant 0 : index
    %c0_0 = arith.constant 0 : index
    %0 = vector.load %arg5[%c0, %c0_0] : memref<25x24xf32, #tpu.memory_space<vmem>>, vector<25x24xf32>
    %c0_1 = arith.constant 0 : index
    %c0_2 = arith.constant 0 : index
    %1 = vector.load %arg6[%c0_1, %c0_2] : memref<1x24xf32, #tpu.memory_space<vmem>>, vector<1x24xf32>
    %2 = vector.shape_cast %1 : vector<1x24xf32> to vector<24xf32>
    %cst = arith.constant 0.000000e+00 : f32
    %3 = vector.broadcast %cst : f32 to vector<12x20x24xf32>
    %c0_3 = arith.constant 0 : index
    %c0_4 = arith.constant 0 : index
    %c0_5 = arith.constant 0 : index
    %4 = vector.load %arg10[%c0_3, %c0_4, %c0_5] : memref<12x20x24xf32, #tpu.memory_space<vmem>>, vector<12x20x24xf32>
    tpu.vector_store %arg10[%c0_3, %c0_4, %c0_5], %3 {strides = array<i32>} : memref<12x20x24xf32, #tpu.memory_space<vmem>>, vector<12x20x24xf32>,
    %c8_i32 = arith.constant 8 : i32
    %5 = arith.muli %arg1, %c8_i32 : i32
    %c0_i32 = arith.constant 0 : i32
    %6 = arith.addi %5, %c0_i32 : i32
    %c2_i32 = arith.constant 2 : i32
    %7 = arith.subi %6, %c2_i32 : i32
    %c0_i32_6 = arith.constant 0 : i32
    %8 = arith.cmpi sge, %7, %c0_i32_6 : i32
    %c16_i32 = arith.constant 16 : i32
    %9 = arith.cmpi slt, %7, %c16_i32 : i32
    %10 = arith.andi %8, %9 : i1
    %11 = arith.extui %10 : i1 to i32
    %c0_i32_7 = arith.constant 0 : i32
    %12 = arith.cmpi ne, %11, %c0_i32_7 : i32
    scf.if %12 {
      %c0_141 = arith.constant 0 : index
      %289 = arith.index_cast %7 : i32 to index
      %c0_142 = arith.constant 0 : index
      %c0_143 = arith.constant 0 : index
      %290 = vector.load %arg2[%c0_141, %289, %c0_142, %c0_143] : memref<1x16x16x4xf32, #tpu.memory_space<vmem>>, vector<1x1x16x4xf32>
      %291 = vector.shape_cast %290 : vector<1x1x16x4xf32> to vector<1x16x4xf32>
      %292 = vector.shape_cast %291 : vector<1x16x4xf32> to vector<16x4xf32>
      %c0_144 = arith.constant 0 : index
      %c0_145 = arith.constant 0 : index
      %293 = vector.load %arg3[%c0_144, %c0_145] : memref<4x24xf32, #tpu.memory_space<vmem>>, vector<4x24xf32>
      %cst_146 = arith.constant dense<0.000000e+00> : vector<16x24xf32>
      %294 = tpu.matmul %292, %293, %cst_146 {dimension_numbers = #tpu.dot_dimension_numbers<[1], [0], [0], [1], [0, 0, 1, 1], [], []>} : vector<16x4xf32>, vector<4x24xf32>, vector<16x24xf32> -> vector<16x24xf32>
      %c0_147 = arith.constant 0 : index
      %c0_148 = arith.constant 0 : index
      %295 = vector.load %arg4[%c0_147, %c0_148] : memref<1x24xf32, #tpu.memory_space<vmem>>, vector<1x24xf32>
      %296 = vector.broadcast %295 : vector<1x24xf32> to vector<16x24xf32>
      %297 = arith.addf %294, %296 : vector<16x24xf32>
      %cst_149 = arith.constant 0.000000e+00 : f32
      %cst_150 = arith.constant 6.000000e+00 : f32
      %298 = vector.broadcast %cst_149 : f32 to vector<16x24xf32>
      %299 = arith.maximumf %298, %297 : vector<16x24xf32>
      %300 = vector.broadcast %cst_150 : f32 to vector<16x24xf32>
      %301 = arith.minimumf %300, %299 : vector<16x24xf32>
      %c0_151 = arith.constant 0 : index
      %c2_152 = arith.constant 2 : index
      %c0_153 = arith.constant 0 : index
      %302 = vector.load %arg10[%c0_151, %c2_152, %c0_153] : memref<12x20x24xf32, #tpu.memory_space<vmem>>, vector<1x16x24xf32>
      %303 = vector.shape_cast %302 : vector<1x16x24xf32> to vector<16x24xf32>
      %304 = vector.shape_cast %301 : vector<16x24xf32> to vector<1x16x24xf32>
      tpu.vector_store %arg10[%c0_151, %c2_152, %c0_153], %304 {strides = array<i32>} : memref<12x20x24xf32, #tpu.memory_space<vmem>>, vector<1x16x24xf32>,
    } else {
    }
    %c1_i32 = arith.constant 1 : i32
    %13 = arith.addi %5, %c1_i32 : i32
    %c2_i32_8 = arith.constant 2 : i32
    %14 = arith.subi %13, %c2_i32_8 : i32
    %c0_i32_9 = arith.constant 0 : i32
    %15 = arith.cmpi sge, %14, %c0_i32_9 : i32
    %c16_i32_10 = arith.constant 16 : i32
    %16 = arith.cmpi slt, %14, %c16_i32_10 : i32
    %17 = arith.andi %15, %16 : i1
    %18 = arith.extui %17 : i1 to i32
    %c0_i32_11 = arith.constant 0 : i32
    %19 = arith.cmpi ne, %18, %c0_i32_11 : i32
    scf.if %19 {
      %c0_141 = arith.constant 0 : index
      %289 = arith.index_cast %14 : i32 to index
      %c0_142 = arith.constant 0 : index
      %c0_143 = arith.constant 0 : index
      %290 = vector.load %arg2[%c0_141, %289, %c0_142, %c0_143] : memref<1x16x16x4xf32, #tpu.memory_space<vmem>>, vector<1x1x16x4xf32>
      %291 = vector.shape_cast %290 : vector<1x1x16x4xf32> to vector<1x16x4xf32>
      %292 = vector.shape_cast %291 : vector<1x16x4xf32> to vector<16x4xf32>
      %c0_144 = arith.constant 0 : index
      %c0_145 = arith.constant 0 : index
      %293 = vector.load %arg3[%c0_144, %c0_145] : memref<4x24xf32, #tpu.memory_space<vmem>>, vector<4x24xf32>
      %cst_146 = arith.constant dense<0.000000e+00> : vector<16x24xf32>
      %294 = tpu.matmul %292, %293, %cst_146 {dimension_numbers = #tpu.dot_dimension_numbers<[1], [0], [0], [1], [0, 0, 1, 1], [], []>} : vector<16x4xf32>, vector<4x24xf32>, vector<16x24xf32> -> vector<16x24xf32>
      %c0_147 = arith.constant 0 : index
      %c0_148 = arith.constant 0 : index
      %295 = vector.load %arg4[%c0_147, %c0_148] : memref<1x24xf32, #tpu.memory_space<vmem>>, vector<1x24xf32>
      %296 = vector.broadcast %295 : vector<1x24xf32> to vector<16x24xf32>
      %297 = arith.addf %294, %296 : vector<16x24xf32>
      %cst_149 = arith.constant 0.000000e+00 : f32
      %cst_150 = arith.constant 6.000000e+00 : f32
      %298 = vector.broadcast %cst_149 : f32 to vector<16x24xf32>
      %299 = arith.maximumf %298, %297 : vector<16x24xf32>
      %300 = vector.broadcast %cst_150 : f32 to vector<16x24xf32>
      %301 = arith.minimumf %300, %299 : vector<16x24xf32>
      %c1_151 = arith.constant 1 : index
      %c2_152 = arith.constant 2 : index
      %c0_153 = arith.constant 0 : index
      %302 = vector.load %arg10[%c1_151, %c2_152, %c0_153] : memref<12x20x24xf32, #tpu.memory_space<vmem>>, vector<1x16x24xf32>
      %303 = vector.shape_cast %302 : vector<1x16x24xf32> to vector<16x24xf32>
      %304 = vector.shape_cast %301 : vector<16x24xf32> to vector<1x16x24xf32>
      tpu.vector_store %arg10[%c1_151, %c2_152, %c0_153], %304 {strides = array<i32>} : memref<12x20x24xf32, #tpu.memory_space<vmem>>, vector<1x16x24xf32>,
    } else {
    }
    %c2_i32_12 = arith.constant 2 : i32
    %20 = arith.addi %5, %c2_i32_12 : i32
    %c2_i32_13 = arith.constant 2 : i32
    %21 = arith.subi %20, %c2_i32_13 : i32
    %c0_i32_14 = arith.constant 0 : i32
    %22 = arith.cmpi sge, %21, %c0_i32_14 : i32
    %c16_i32_15 = arith.constant 16 : i32
    %23 = arith.cmpi slt, %21, %c16_i32_15 : i32
    %24 = arith.andi %22, %23 : i1
    %25 = arith.extui %24 : i1 to i32
    %c0_i32_16 = arith.constant 0 : i32
    %26 = arith.cmpi ne, %25, %c0_i32_16 : i32
    scf.if %26 {
      %c0_141 = arith.constant 0 : index
      %289 = arith.index_cast %21 : i32 to index
      %c0_142 = arith.constant 0 : index
      %c0_143 = arith.constant 0 : index
      %290 = vector.load %arg2[%c0_141, %289, %c0_142, %c0_143] : memref<1x16x16x4xf32, #tpu.memory_space<vmem>>, vector<1x1x16x4xf32>
      %291 = vector.shape_cast %290 : vector<1x1x16x4xf32> to vector<1x16x4xf32>
      %292 = vector.shape_cast %291 : vector<1x16x4xf32> to vector<16x4xf32>
      %c0_144 = arith.constant 0 : index
      %c0_145 = arith.constant 0 : index
      %293 = vector.load %arg3[%c0_144, %c0_145] : memref<4x24xf32, #tpu.memory_space<vmem>>, vector<4x24xf32>
      %cst_146 = arith.constant dense<0.000000e+00> : vector<16x24xf32>
      %294 = tpu.matmul %292, %293, %cst_146 {dimension_numbers = #tpu.dot_dimension_numbers<[1], [0], [0], [1], [0, 0, 1, 1], [], []>} : vector<16x4xf32>, vector<4x24xf32>, vector<16x24xf32> -> vector<16x24xf32>
      %c0_147 = arith.constant 0 : index
      %c0_148 = arith.constant 0 : index
      %295 = vector.load %arg4[%c0_147, %c0_148] : memref<1x24xf32, #tpu.memory_space<vmem>>, vector<1x24xf32>
      %296 = vector.broadcast %295 : vector<1x24xf32> to vector<16x24xf32>
      %297 = arith.addf %294, %296 : vector<16x24xf32>
      %cst_149 = arith.constant 0.000000e+00 : f32
      %cst_150 = arith.constant 6.000000e+00 : f32
      %298 = vector.broadcast %cst_149 : f32 to vector<16x24xf32>
      %299 = arith.maximumf %298, %297 : vector<16x24xf32>
      %300 = vector.broadcast %cst_150 : f32 to vector<16x24xf32>
      %301 = arith.minimumf %300, %299 : vector<16x24xf32>
      %c2_151 = arith.constant 2 : index
      %c2_152 = arith.constant 2 : index
      %c0_153 = arith.constant 0 : index
      %302 = vector.load %arg10[%c2_151, %c2_152, %c0_153] : memref<12x20x24xf32, #tpu.memory_space<vmem>>, vector<1x16x24xf32>
      %303 = vector.shape_cast %302 : vector<1x16x24xf32> to vector<16x24xf32>
      %304 = vector.shape_cast %301 : vector<16x24xf32> to vector<1x16x24xf32>
      tpu.vector_store %arg10[%c2_151, %c2_152, %c0_153], %304 {strides = array<i32>} : memref<12x20x24xf32, #tpu.memory_space<vmem>>, vector<1x16x24xf32>,
    } else {
    }
    %c3_i32 = arith.constant 3 : i32
    %27 = arith.addi %5, %c3_i32 : i32
    %c2_i32_17 = arith.constant 2 : i32
    %28 = arith.subi %27, %c2_i32_17 : i32
    %c0_i32_18 = arith.constant 0 : i32
    %29 = arith.cmpi sge, %28, %c0_i32_18 : i32
    %c16_i32_19 = arith.constant 16 : i32
    %30 = arith.cmpi slt, %28, %c16_i32_19 : i32
    %31 = arith.andi %29, %30 : i1
    %32 = arith.extui %31 : i1 to i32
    %c0_i32_20 = arith.constant 0 : i32
    %33 = arith.cmpi ne, %32, %c0_i32_20 : i32
    scf.if %33 {
      %c0_141 = arith.constant 0 : index
      %289 = arith.index_cast %28 : i32 to index
      %c0_142 = arith.constant 0 : index
      %c0_143 = arith.constant 0 : index
      %290 = vector.load %arg2[%c0_141, %289, %c0_142, %c0_143] : memref<1x16x16x4xf32, #tpu.memory_space<vmem>>, vector<1x1x16x4xf32>
      %291 = vector.shape_cast %290 : vector<1x1x16x4xf32> to vector<1x16x4xf32>
      %292 = vector.shape_cast %291 : vector<1x16x4xf32> to vector<16x4xf32>
      %c0_144 = arith.constant 0 : index
      %c0_145 = arith.constant 0 : index
      %293 = vector.load %arg3[%c0_144, %c0_145] : memref<4x24xf32, #tpu.memory_space<vmem>>, vector<4x24xf32>
      %cst_146 = arith.constant dense<0.000000e+00> : vector<16x24xf32>
      %294 = tpu.matmul %292, %293, %cst_146 {dimension_numbers = #tpu.dot_dimension_numbers<[1], [0], [0], [1], [0, 0, 1, 1], [], []>} : vector<16x4xf32>, vector<4x24xf32>, vector<16x24xf32> -> vector<16x24xf32>
      %c0_147 = arith.constant 0 : index
      %c0_148 = arith.constant 0 : index
      %295 = vector.load %arg4[%c0_147, %c0_148] : memref<1x24xf32, #tpu.memory_space<vmem>>, vector<1x24xf32>
      %296 = vector.broadcast %295 : vector<1x24xf32> to vector<16x24xf32>
      %297 = arith.addf %294, %296 : vector<16x24xf32>
      %cst_149 = arith.constant 0.000000e+00 : f32
      %cst_150 = arith.constant 6.000000e+00 : f32
      %298 = vector.broadcast %cst_149 : f32 to vector<16x24xf32>
      %299 = arith.maximumf %298, %297 : vector<16x24xf32>
      %300 = vector.broadcast %cst_150 : f32 to vector<16x24xf32>
      %301 = arith.minimumf %300, %299 : vector<16x24xf32>
      %c3_151 = arith.constant 3 : index
      %c2_152 = arith.constant 2 : index
      %c0_153 = arith.constant 0 : index
      %302 = vector.load %arg10[%c3_151, %c2_152, %c0_153] : memref<12x20x24xf32, #tpu.memory_space<vmem>>, vector<1x16x24xf32>
      %303 = vector.shape_cast %302 : vector<1x16x24xf32> to vector<16x24xf32>
      %304 = vector.shape_cast %301 : vector<16x24xf32> to vector<1x16x24xf32>
      tpu.vector_store %arg10[%c3_151, %c2_152, %c0_153], %304 {strides = array<i32>} : memref<12x20x24xf32, #tpu.memory_space<vmem>>, vector<1x16x24xf32>,
    } else {
    }
    %c4_i32 = arith.constant 4 : i32
    %34 = arith.addi %5, %c4_i32 : i32
    %c2_i32_21 = arith.constant 2 : i32
    %35 = arith.subi %34, %c2_i32_21 : i32
    %c0_i32_22 = arith.constant 0 : i32
    %36 = arith.cmpi sge, %35, %c0_i32_22 : i32
    %c16_i32_23 = arith.constant 16 : i32
    %37 = arith.cmpi slt, %35, %c16_i32_23 : i32
    %38 = arith.andi %36, %37 : i1
    %39 = arith.extui %38 : i1 to i32
    %c0_i32_24 = arith.constant 0 : i32
    %40 = arith.cmpi ne, %39, %c0_i32_24 : i32
    scf.if %40 {
      %c0_141 = arith.constant 0 : index
      %289 = arith.index_cast %35 : i32 to index
      %c0_142 = arith.constant 0 : index
      %c0_143 = arith.constant 0 : index
      %290 = vector.load %arg2[%c0_141, %289, %c0_142, %c0_143] : memref<1x16x16x4xf32, #tpu.memory_space<vmem>>, vector<1x1x16x4xf32>
      %291 = vector.shape_cast %290 : vector<1x1x16x4xf32> to vector<1x16x4xf32>
      %292 = vector.shape_cast %291 : vector<1x16x4xf32> to vector<16x4xf32>
      %c0_144 = arith.constant 0 : index
      %c0_145 = arith.constant 0 : index
      %293 = vector.load %arg3[%c0_144, %c0_145] : memref<4x24xf32, #tpu.memory_space<vmem>>, vector<4x24xf32>
      %cst_146 = arith.constant dense<0.000000e+00> : vector<16x24xf32>
      %294 = tpu.matmul %292, %293, %cst_146 {dimension_numbers = #tpu.dot_dimension_numbers<[1], [0], [0], [1], [0, 0, 1, 1], [], []>} : vector<16x4xf32>, vector<4x24xf32>, vector<16x24xf32> -> vector<16x24xf32>
      %c0_147 = arith.constant 0 : index
      %c0_148 = arith.constant 0 : index
      %295 = vector.load %arg4[%c0_147, %c0_148] : memref<1x24xf32, #tpu.memory_space<vmem>>, vector<1x24xf32>
      %296 = vector.broadcast %295 : vector<1x24xf32> to vector<16x24xf32>
      %297 = arith.addf %294, %296 : vector<16x24xf32>
      %cst_149 = arith.constant 0.000000e+00 : f32
      %cst_150 = arith.constant 6.000000e+00 : f32
      %298 = vector.broadcast %cst_149 : f32 to vector<16x24xf32>
      %299 = arith.maximumf %298, %297 : vector<16x24xf32>
      %300 = vector.broadcast %cst_150 : f32 to vector<16x24xf32>
      %301 = arith.minimumf %300, %299 : vector<16x24xf32>
      %c4_151 = arith.constant 4 : index
      %c2_152 = arith.constant 2 : index
      %c0_153 = arith.constant 0 : index
      %302 = vector.load %arg10[%c4_151, %c2_152, %c0_153] : memref<12x20x24xf32, #tpu.memory_space<vmem>>, vector<1x16x24xf32>
      %303 = vector.shape_cast %302 : vector<1x16x24xf32> to vector<16x24xf32>
      %304 = vector.shape_cast %301 : vector<16x24xf32> to vector<1x16x24xf32>
      tpu.vector_store %arg10[%c4_151, %c2_152, %c0_153], %304 {strides = array<i32>} : memref<12x20x24xf32, #tpu.memory_space<vmem>>, vector<1x16x24xf32>,
    } else {
    }
    %c5_i32 = arith.constant 5 : i32
    %41 = arith.addi %5, %c5_i32 : i32
    %c2_i32_25 = arith.constant 2 : i32
    %42 = arith.subi %41, %c2_i32_25 : i32
    %c0_i32_26 = arith.constant 0 : i32
    %43 = arith.cmpi sge, %42, %c0_i32_26 : i32
    %c16_i32_27 = arith.constant 16 : i32
    %44 = arith.cmpi slt, %42, %c16_i32_27 : i32
    %45 = arith.andi %43, %44 : i1
    %46 = arith.extui %45 : i1 to i32
    %c0_i32_28 = arith.constant 0 : i32
    %47 = arith.cmpi ne, %46, %c0_i32_28 : i32
    scf.if %47 {
      %c0_141 = arith.constant 0 : index
      %289 = arith.index_cast %42 : i32 to index
      %c0_142 = arith.constant 0 : index
      %c0_143 = arith.constant 0 : index
      %290 = vector.load %arg2[%c0_141, %289, %c0_142, %c0_143] : memref<1x16x16x4xf32, #tpu.memory_space<vmem>>, vector<1x1x16x4xf32>
      %291 = vector.shape_cast %290 : vector<1x1x16x4xf32> to vector<1x16x4xf32>
      %292 = vector.shape_cast %291 : vector<1x16x4xf32> to vector<16x4xf32>
      %c0_144 = arith.constant 0 : index
      %c0_145 = arith.constant 0 : index
      %293 = vector.load %arg3[%c0_144, %c0_145] : memref<4x24xf32, #tpu.memory_space<vmem>>, vector<4x24xf32>
      %cst_146 = arith.constant dense<0.000000e+00> : vector<16x24xf32>
      %294 = tpu.matmul %292, %293, %cst_146 {dimension_numbers = #tpu.dot_dimension_numbers<[1], [0], [0], [1], [0, 0, 1, 1], [], []>} : vector<16x4xf32>, vector<4x24xf32>, vector<16x24xf32> -> vector<16x24xf32>
      %c0_147 = arith.constant 0 : index
      %c0_148 = arith.constant 0 : index
      %295 = vector.load %arg4[%c0_147, %c0_148] : memref<1x24xf32, #tpu.memory_space<vmem>>, vector<1x24xf32>
      %296 = vector.broadcast %295 : vector<1x24xf32> to vector<16x24xf32>
      %297 = arith.addf %294, %296 : vector<16x24xf32>
      %cst_149 = arith.constant 0.000000e+00 : f32
      %cst_150 = arith.constant 6.000000e+00 : f32
      %298 = vector.broadcast %cst_149 : f32 to vector<16x24xf32>
      %299 = arith.maximumf %298, %297 : vector<16x24xf32>
      %300 = vector.broadcast %cst_150 : f32 to vector<16x24xf32>
      %301 = arith.minimumf %300, %299 : vector<16x24xf32>
      %c5 = arith.constant 5 : index
      %c2_151 = arith.constant 2 : index
      %c0_152 = arith.constant 0 : index
      %302 = vector.load %arg10[%c5, %c2_151, %c0_152] : memref<12x20x24xf32, #tpu.memory_space<vmem>>, vector<1x16x24xf32>
      %303 = vector.shape_cast %302 : vector<1x16x24xf32> to vector<16x24xf32>
      %304 = vector.shape_cast %301 : vector<16x24xf32> to vector<1x16x24xf32>
      tpu.vector_store %arg10[%c5, %c2_151, %c0_152], %304 {strides = array<i32>} : memref<12x20x24xf32, #tpu.memory_space<vmem>>, vector<1x16x24xf32>,
    } else {
    }
    %c6_i32 = arith.constant 6 : i32
    %48 = arith.addi %5, %c6_i32 : i32
    %c2_i32_29 = arith.constant 2 : i32
    %49 = arith.subi %48, %c2_i32_29 : i32
    %c0_i32_30 = arith.constant 0 : i32
    %50 = arith.cmpi sge, %49, %c0_i32_30 : i32
    %c16_i32_31 = arith.constant 16 : i32
    %51 = arith.cmpi slt, %49, %c16_i32_31 : i32
    %52 = arith.andi %50, %51 : i1
    %53 = arith.extui %52 : i1 to i32
    %c0_i32_32 = arith.constant 0 : i32
    %54 = arith.cmpi ne, %53, %c0_i32_32 : i32
    scf.if %54 {
      %c0_141 = arith.constant 0 : index
      %289 = arith.index_cast %49 : i32 to index
      %c0_142 = arith.constant 0 : index
      %c0_143 = arith.constant 0 : index
      %290 = vector.load %arg2[%c0_141, %289, %c0_142, %c0_143] : memref<1x16x16x4xf32, #tpu.memory_space<vmem>>, vector<1x1x16x4xf32>
      %291 = vector.shape_cast %290 : vector<1x1x16x4xf32> to vector<1x16x4xf32>
      %292 = vector.shape_cast %291 : vector<1x16x4xf32> to vector<16x4xf32>
      %c0_144 = arith.constant 0 : index
      %c0_145 = arith.constant 0 : index
      %293 = vector.load %arg3[%c0_144, %c0_145] : memref<4x24xf32, #tpu.memory_space<vmem>>, vector<4x24xf32>
      %cst_146 = arith.constant dense<0.000000e+00> : vector<16x24xf32>
      %294 = tpu.matmul %292, %293, %cst_146 {dimension_numbers = #tpu.dot_dimension_numbers<[1], [0], [0], [1], [0, 0, 1, 1], [], []>} : vector<16x4xf32>, vector<4x24xf32>, vector<16x24xf32> -> vector<16x24xf32>
      %c0_147 = arith.constant 0 : index
      %c0_148 = arith.constant 0 : index
      %295 = vector.load %arg4[%c0_147, %c0_148] : memref<1x24xf32, #tpu.memory_space<vmem>>, vector<1x24xf32>
      %296 = vector.broadcast %295 : vector<1x24xf32> to vector<16x24xf32>
      %297 = arith.addf %294, %296 : vector<16x24xf32>
      %cst_149 = arith.constant 0.000000e+00 : f32
      %cst_150 = arith.constant 6.000000e+00 : f32
      %298 = vector.broadcast %cst_149 : f32 to vector<16x24xf32>
      %299 = arith.maximumf %298, %297 : vector<16x24xf32>
      %300 = vector.broadcast %cst_150 : f32 to vector<16x24xf32>
      %301 = arith.minimumf %300, %299 : vector<16x24xf32>
      %c6 = arith.constant 6 : index
      %c2_151 = arith.constant 2 : index
      %c0_152 = arith.constant 0 : index
      %302 = vector.load %arg10[%c6, %c2_151, %c0_152] : memref<12x20x24xf32, #tpu.memory_space<vmem>>, vector<1x16x24xf32>
      %303 = vector.shape_cast %302 : vector<1x16x24xf32> to vector<16x24xf32>
      %304 = vector.shape_cast %301 : vector<16x24xf32> to vector<1x16x24xf32>
      tpu.vector_store %arg10[%c6, %c2_151, %c0_152], %304 {strides = array<i32>} : memref<12x20x24xf32, #tpu.memory_space<vmem>>, vector<1x16x24xf32>,
    } else {
    }
    %c7_i32 = arith.constant 7 : i32
    %55 = arith.addi %5, %c7_i32 : i32
    %c2_i32_33 = arith.constant 2 : i32
    %56 = arith.subi %55, %c2_i32_33 : i32
    %c0_i32_34 = arith.constant 0 : i32
    %57 = arith.cmpi sge, %56, %c0_i32_34 : i32
    %c16_i32_35 = arith.constant 16 : i32
    %58 = arith.cmpi slt, %56, %c16_i32_35 : i32
    %59 = arith.andi %57, %58 : i1
    %60 = arith.extui %59 : i1 to i32
    %c0_i32_36 = arith.constant 0 : i32
    %61 = arith.cmpi ne, %60, %c0_i32_36 : i32
    scf.if %61 {
      %c0_141 = arith.constant 0 : index
      %289 = arith.index_cast %56 : i32 to index
      %c0_142 = arith.constant 0 : index
      %c0_143 = arith.constant 0 : index
      %290 = vector.load %arg2[%c0_141, %289, %c0_142, %c0_143] : memref<1x16x16x4xf32, #tpu.memory_space<vmem>>, vector<1x1x16x4xf32>
      %291 = vector.shape_cast %290 : vector<1x1x16x4xf32> to vector<1x16x4xf32>
      %292 = vector.shape_cast %291 : vector<1x16x4xf32> to vector<16x4xf32>
      %c0_144 = arith.constant 0 : index
      %c0_145 = arith.constant 0 : index
      %293 = vector.load %arg3[%c0_144, %c0_145] : memref<4x24xf32, #tpu.memory_space<vmem>>, vector<4x24xf32>
      %cst_146 = arith.constant dense<0.000000e+00> : vector<16x24xf32>
      %294 = tpu.matmul %292, %293, %cst_146 {dimension_numbers = #tpu.dot_dimension_numbers<[1], [0], [0], [1], [0, 0, 1, 1], [], []>} : vector<16x4xf32>, vector<4x24xf32>, vector<16x24xf32> -> vector<16x24xf32>
      %c0_147 = arith.constant 0 : index
      %c0_148 = arith.constant 0 : index
      %295 = vector.load %arg4[%c0_147, %c0_148] : memref<1x24xf32, #tpu.memory_space<vmem>>, vector<1x24xf32>
      %296 = vector.broadcast %295 : vector<1x24xf32> to vector<16x24xf32>
      %297 = arith.addf %294, %296 : vector<16x24xf32>
      %cst_149 = arith.constant 0.000000e+00 : f32
      %cst_150 = arith.constant 6.000000e+00 : f32
      %298 = vector.broadcast %cst_149 : f32 to vector<16x24xf32>
      %299 = arith.maximumf %298, %297 : vector<16x24xf32>
      %300 = vector.broadcast %cst_150 : f32 to vector<16x24xf32>
      %301 = arith.minimumf %300, %299 : vector<16x24xf32>
      %c7 = arith.constant 7 : index
      %c2_151 = arith.constant 2 : index
      %c0_152 = arith.constant 0 : index
      %302 = vector.load %arg10[%c7, %c2_151, %c0_152] : memref<12x20x24xf32, #tpu.memory_space<vmem>>, vector<1x16x24xf32>
      %303 = vector.shape_cast %302 : vector<1x16x24xf32> to vector<16x24xf32>
      %304 = vector.shape_cast %301 : vector<16x24xf32> to vector<1x16x24xf32>
      tpu.vector_store %arg10[%c7, %c2_151, %c0_152], %304 {strides = array<i32>} : memref<12x20x24xf32, #tpu.memory_space<vmem>>, vector<1x16x24xf32>,
    } else {
    }
    %c8_i32_37 = arith.constant 8 : i32
    %62 = arith.addi %5, %c8_i32_37 : i32
    %c2_i32_38 = arith.constant 2 : i32
    %63 = arith.subi %62, %c2_i32_38 : i32
    %c0_i32_39 = arith.constant 0 : i32
    %64 = arith.cmpi sge, %63, %c0_i32_39 : i32
    %c16_i32_40 = arith.constant 16 : i32
    %65 = arith.cmpi slt, %63, %c16_i32_40 : i32
    %66 = arith.andi %64, %65 : i1
    %67 = arith.extui %66 : i1 to i32
    %c0_i32_41 = arith.constant 0 : i32
    %68 = arith.cmpi ne, %67, %c0_i32_41 : i32
    scf.if %68 {
      %c0_141 = arith.constant 0 : index
      %289 = arith.index_cast %63 : i32 to index
      %c0_142 = arith.constant 0 : index
      %c0_143 = arith.constant 0 : index
      %290 = vector.load %arg2[%c0_141, %289, %c0_142, %c0_143] : memref<1x16x16x4xf32, #tpu.memory_space<vmem>>, vector<1x1x16x4xf32>
      %291 = vector.shape_cast %290 : vector<1x1x16x4xf32> to vector<1x16x4xf32>
      %292 = vector.shape_cast %291 : vector<1x16x4xf32> to vector<16x4xf32>
      %c0_144 = arith.constant 0 : index
      %c0_145 = arith.constant 0 : index
      %293 = vector.load %arg3[%c0_144, %c0_145] : memref<4x24xf32, #tpu.memory_space<vmem>>, vector<4x24xf32>
      %cst_146 = arith.constant dense<0.000000e+00> : vector<16x24xf32>
      %294 = tpu.matmul %292, %293, %cst_146 {dimension_numbers = #tpu.dot_dimension_numbers<[1], [0], [0], [1], [0, 0, 1, 1], [], []>} : vector<16x4xf32>, vector<4x24xf32>, vector<16x24xf32> -> vector<16x24xf32>
      %c0_147 = arith.constant 0 : index
      %c0_148 = arith.constant 0 : index
      %295 = vector.load %arg4[%c0_147, %c0_148] : memref<1x24xf32, #tpu.memory_space<vmem>>, vector<1x24xf32>
      %296 = vector.broadcast %295 : vector<1x24xf32> to vector<16x24xf32>
      %297 = arith.addf %294, %296 : vector<16x24xf32>
      %cst_149 = arith.constant 0.000000e+00 : f32
      %cst_150 = arith.constant 6.000000e+00 : f32
      %298 = vector.broadcast %cst_149 : f32 to vector<16x24xf32>
      %299 = arith.maximumf %298, %297 : vector<16x24xf32>
      %300 = vector.broadcast %cst_150 : f32 to vector<16x24xf32>
      %301 = arith.minimumf %300, %299 : vector<16x24xf32>
      %c8 = arith.constant 8 : index
      %c2_151 = arith.constant 2 : index
      %c0_152 = arith.constant 0 : index
      %302 = vector.load %arg10[%c8, %c2_151, %c0_152] : memref<12x20x24xf32, #tpu.memory_space<vmem>>, vector<1x16x24xf32>
      %303 = vector.shape_cast %302 : vector<1x16x24xf32> to vector<16x24xf32>
      %304 = vector.shape_cast %301 : vector<16x24xf32> to vector<1x16x24xf32>
      tpu.vector_store %arg10[%c8, %c2_151, %c0_152], %304 {strides = array<i32>} : memref<12x20x24xf32, #tpu.memory_space<vmem>>, vector<1x16x24xf32>,
    } else {
    }
    %c9_i32 = arith.constant 9 : i32
    %69 = arith.addi %5, %c9_i32 : i32
    %c2_i32_42 = arith.constant 2 : i32
    %70 = arith.subi %69, %c2_i32_42 : i32
    %c0_i32_43 = arith.constant 0 : i32
    %71 = arith.cmpi sge, %70, %c0_i32_43 : i32
    %c16_i32_44 = arith.constant 16 : i32
    %72 = arith.cmpi slt, %70, %c16_i32_44 : i32
    %73 = arith.andi %71, %72 : i1
    %74 = arith.extui %73 : i1 to i32
    %c0_i32_45 = arith.constant 0 : i32
    %75 = arith.cmpi ne, %74, %c0_i32_45 : i32
    scf.if %75 {
      %c0_141 = arith.constant 0 : index
      %289 = arith.index_cast %70 : i32 to index
      %c0_142 = arith.constant 0 : index
      %c0_143 = arith.constant 0 : index
      %290 = vector.load %arg2[%c0_141, %289, %c0_142, %c0_143] : memref<1x16x16x4xf32, #tpu.memory_space<vmem>>, vector<1x1x16x4xf32>
      %291 = vector.shape_cast %290 : vector<1x1x16x4xf32> to vector<1x16x4xf32>
      %292 = vector.shape_cast %291 : vector<1x16x4xf32> to vector<16x4xf32>
      %c0_144 = arith.constant 0 : index
      %c0_145 = arith.constant 0 : index
      %293 = vector.load %arg3[%c0_144, %c0_145] : memref<4x24xf32, #tpu.memory_space<vmem>>, vector<4x24xf32>
      %cst_146 = arith.constant dense<0.000000e+00> : vector<16x24xf32>
      %294 = tpu.matmul %292, %293, %cst_146 {dimension_numbers = #tpu.dot_dimension_numbers<[1], [0], [0], [1], [0, 0, 1, 1], [], []>} : vector<16x4xf32>, vector<4x24xf32>, vector<16x24xf32> -> vector<16x24xf32>
      %c0_147 = arith.constant 0 : index
      %c0_148 = arith.constant 0 : index
      %295 = vector.load %arg4[%c0_147, %c0_148] : memref<1x24xf32, #tpu.memory_space<vmem>>, vector<1x24xf32>
      %296 = vector.broadcast %295 : vector<1x24xf32> to vector<16x24xf32>
      %297 = arith.addf %294, %296 : vector<16x24xf32>
      %cst_149 = arith.constant 0.000000e+00 : f32
      %cst_150 = arith.constant 6.000000e+00 : f32
      %298 = vector.broadcast %cst_149 : f32 to vector<16x24xf32>
      %299 = arith.maximumf %298, %297 : vector<16x24xf32>
      %300 = vector.broadcast %cst_150 : f32 to vector<16x24xf32>
      %301 = arith.minimumf %300, %299 : vector<16x24xf32>
      %c9 = arith.constant 9 : index
      %c2_151 = arith.constant 2 : index
      %c0_152 = arith.constant 0 : index
      %302 = vector.load %arg10[%c9, %c2_151, %c0_152] : memref<12x20x24xf32, #tpu.memory_space<vmem>>, vector<1x16x24xf32>
      %303 = vector.shape_cast %302 : vector<1x16x24xf32> to vector<16x24xf32>
      %304 = vector.shape_cast %301 : vector<16x24xf32> to vector<1x16x24xf32>
      tpu.vector_store %arg10[%c9, %c2_151, %c0_152], %304 {strides = array<i32>} : memref<12x20x24xf32, #tpu.memory_space<vmem>>, vector<1x16x24xf32>,
    } else {
    }
    %c10_i32 = arith.constant 10 : i32
    %76 = arith.addi %5, %c10_i32 : i32
    %c2_i32_46 = arith.constant 2 : i32
    %77 = arith.subi %76, %c2_i32_46 : i32
    %c0_i32_47 = arith.constant 0 : i32
    %78 = arith.cmpi sge, %77, %c0_i32_47 : i32
    %c16_i32_48 = arith.constant 16 : i32
    %79 = arith.cmpi slt, %77, %c16_i32_48 : i32
    %80 = arith.andi %78, %79 : i1
    %81 = arith.extui %80 : i1 to i32
    %c0_i32_49 = arith.constant 0 : i32
    %82 = arith.cmpi ne, %81, %c0_i32_49 : i32
    scf.if %82 {
      %c0_141 = arith.constant 0 : index
      %289 = arith.index_cast %77 : i32 to index
      %c0_142 = arith.constant 0 : index
      %c0_143 = arith.constant 0 : index
      %290 = vector.load %arg2[%c0_141, %289, %c0_142, %c0_143] : memref<1x16x16x4xf32, #tpu.memory_space<vmem>>, vector<1x1x16x4xf32>
      %291 = vector.shape_cast %290 : vector<1x1x16x4xf32> to vector<1x16x4xf32>
      %292 = vector.shape_cast %291 : vector<1x16x4xf32> to vector<16x4xf32>
      %c0_144 = arith.constant 0 : index
      %c0_145 = arith.constant 0 : index
      %293 = vector.load %arg3[%c0_144, %c0_145] : memref<4x24xf32, #tpu.memory_space<vmem>>, vector<4x24xf32>
      %cst_146 = arith.constant dense<0.000000e+00> : vector<16x24xf32>
      %294 = tpu.matmul %292, %293, %cst_146 {dimension_numbers = #tpu.dot_dimension_numbers<[1], [0], [0], [1], [0, 0, 1, 1], [], []>} : vector<16x4xf32>, vector<4x24xf32>, vector<16x24xf32> -> vector<16x24xf32>
      %c0_147 = arith.constant 0 : index
      %c0_148 = arith.constant 0 : index
      %295 = vector.load %arg4[%c0_147, %c0_148] : memref<1x24xf32, #tpu.memory_space<vmem>>, vector<1x24xf32>
      %296 = vector.broadcast %295 : vector<1x24xf32> to vector<16x24xf32>
      %297 = arith.addf %294, %296 : vector<16x24xf32>
      %cst_149 = arith.constant 0.000000e+00 : f32
      %cst_150 = arith.constant 6.000000e+00 : f32
      %298 = vector.broadcast %cst_149 : f32 to vector<16x24xf32>
      %299 = arith.maximumf %298, %297 : vector<16x24xf32>
      %300 = vector.broadcast %cst_150 : f32 to vector<16x24xf32>
      %301 = arith.minimumf %300, %299 : vector<16x24xf32>
      %c10 = arith.constant 10 : index
      %c2_151 = arith.constant 2 : index
      %c0_152 = arith.constant 0 : index
      %302 = vector.load %arg10[%c10, %c2_151, %c0_152] : memref<12x20x24xf32, #tpu.memory_space<vmem>>, vector<1x16x24xf32>
      %303 = vector.shape_cast %302 : vector<1x16x24xf32> to vector<16x24xf32>
      %304 = vector.shape_cast %301 : vector<16x24xf32> to vector<1x16x24xf32>
      tpu.vector_store %arg10[%c10, %c2_151, %c0_152], %304 {strides = array<i32>} : memref<12x20x24xf32, #tpu.memory_space<vmem>>, vector<1x16x24xf32>,
    } else {
    }
    %c11_i32 = arith.constant 11 : i32
    %83 = arith.addi %5, %c11_i32 : i32
    %c2_i32_50 = arith.constant 2 : i32
    %84 = arith.subi %83, %c2_i32_50 : i32
    %c0_i32_51 = arith.constant 0 : i32
    %85 = arith.cmpi sge, %84, %c0_i32_51 : i32
    %c16_i32_52 = arith.constant 16 : i32
    %86 = arith.cmpi slt, %84, %c16_i32_52 : i32
    %87 = arith.andi %85, %86 : i1
    %88 = arith.extui %87 : i1 to i32
    %c0_i32_53 = arith.constant 0 : i32
    %89 = arith.cmpi ne, %88, %c0_i32_53 : i32
    scf.if %89 {
      %c0_141 = arith.constant 0 : index
      %289 = arith.index_cast %84 : i32 to index
      %c0_142 = arith.constant 0 : index
      %c0_143 = arith.constant 0 : index
      %290 = vector.load %arg2[%c0_141, %289, %c0_142, %c0_143] : memref<1x16x16x4xf32, #tpu.memory_space<vmem>>, vector<1x1x16x4xf32>
      %291 = vector.shape_cast %290 : vector<1x1x16x4xf32> to vector<1x16x4xf32>
      %292 = vector.shape_cast %291 : vector<1x16x4xf32> to vector<16x4xf32>
      %c0_144 = arith.constant 0 : index
      %c0_145 = arith.constant 0 : index
      %293 = vector.load %arg3[%c0_144, %c0_145] : memref<4x24xf32, #tpu.memory_space<vmem>>, vector<4x24xf32>
      %cst_146 = arith.constant dense<0.000000e+00> : vector<16x24xf32>
      %294 = tpu.matmul %292, %293, %cst_146 {dimension_numbers = #tpu.dot_dimension_numbers<[1], [0], [0], [1], [0, 0, 1, 1], [], []>} : vector<16x4xf32>, vector<4x24xf32>, vector<16x24xf32> -> vector<16x24xf32>
      %c0_147 = arith.constant 0 : index
      %c0_148 = arith.constant 0 : index
      %295 = vector.load %arg4[%c0_147, %c0_148] : memref<1x24xf32, #tpu.memory_space<vmem>>, vector<1x24xf32>
      %296 = vector.broadcast %295 : vector<1x24xf32> to vector<16x24xf32>
      %297 = arith.addf %294, %296 : vector<16x24xf32>
      %cst_149 = arith.constant 0.000000e+00 : f32
      %cst_150 = arith.constant 6.000000e+00 : f32
      %298 = vector.broadcast %cst_149 : f32 to vector<16x24xf32>
      %299 = arith.maximumf %298, %297 : vector<16x24xf32>
      %300 = vector.broadcast %cst_150 : f32 to vector<16x24xf32>
      %301 = arith.minimumf %300, %299 : vector<16x24xf32>
      %c11 = arith.constant 11 : index
      %c2_151 = arith.constant 2 : index
      %c0_152 = arith.constant 0 : index
      %302 = vector.load %arg10[%c11, %c2_151, %c0_152] : memref<12x20x24xf32, #tpu.memory_space<vmem>>, vector<1x16x24xf32>
      %303 = vector.shape_cast %302 : vector<1x16x24xf32> to vector<16x24xf32>
      %304 = vector.shape_cast %301 : vector<16x24xf32> to vector<1x16x24xf32>
      tpu.vector_store %arg10[%c11, %c2_151, %c0_152], %304 {strides = array<i32>} : memref<12x20x24xf32, #tpu.memory_space<vmem>>, vector<1x16x24xf32>,
    } else {
    }
    %cst_54 = arith.constant 0.000000e+00 : f32
    %90 = vector.broadcast %cst_54 : f32 to vector<8x16x24xf32>
    %c0_55 = arith.constant 0 : index
    %c0_56 = arith.constant 0 : index
    %c0_57 = arith.constant 0 : index
    %91 = vector.load %arg10[%c0_55, %c0_56, %c0_57] : memref<12x20x24xf32, #tpu.memory_space<vmem>>, vector<8x16x24xf32>
    %92 = vector.extract_strided_slice %0 {offsets = [0, 0], sizes = [1, 24], strides = [1, 1]} : vector<25x24xf32> to vector<1x24xf32>
    %93 = vector.shape_cast %92 : vector<1x24xf32> to vector<24xf32>
    %94 = vector.shape_cast %93 : vector<24xf32> to vector<1x1x24xf32>
    %95 = vector.broadcast %94 : vector<1x1x24xf32> to vector<8x16x24xf32>
    %96 = arith.mulf %91, %95 : vector<8x16x24xf32>
    %97 = arith.addf %90, %96 : vector<8x16x24xf32>
    %c0_58 = arith.constant 0 : index
    %c1 = arith.constant 1 : index
    %c0_59 = arith.constant 0 : index
    %98 = vector.load %arg10[%c0_58, %c1, %c0_59] : memref<12x20x24xf32, #tpu.memory_space<vmem>>, vector<8x16x24xf32>
    %99 = vector.extract_strided_slice %0 {offsets = [1, 0], sizes = [1, 24], strides = [1, 1]} : vector<25x24xf32> to vector<1x24xf32>
    %100 = vector.shape_cast %99 : vector<1x24xf32> to vector<24xf32>
    %101 = vector.shape_cast %100 : vector<24xf32> to vector<1x1x24xf32>
    %102 = vector.broadcast %101 : vector<1x1x24xf32> to vector<8x16x24xf32>
    %103 = arith.mulf %98, %102 : vector<8x16x24xf32>
    %104 = arith.addf %97, %103 : vector<8x16x24xf32>
    %c0_60 = arith.constant 0 : index
    %c2 = arith.constant 2 : index
    %c0_61 = arith.constant 0 : index
    %105 = vector.load %arg10[%c0_60, %c2, %c0_61] : memref<12x20x24xf32, #tpu.memory_space<vmem>>, vector<8x16x24xf32>
    %106 = vector.extract_strided_slice %0 {offsets = [2, 0], sizes = [1, 24], strides = [1, 1]} : vector<25x24xf32> to vector<1x24xf32>
    %107 = vector.shape_cast %106 : vector<1x24xf32> to vector<24xf32>
    %108 = vector.shape_cast %107 : vector<24xf32> to vector<1x1x24xf32>
    %109 = vector.broadcast %108 : vector<1x1x24xf32> to vector<8x16x24xf32>
    %110 = arith.mulf %105, %109 : vector<8x16x24xf32>
    %111 = arith.addf %104, %110 : vector<8x16x24xf32>
    %c0_62 = arith.constant 0 : index
    %c3 = arith.constant 3 : index
    %c0_63 = arith.constant 0 : index
    %112 = vector.load %arg10[%c0_62, %c3, %c0_63] : memref<12x20x24xf32, #tpu.memory_space<vmem>>, vector<8x16x24xf32>
    %113 = vector.extract_strided_slice %0 {offsets = [3, 0], sizes = [1, 24], strides = [1, 1]} : vector<25x24xf32> to vector<1x24xf32>
    %114 = vector.shape_cast %113 : vector<1x24xf32> to vector<24xf32>
    %115 = vector.shape_cast %114 : vector<24xf32> to vector<1x1x24xf32>
    %116 = vector.broadcast %115 : vector<1x1x24xf32> to vector<8x16x24xf32>
    %117 = arith.mulf %112, %116 : vector<8x16x24xf32>
    %118 = arith.addf %111, %117 : vector<8x16x24xf32>
    %c0_64 = arith.constant 0 : index
    %c4 = arith.constant 4 : index
    %c0_65 = arith.constant 0 : index
    %119 = vector.load %arg10[%c0_64, %c4, %c0_65] : memref<12x20x24xf32, #tpu.memory_space<vmem>>, vector<8x16x24xf32>
    %120 = vector.extract_strided_slice %0 {offsets = [4, 0], sizes = [1, 24], strides = [1, 1]} : vector<25x24xf32> to vector<1x24xf32>
    %121 = vector.shape_cast %120 : vector<1x24xf32> to vector<24xf32>
    %122 = vector.shape_cast %121 : vector<24xf32> to vector<1x1x24xf32>
    %123 = vector.broadcast %122 : vector<1x1x24xf32> to vector<8x16x24xf32>
    %124 = arith.mulf %119, %123 : vector<8x16x24xf32>
    %125 = arith.addf %118, %124 : vector<8x16x24xf32>
    %c1_66 = arith.constant 1 : index
    %c0_67 = arith.constant 0 : index
    %c0_68 = arith.constant 0 : index
    %126 = vector.load %arg10[%c1_66, %c0_67, %c0_68] : memref<12x20x24xf32, #tpu.memory_space<vmem>>, vector<8x16x24xf32>
    %127 = vector.extract_strided_slice %0 {offsets = [5, 0], sizes = [1, 24], strides = [1, 1]} : vector<25x24xf32> to vector<1x24xf32>
    %128 = vector.shape_cast %127 : vector<1x24xf32> to vector<24xf32>
    %129 = vector.shape_cast %128 : vector<24xf32> to vector<1x1x24xf32>
    %130 = vector.broadcast %129 : vector<1x1x24xf32> to vector<8x16x24xf32>
    %131 = arith.mulf %126, %130 : vector<8x16x24xf32>
    %132 = arith.addf %125, %131 : vector<8x16x24xf32>
    %c1_69 = arith.constant 1 : index
    %c1_70 = arith.constant 1 : index
    %c0_71 = arith.constant 0 : index
    %133 = vector.load %arg10[%c1_69, %c1_70, %c0_71] : memref<12x20x24xf32, #tpu.memory_space<vmem>>, vector<8x16x24xf32>
    %134 = vector.extract_strided_slice %0 {offsets = [6, 0], sizes = [1, 24], strides = [1, 1]} : vector<25x24xf32> to vector<1x24xf32>
    %135 = vector.shape_cast %134 : vector<1x24xf32> to vector<24xf32>
    %136 = vector.shape_cast %135 : vector<24xf32> to vector<1x1x24xf32>
    %137 = vector.broadcast %136 : vector<1x1x24xf32> to vector<8x16x24xf32>
    %138 = arith.mulf %133, %137 : vector<8x16x24xf32>
    %139 = arith.addf %132, %138 : vector<8x16x24xf32>
    %c1_72 = arith.constant 1 : index
    %c2_73 = arith.constant 2 : index
    %c0_74 = arith.constant 0 : index
    %140 = vector.load %arg10[%c1_72, %c2_73, %c0_74] : memref<12x20x24xf32, #tpu.memory_space<vmem>>, vector<8x16x24xf32>
    %141 = vector.extract_strided_slice %0 {offsets = [7, 0], sizes = [1, 24], strides = [1, 1]} : vector<25x24xf32> to vector<1x24xf32>
    %142 = vector.shape_cast %141 : vector<1x24xf32> to vector<24xf32>
    %143 = vector.shape_cast %142 : vector<24xf32> to vector<1x1x24xf32>
    %144 = vector.broadcast %143 : vector<1x1x24xf32> to vector<8x16x24xf32>
    %145 = arith.mulf %140, %144 : vector<8x16x24xf32>
    %146 = arith.addf %139, %145 : vector<8x16x24xf32>
    %c1_75 = arith.constant 1 : index
    %c3_76 = arith.constant 3 : index
    %c0_77 = arith.constant 0 : index
    %147 = vector.load %arg10[%c1_75, %c3_76, %c0_77] : memref<12x20x24xf32, #tpu.memory_space<vmem>>, vector<8x16x24xf32>
    %148 = vector.extract_strided_slice %0 {offsets = [8, 0], sizes = [1, 24], strides = [1, 1]} : vector<25x24xf32> to vector<1x24xf32>
    %149 = vector.shape_cast %148 : vector<1x24xf32> to vector<24xf32>
    %150 = vector.shape_cast %149 : vector<24xf32> to vector<1x1x24xf32>
    %151 = vector.broadcast %150 : vector<1x1x24xf32> to vector<8x16x24xf32>
    %152 = arith.mulf %147, %151 : vector<8x16x24xf32>
    %153 = arith.addf %146, %152 : vector<8x16x24xf32>
    %c1_78 = arith.constant 1 : index
    %c4_79 = arith.constant 4 : index
    %c0_80 = arith.constant 0 : index
    %154 = vector.load %arg10[%c1_78, %c4_79, %c0_80] : memref<12x20x24xf32, #tpu.memory_space<vmem>>, vector<8x16x24xf32>
    %155 = vector.extract_strided_slice %0 {offsets = [9, 0], sizes = [1, 24], strides = [1, 1]} : vector<25x24xf32> to vector<1x24xf32>
    %156 = vector.shape_cast %155 : vector<1x24xf32> to vector<24xf32>
    %157 = vector.shape_cast %156 : vector<24xf32> to vector<1x1x24xf32>
    %158 = vector.broadcast %157 : vector<1x1x24xf32> to vector<8x16x24xf32>
    %159 = arith.mulf %154, %158 : vector<8x16x24xf32>
    %160 = arith.addf %153, %159 : vector<8x16x24xf32>
    %c2_81 = arith.constant 2 : index
    %c0_82 = arith.constant 0 : index
    %c0_83 = arith.constant 0 : index
    %161 = vector.load %arg10[%c2_81, %c0_82, %c0_83] : memref<12x20x24xf32, #tpu.memory_space<vmem>>, vector<8x16x24xf32>
    %162 = vector.extract_strided_slice %0 {offsets = [10, 0], sizes = [1, 24], strides = [1, 1]} : vector<25x24xf32> to vector<1x24xf32>
    %163 = vector.shape_cast %162 : vector<1x24xf32> to vector<24xf32>
    %164 = vector.shape_cast %163 : vector<24xf32> to vector<1x1x24xf32>
    %165 = vector.broadcast %164 : vector<1x1x24xf32> to vector<8x16x24xf32>
    %166 = arith.mulf %161, %165 : vector<8x16x24xf32>
    %167 = arith.addf %160, %166 : vector<8x16x24xf32>
    %c2_84 = arith.constant 2 : index
    %c1_85 = arith.constant 1 : index
    %c0_86 = arith.constant 0 : index
    %168 = vector.load %arg10[%c2_84, %c1_85, %c0_86] : memref<12x20x24xf32, #tpu.memory_space<vmem>>, vector<8x16x24xf32>
    %169 = vector.extract_strided_slice %0 {offsets = [11, 0], sizes = [1, 24], strides = [1, 1]} : vector<25x24xf32> to vector<1x24xf32>
    %170 = vector.shape_cast %169 : vector<1x24xf32> to vector<24xf32>
    %171 = vector.shape_cast %170 : vector<24xf32> to vector<1x1x24xf32>
    %172 = vector.broadcast %171 : vector<1x1x24xf32> to vector<8x16x24xf32>
    %173 = arith.mulf %168, %172 : vector<8x16x24xf32>
    %174 = arith.addf %167, %173 : vector<8x16x24xf32>
    %c2_87 = arith.constant 2 : index
    %c2_88 = arith.constant 2 : index
    %c0_89 = arith.constant 0 : index
    %175 = vector.load %arg10[%c2_87, %c2_88, %c0_89] : memref<12x20x24xf32, #tpu.memory_space<vmem>>, vector<8x16x24xf32>
    %176 = vector.extract_strided_slice %0 {offsets = [12, 0], sizes = [1, 24], strides = [1, 1]} : vector<25x24xf32> to vector<1x24xf32>
    %177 = vector.shape_cast %176 : vector<1x24xf32> to vector<24xf32>
    %178 = vector.shape_cast %177 : vector<24xf32> to vector<1x1x24xf32>
    %179 = vector.broadcast %178 : vector<1x1x24xf32> to vector<8x16x24xf32>
    %180 = arith.mulf %175, %179 : vector<8x16x24xf32>
    %181 = arith.addf %174, %180 : vector<8x16x24xf32>
    %c2_90 = arith.constant 2 : index
    %c3_91 = arith.constant 3 : index
    %c0_92 = arith.constant 0 : index
    %182 = vector.load %arg10[%c2_90, %c3_91, %c0_92] : memref<12x20x24xf32, #tpu.memory_space<vmem>>, vector<8x16x24xf32>
    %183 = vector.extract_strided_slice %0 {offsets = [13, 0], sizes = [1, 24], strides = [1, 1]} : vector<25x24xf32> to vector<1x24xf32>
    %184 = vector.shape_cast %183 : vector<1x24xf32> to vector<24xf32>
    %185 = vector.shape_cast %184 : vector<24xf32> to vector<1x1x24xf32>
    %186 = vector.broadcast %185 : vector<1x1x24xf32> to vector<8x16x24xf32>
    %187 = arith.mulf %182, %186 : vector<8x16x24xf32>
    %188 = arith.addf %181, %187 : vector<8x16x24xf32>
    %c2_93 = arith.constant 2 : index
    %c4_94 = arith.constant 4 : index
    %c0_95 = arith.constant 0 : index
    %189 = vector.load %arg10[%c2_93, %c4_94, %c0_95] : memref<12x20x24xf32, #tpu.memory_space<vmem>>, vector<8x16x24xf32>
    %190 = vector.extract_strided_slice %0 {offsets = [14, 0], sizes = [1, 24], strides = [1, 1]} : vector<25x24xf32> to vector<1x24xf32>
    %191 = vector.shape_cast %190 : vector<1x24xf32> to vector<24xf32>
    %192 = vector.shape_cast %191 : vector<24xf32> to vector<1x1x24xf32>
    %193 = vector.broadcast %192 : vector<1x1x24xf32> to vector<8x16x24xf32>
    %194 = arith.mulf %189, %193 : vector<8x16x24xf32>
    %195 = arith.addf %188, %194 : vector<8x16x24xf32>
    %c3_96 = arith.constant 3 : index
    %c0_97 = arith.constant 0 : index
    %c0_98 = arith.constant 0 : index
    %196 = vector.load %arg10[%c3_96, %c0_97, %c0_98] : memref<12x20x24xf32, #tpu.memory_space<vmem>>, vector<8x16x24xf32>
    %197 = vector.extract_strided_slice %0 {offsets = [15, 0], sizes = [1, 24], strides = [1, 1]} : vector<25x24xf32> to vector<1x24xf32>
    %198 = vector.shape_cast %197 : vector<1x24xf32> to vector<24xf32>
    %199 = vector.shape_cast %198 : vector<24xf32> to vector<1x1x24xf32>
    %200 = vector.broadcast %199 : vector<1x1x24xf32> to vector<8x16x24xf32>
    %201 = arith.mulf %196, %200 : vector<8x16x24xf32>
    %202 = arith.addf %195, %201 : vector<8x16x24xf32>
    %c3_99 = arith.constant 3 : index
    %c1_100 = arith.constant 1 : index
    %c0_101 = arith.constant 0 : index
    %203 = vector.load %arg10[%c3_99, %c1_100, %c0_101] : memref<12x20x24xf32, #tpu.memory_space<vmem>>, vector<8x16x24xf32>
    %204 = vector.extract_strided_slice %0 {offsets = [16, 0], sizes = [1, 24], strides = [1, 1]} : vector<25x24xf32> to vector<1x24xf32>
    %205 = vector.shape_cast %204 : vector<1x24xf32> to vector<24xf32>
    %206 = vector.shape_cast %205 : vector<24xf32> to vector<1x1x24xf32>
    %207 = vector.broadcast %206 : vector<1x1x24xf32> to vector<8x16x24xf32>
    %208 = arith.mulf %203, %207 : vector<8x16x24xf32>
    %209 = arith.addf %202, %208 : vector<8x16x24xf32>
    %c3_102 = arith.constant 3 : index
    %c2_103 = arith.constant 2 : index
    %c0_104 = arith.constant 0 : index
    %210 = vector.load %arg10[%c3_102, %c2_103, %c0_104] : memref<12x20x24xf32, #tpu.memory_space<vmem>>, vector<8x16x24xf32>
    %211 = vector.extract_strided_slice %0 {offsets = [17, 0], sizes = [1, 24], strides = [1, 1]} : vector<25x24xf32> to vector<1x24xf32>
    %212 = vector.shape_cast %211 : vector<1x24xf32> to vector<24xf32>
    %213 = vector.shape_cast %212 : vector<24xf32> to vector<1x1x24xf32>
    %214 = vector.broadcast %213 : vector<1x1x24xf32> to vector<8x16x24xf32>
    %215 = arith.mulf %210, %214 : vector<8x16x24xf32>
    %216 = arith.addf %209, %215 : vector<8x16x24xf32>
    %c3_105 = arith.constant 3 : index
    %c3_106 = arith.constant 3 : index
    %c0_107 = arith.constant 0 : index
    %217 = vector.load %arg10[%c3_105, %c3_106, %c0_107] : memref<12x20x24xf32, #tpu.memory_space<vmem>>, vector<8x16x24xf32>
    %218 = vector.extract_strided_slice %0 {offsets = [18, 0], sizes = [1, 24], strides = [1, 1]} : vector<25x24xf32> to vector<1x24xf32>
    %219 = vector.shape_cast %218 : vector<1x24xf32> to vector<24xf32>
    %220 = vector.shape_cast %219 : vector<24xf32> to vector<1x1x24xf32>
    %221 = vector.broadcast %220 : vector<1x1x24xf32> to vector<8x16x24xf32>
    %222 = arith.mulf %217, %221 : vector<8x16x24xf32>
    %223 = arith.addf %216, %222 : vector<8x16x24xf32>
    %c3_108 = arith.constant 3 : index
    %c4_109 = arith.constant 4 : index
    %c0_110 = arith.constant 0 : index
    %224 = vector.load %arg10[%c3_108, %c4_109, %c0_110] : memref<12x20x24xf32, #tpu.memory_space<vmem>>, vector<8x16x24xf32>
    %225 = vector.extract_strided_slice %0 {offsets = [19, 0], sizes = [1, 24], strides = [1, 1]} : vector<25x24xf32> to vector<1x24xf32>
    %226 = vector.shape_cast %225 : vector<1x24xf32> to vector<24xf32>
    %227 = vector.shape_cast %226 : vector<24xf32> to vector<1x1x24xf32>
    %228 = vector.broadcast %227 : vector<1x1x24xf32> to vector<8x16x24xf32>
    %229 = arith.mulf %224, %228 : vector<8x16x24xf32>
    %230 = arith.addf %223, %229 : vector<8x16x24xf32>
    %c4_111 = arith.constant 4 : index
    %c0_112 = arith.constant 0 : index
    %c0_113 = arith.constant 0 : index
    %231 = vector.load %arg10[%c4_111, %c0_112, %c0_113] : memref<12x20x24xf32, #tpu.memory_space<vmem>>, vector<8x16x24xf32>
    %232 = vector.extract_strided_slice %0 {offsets = [20, 0], sizes = [1, 24], strides = [1, 1]} : vector<25x24xf32> to vector<1x24xf32>
    %233 = vector.shape_cast %232 : vector<1x24xf32> to vector<24xf32>
    %234 = vector.shape_cast %233 : vector<24xf32> to vector<1x1x24xf32>
    %235 = vector.broadcast %234 : vector<1x1x24xf32> to vector<8x16x24xf32>
    %236 = arith.mulf %231, %235 : vector<8x16x24xf32>
    %237 = arith.addf %230, %236 : vector<8x16x24xf32>
    %c4_114 = arith.constant 4 : index
    %c1_115 = arith.constant 1 : index
    %c0_116 = arith.constant 0 : index
    %238 = vector.load %arg10[%c4_114, %c1_115, %c0_116] : memref<12x20x24xf32, #tpu.memory_space<vmem>>, vector<8x16x24xf32>
    %239 = vector.extract_strided_slice %0 {offsets = [21, 0], sizes = [1, 24], strides = [1, 1]} : vector<25x24xf32> to vector<1x24xf32>
    %240 = vector.shape_cast %239 : vector<1x24xf32> to vector<24xf32>
    %241 = vector.shape_cast %240 : vector<24xf32> to vector<1x1x24xf32>
    %242 = vector.broadcast %241 : vector<1x1x24xf32> to vector<8x16x24xf32>
    %243 = arith.mulf %238, %242 : vector<8x16x24xf32>
    %244 = arith.addf %237, %243 : vector<8x16x24xf32>
    %c4_117 = arith.constant 4 : index
    %c2_118 = arith.constant 2 : index
    %c0_119 = arith.constant 0 : index
    %245 = vector.load %arg10[%c4_117, %c2_118, %c0_119] : memref<12x20x24xf32, #tpu.memory_space<vmem>>, vector<8x16x24xf32>
    %246 = vector.extract_strided_slice %0 {offsets = [22, 0], sizes = [1, 24], strides = [1, 1]} : vector<25x24xf32> to vector<1x24xf32>
    %247 = vector.shape_cast %246 : vector<1x24xf32> to vector<24xf32>
    %248 = vector.shape_cast %247 : vector<24xf32> to vector<1x1x24xf32>
    %249 = vector.broadcast %248 : vector<1x1x24xf32> to vector<8x16x24xf32>
    %250 = arith.mulf %245, %249 : vector<8x16x24xf32>
    %251 = arith.addf %244, %250 : vector<8x16x24xf32>
    %c4_120 = arith.constant 4 : index
    %c3_121 = arith.constant 3 : index
    %c0_122 = arith.constant 0 : index
    %252 = vector.load %arg10[%c4_120, %c3_121, %c0_122] : memref<12x20x24xf32, #tpu.memory_space<vmem>>, vector<8x16x24xf32>
    %253 = vector.extract_strided_slice %0 {offsets = [23, 0], sizes = [1, 24], strides = [1, 1]} : vector<25x24xf32> to vector<1x24xf32>
    %254 = vector.shape_cast %253 : vector<1x24xf32> to vector<24xf32>
    %255 = vector.shape_cast %254 : vector<24xf32> to vector<1x1x24xf32>
    %256 = vector.broadcast %255 : vector<1x1x24xf32> to vector<8x16x24xf32>
    %257 = arith.mulf %252, %256 : vector<8x16x24xf32>
    %258 = arith.addf %251, %257 : vector<8x16x24xf32>
    %c4_123 = arith.constant 4 : index
    %c4_124 = arith.constant 4 : index
    %c0_125 = arith.constant 0 : index
    %259 = vector.load %arg10[%c4_123, %c4_124, %c0_125] : memref<12x20x24xf32, #tpu.memory_space<vmem>>, vector<8x16x24xf32>
    %260 = vector.extract_strided_slice %0 {offsets = [24, 0], sizes = [1, 24], strides = [1, 1]} : vector<25x24xf32> to vector<1x24xf32>
    %261 = vector.shape_cast %260 : vector<1x24xf32> to vector<24xf32>
    %262 = vector.shape_cast %261 : vector<24xf32> to vector<1x1x24xf32>
    %263 = vector.broadcast %262 : vector<1x1x24xf32> to vector<8x16x24xf32>
    %264 = arith.mulf %259, %263 : vector<8x16x24xf32>
    %265 = arith.addf %258, %264 : vector<8x16x24xf32>
    %266 = vector.shape_cast %2 : vector<24xf32> to vector<1x1x24xf32>
    %267 = vector.broadcast %266 : vector<1x1x24xf32> to vector<8x16x24xf32>
    %268 = arith.addf %265, %267 : vector<8x16x24xf32>
    %cst_126 = arith.constant 0.000000e+00 : f32
    %cst_127 = arith.constant 6.000000e+00 : f32
    %269 = vector.broadcast %cst_126 : f32 to vector<8x16x24xf32>
    %270 = arith.maximumf %269, %268 : vector<8x16x24xf32>
    %271 = vector.broadcast %cst_127 : f32 to vector<8x16x24xf32>
    %272 = arith.minimumf %271, %270 : vector<8x16x24xf32>
    %273 = vector.shape_cast %272 : vector<8x16x24xf32> to vector<128x24xf32>
    %c0_128 = arith.constant 0 : index
    %c0_129 = arith.constant 0 : index
    %274 = vector.load %arg7[%c0_128, %c0_129] : memref<24x4xf32, #tpu.memory_space<vmem>>, vector<24x4xf32>
    %cst_130 = arith.constant dense<0.000000e+00> : vector<128x4xf32>
    %275 = tpu.matmul %273, %274, %cst_130 {dimension_numbers = #tpu.dot_dimension_numbers<[1], [0], [0], [1], [0, 0, 1, 1], [], []>} : vector<128x24xf32>, vector<24x4xf32>, vector<128x4xf32> -> vector<128x4xf32>
    %c0_131 = arith.constant 0 : index
    %c0_132 = arith.constant 0 : index
    %276 = vector.load %arg8[%c0_131, %c0_132] : memref<1x4xf32, #tpu.memory_space<vmem>>, vector<1x4xf32>
    %277 = vector.broadcast %276 : vector<1x4xf32> to vector<128x4xf32>
    %278 = arith.addf %275, %277 : vector<128x4xf32>
    %279 = vector.shape_cast %278 : vector<128x4xf32> to vector<8x16x4xf32>
    %c8_i32_133 = arith.constant 8 : i32
    %280 = arith.muli %arg1, %c8_i32_133 : i32
    %281 = tpu.assume_multiple %280, 8 : i32
    %c0_134 = arith.constant 0 : index
    %282 = arith.index_cast %281 : i32 to index
    %c0_135 = arith.constant 0 : index
    %c0_136 = arith.constant 0 : index
    %283 = vector.load %arg2[%c0_134, %282, %c0_135, %c0_136] : memref<1x16x16x4xf32, #tpu.memory_space<vmem>>, vector<1x8x16x4xf32>
    %284 = vector.shape_cast %283 : vector<1x8x16x4xf32> to vector<8x16x4xf32>
    %285 = arith.addf %279, %284 : vector<8x16x4xf32>
    %c0_137 = arith.constant 0 : index
    %c0_138 = arith.constant 0 : index
    %c0_139 = arith.constant 0 : index
    %c0_140 = arith.constant 0 : index
    %286 = vector.load %arg9[%c0_137, %c0_138, %c0_139, %c0_140] : memref<1x8x16x4xf32, #tpu.memory_space<vmem>>, vector<1x8x16x4xf32>
    %287 = vector.shape_cast %286 : vector<1x8x16x4xf32> to vector<8x16x4xf32>
    %288 = vector.shape_cast %285 : vector<8x16x4xf32> to vector<1x8x16x4xf32>
    tpu.vector_store %arg9[%c0_137, %c0_138, %c0_139, %c0_140], %288 {strides = array<i32>} : memref<1x8x16x4xf32, #tpu.memory_space<vmem>>, vector<1x8x16x4xf32>,
    return
  }
  func.func @transform_0(%arg0: i32, %arg1: i32) -> (i32, i32, i32, i32) {
    %c0_i32 = arith.constant 0 : i32
    %c0_i32_0 = arith.constant 0 : i32
    %c0_i32_1 = arith.constant 0 : i32
    %c0_i32_2 = arith.constant 0 : i32
    return %arg0, %c0_i32, %c0_i32_0, %c0_i32_1 : i32, i32, i32, i32
  }
  func.func @transform_1(%arg0: i32, %arg1: i32) -> (i32, i32) {
    %c0_i32 = arith.constant 0 : i32
    %c0_i32_0 = arith.constant 0 : i32
    %c0_i32_1 = arith.constant 0 : i32
    return %c0_i32, %c0_i32_0 : i32, i32
  }
  func.func @transform_2(%arg0: i32, %arg1: i32) -> (i32, i32) {
    %c0_i32 = arith.constant 0 : i32
    %c0_i32_0 = arith.constant 0 : i32
    %c0_i32_1 = arith.constant 0 : i32
    return %c0_i32, %c0_i32_0 : i32, i32
  }
  func.func @transform_3(%arg0: i32, %arg1: i32) -> (i32, i32) {
    %c0_i32 = arith.constant 0 : i32
    %c0_i32_0 = arith.constant 0 : i32
    %c0_i32_1 = arith.constant 0 : i32
    return %c0_i32, %c0_i32_0 : i32, i32
  }
  func.func @transform_4(%arg0: i32, %arg1: i32) -> (i32, i32) {
    %c0_i32 = arith.constant 0 : i32
    %c0_i32_0 = arith.constant 0 : i32
    %c0_i32_1 = arith.constant 0 : i32
    return %c0_i32, %c0_i32_0 : i32, i32
  }
  func.func @transform_5(%arg0: i32, %arg1: i32) -> (i32, i32) {
    %c0_i32 = arith.constant 0 : i32
    %c0_i32_0 = arith.constant 0 : i32
    %c0_i32_1 = arith.constant 0 : i32
    return %c0_i32, %c0_i32_0 : i32, i32
  }
  func.func @transform_6(%arg0: i32, %arg1: i32) -> (i32, i32) {
    %c0_i32 = arith.constant 0 : i32
    %c0_i32_0 = arith.constant 0 : i32
    %c0_i32_1 = arith.constant 0 : i32
    return %c0_i32, %c0_i32_0 : i32, i32
  }
  func.func @transform_7(%arg0: i32, %arg1: i32) -> (i32, i32, i32, i32) {
    %c0_i32 = arith.constant 0 : i32
    %c0_i32_0 = arith.constant 0 : i32
    %c0_i32_1 = arith.constant 0 : i32
    return %arg0, %arg1, %c0_i32, %c0_i32_0 : i32, i32, i32, i32
  }
}

</mosaic_0001>

<bundles_post_ra>
// kernel: squeeze.4
= control target key start
LH: loop header
LB: loop body
LE: loop exit
PB: predicated region body
PF: predicated region fallthrough
CT: control target
= control target key end

     0   :  { %vm3_vm0 = vcmask 195584   ;;  %s73_s0 = inlined_call_operand.vmem [shape: f32[24,5,5], index: 0, kind: input, shape index: {}]   ;;  %s74_s1 = inlined_call_operand.vmem [shape: f32[24,25], index: 1, kind: output, shape index: {}]  }
   0x1   :  { %v2_v0 = vld [vmem:[%s73_s0] sm:$0x1f]   ;;  %v25_v1 = vld [vmem:[%s73_s0 + $0x8] sm:$0x1f]   ;;  %v27_v2 = vld [vmem:[%s73_s0 + $0x10] sm:$0x1f]  }
   0x2   :  { %4 = vst.msk [vmem:[%s74_s1] sm:$0x1f] %vm3_vm0, %v2_v0   ;;  %26 = vst.msk [vmem:[%s74_s1 + $0x5] sm:$0x1f] %vm3_vm0, %v25_v1   ;;  %v29_v3 = vld [vmem:[%s73_s0 + $0x18] sm:$0x1f]  }
   0x3   :  { %28 = vst.msk [vmem:[%s74_s1 + $0xa] sm:$0x1f] %vm3_vm0, %v27_v2   ;;  %v31_v4 = vld [vmem:[%s73_s0 + $0x20] sm:$0x1f]   ;;  %30 = vst.msk [vmem:[%s74_s1 + $0xf] sm:$0x1f] %vm3_vm0, %v29_v3  }
   0x4   :  { %32 = vst.msk [vmem:[%s74_s1 + $0x14] sm:$0x1f] %vm3_vm0, %v31_v4  }

// kernel: _lambda_.1
= control target key start
LH: loop header
LB: loop body
LE: loop exit
PB: predicated region body
PF: predicated region fallthrough
CT: control target
= control target key end

     0   :  { %s3856_s24 = smov 0   ;;  %s3858_s25 = smov 0   ;;  %s5529_s0 = inlined_call_operand.vmem [shape: f32[2,16,16,4], index: 0, kind: input, shape index: {}]   ;;  %s5530_s1 = inlined_call_operand.vmem [shape: f32[4,24], index: 1, kind: input, shape index: {}]   ;;  %s5531_s2 = inlined_call_operand.vmem [shape: f32[1,24], index: 2, kind: input, shape index: {}]   ;;  %s5532_s3 = inlined_call_operand.vmem [shape: f32[25,24], index: 3, kind: input, shape index: {}]   ;;  %s5533_s4 = inlined_call_operand.vmem [shape: f32[1,24], index: 4, kind: input, shape index: {}]   ;;  %s5534_s5 = inlined_call_operand.vmem [shape: f32[24,4], index: 5, kind: input, shape index: {}]   ;;  %s5535_s6 = inlined_call_operand.vmem [shape: f32[1,4], index: 6, kind: input, shape index: {}]   ;;  %s5536_s7 = inlined_call_operand.vmem [shape: f32[2,16,16,4], index: 7, kind: output, shape index: {}]  }
   0x1   :  { %s3860_s26 = smov 0   ;;  %s3862_s27 = smov 0  }
   0x2   :  { %s3864_s28 = smov 0  }
   0x3 LB: > { %s26_s29 = sadd.s32 1, %s3805_s26  ;;  %s29_s30 = sadd.s32 1, %s3809_s27  ;;  %s3813_s28 = sphi %s3864_s28, %s17_s28   ;;  %s3809_s27 = sphi %s3862_s27, %s6029_s27   ;;  %s3805_s26 = sphi %s3860_s26, %s6028_s26   ;;  %s3801_s25 = sphi %s3858_s25, %s6027_s25   ;;  %s3797_s24 = sphi %s3856_s24, %s6026_s24  }
   0x4   : > { %p27_p0 = scmp.ge.s32.totalorder %s26_s29, 2  ;;  %p3444_p1 = scmp.ge.s32.totalorder %s3813_s28, 1 }
   0x5   : > { %p251_p2 = scmp.lt.s32.totalorder %s3813_s28, 5 }
   0x6   : > { %s6031_s29 = smov (%p27_p0, %s26_s29), 0  ;;  %s6033_s30 = smov (!%p27_p0, %s29_s30), %s3809_s27 }
   0x7   : > { %p252_p3 = pnand %p3444_p1, %p251_p2  ;;  %p31_p4 = scmp.ge.s32.totalorder %s6033_s30, 2 }
   0x9   : > { %s6035_s30 = smov (%p31_p4, %s6033_s30), 0  ;;  %255 = sbr.rel (%p252_p3) target bundleno = 3232 (0xca0), region = 48 }
  0x10   : > { %p288_p5 = scmp.lt.s32.totalorder %s3801_s25, 1  ;;  %s3889_s8 = sshll.u32 %s3797_s24, 3  ;;  %v3894_v0 = vld [vmem:[%s5532_s3] sm:$0xff]  ;;  %v3899_v1 = vld [vmem:[%s5532_s3 + $0x8] sm:$0xff]  ;;  %v3904_v2 = vld [vmem:[%s5532_s3 + $0x10] sm:$0xff]  ;;  %vm309_vm0 = vcmask 195584  }
  0x11   : > { %p296_p6 = scmp.lt.s32.totalorder %s3889_s8, 15  ;;  %v3910_v3 = vld [vmem:[%s5532_s3 + $0x18] ss:$0 sm:$0xff]  ;;  %v3915_v4 = vld [vmem:[%s5533_s4] ss:$0 sm:$0xff]  ;;  %v3815_v5 = vmov 0.0  }
  0x12   : > { %5707 = vst [vmem:[#allocation3_spill] sm:$0xff] %v3910_v3  ;;  %5708 = vst [vmem:[#allocation4_spill] sm:$0xff] %v3915_v4  ;;  %s6037_s25 = smov (!%p288_p5, %s3801_s25), 1  ;;  %vm312_vm1 = vcmask 191488   ;;  %s348_s12 = sadd.s32 4294967294, %s3889_s8 }
  0x13   : > { %310 = vst.msk [vmem:[#allocation2] sm:$0xff] %vm309_vm0, %v3815_v5  ;;  %311 = vst.msk [vmem:[#allocation2 + $0x8] sm:$0xff] %vm309_vm0, %v3815_v5  ;;  %s297_s19 = scalar_select %p296_p6, %s3889_s8, 15 }
  0x14   : > { %314 = vst.msk [vmem:[#allocation2 + $0x18] sm:$0xff] %vm309_vm0, %v3815_v5  ;;  %315 = vst.msk [vmem:[#allocation2 + $0x20] sm:$0xff] %vm309_vm0, %v3815_v5  ;;  %s3567_s20 = sshll.u32 %s6037_s25, 8  ;;  %s3449_s21 = sshll.u32 %s6037_s25, 5 }
  0x15   : > { %317 = vst.msk [vmem:[#allocation2 + $0x30] sm:$0xff] %vm309_vm0, %v3815_v5  ;;  %318 = vst.msk [vmem:[#allocation2 + $0x38] sm:$0xff] %vm309_vm0, %v3815_v5  ;;  %s3951_s9 = scalar_lea.vmem %s5529_s0, %s3567_s20  ;;  %s3448_s10 = sshll.u32 %s297_s19, 1 }
  0x16   : > { %320 = vst.msk [vmem:[#allocation2 + $0x48] sm:$0xff] %vm309_vm0, %v3815_v5  ;;  %321 = vst.msk [vmem:[#allocation2 + $0x50] sm:$0xff] %vm309_vm0, %v3815_v5  ;;  %s300_s11 = sadd.s32 %s3449_s21, %s3448_s10  ;;  %p349_p7 = scmp.ge.s32.totalorder %s348_s12, 0 }
  0x17   : > { %323 = vst.msk [vmem:[#allocation2 + $0x60] sm:$0xff] %vm309_vm0, %v3815_v5  ;;  %324 = vst.msk [vmem:[#allocation2 + $0x68] sm:$0xff] %vm309_vm0, %v3815_v5  ;;  %s3450_s13 = sshll.u32 %s300_s11, 3  ;;  %p350_p8 = scmp.lt.s32.totalorder %s348_s12, 16 }
  0x18   : > { %326 = vst.msk [vmem:[#allocation2 + $0x78] sm:$0xff] %vm309_vm0, %v3815_v5  ;;  %327 = vst.msk [vmem:[#allocation2 + $0x80] sm:$0xff] %vm309_vm0, %v3815_v5  ;;  %s3957_s16 = scalar_lea.vmem %s5536_s7, %s3450_s13 }
  0x19   : > { %329 = vst.msk [vmem:[#allocation2 + $0x90] sm:$0xff] %vm309_vm0, %v3815_v5  ;;  %330 = vst.msk [vmem:[#allocation2 + $0x98] sm:$0xff] %vm309_vm0, %v3815_v5  ;;  %p351_p9 = pnand %p350_p8, %p349_p7 }
  0x1a   : > { %332 = vst.msk [vmem:[#allocation2 + $0xa8] sm:$0xff] %vm309_vm0, %v3815_v5  ;;  %333 = vst.msk [vmem:[#allocation2 + $0xb0] sm:$0xff] %vm309_vm0, %v3815_v5  ;;  %v359_v6 = vld [vmem:[%s5530_s1] sm:$0xf] (!%p351_p9)  ;;  %vm374_vm2 = vcmask (!%p351_p9), 1043456   ;;  %s3568_s18 = sshll.u32 (!%p351_p9), %s3797_s24, 7 }
  0x1b   : > { %335 = vst.msk [vmem:[#allocation2 + $0xc0] sm:$0xff] %vm309_vm0, %v3815_v5  ;;  %336 = vst.msk [vmem:[#allocation2 + $0xc8] sm:$0xff] %vm309_vm0, %v3815_v5  ;;  %vm367_vm3 = vcmask (!%p351_p9), 31744   ;;  %3636 = vmatprep.subr.msk.mxu0 (!%p351_p9), %vm374_vm2, %v359_v6  ;;  %s3352_s19 = scalar_lea.vmem (!%p351_p9), %s3951_s9, %s3568_s18  ;;  %v3456_v9 = vld [vmem:[%s5531_s2] ss:$0 sm:$0xff] (!%p351_p9) }
  0x1c   : > { %338 = vst.msk [vmem:[#allocation2 + $0xd8] sm:$0xff] %vm309_vm0, %v3815_v5  ;;  %339 = vst.msk [vmem:[#allocation2 + $0xe0] sm:$0xff] %vm309_vm0, %v3815_v5  ;;  %3637 = vmatpush3.msk.msra.mxu0 (!%p351_p9), %vm374_vm2, %v359_v6  ;;  %v3454_v7 = vld [vmem:[%s3352_s19 - $0x20] sm:$0xff] (!%p351_p9)  ;;  %v3455_v8 = vld [vmem:[%s3352_s19 - $0x18] sm:$0xff] (!%p351_p9) }
  0x1d   : > { %341 = vst.msk [vmem:[#allocation2 + $0xf0] sm:$0xff] %vm309_vm0, %v3815_v5  ;;  %342 = vst.msk [vmem:[#allocation2 + $0xf8] sm:$0xff] %vm309_vm0, %v3815_v5  ;;  %3638 = vmatprep.mubr.msk.f32.mxu0 (!%p351_p9), %vm367_vm3, %v3454_v7 }
  0x1e   : > { %344 = vst.msk [vmem:[#allocation2 + $0x108] sm:$0xff] %vm309_vm0, %v3815_v5  ;;  %345 = vst.msk [vmem:[#allocation2 + $0x110] sm:$0xff] %vm309_vm0, %v3815_v5  ;;  %354 = sbr.rel (%p351_p9) target bundleno = 250 (0xfa), region = 52  ;;  %3639 = vmatmul.mubr.msk.f32.vlgmr.msra.gmra.mrb[0].mxu0 (!%p351_p9), %vm367_vm3, %v3455_v8 }
  0x1f   : > { %313 = vst.msk [vmem:[#allocation2 + $0x10] sm:$0xf] %vm312_vm1, %v3815_v5  ;;  %316 = vst.msk [vmem:[#allocation2 + $0x28] sm:$0xf] %vm312_vm1, %v3815_v5 }
  0x20   : > { %319 = vst.msk [vmem:[#allocation2 + $0x40] sm:$0xf] %vm312_vm1, %v3815_v5  ;;  %322 = vst.msk [vmem:[#allocation2 + $0x58] sm:$0xf] %vm312_vm1, %v3815_v5 }
  0x21   : > { %325 = vst.msk [vmem:[#allocation2 + $0x70] sm:$0xf] %vm312_vm1, %v3815_v5  ;;  %328 = vst.msk [vmem:[#allocation2 + $0x88] sm:$0xf] %vm312_vm1, %v3815_v5 }
  0x22   : > { %331 = vst.msk [vmem:[#allocation2 + $0xa0] sm:$0xf] %vm312_vm1, %v3815_v5  ;;  %334 = vst.msk [vmem:[#allocation2 + $0xb8] sm:$0xf] %vm312_vm1, %v3815_v5 }
  0x23   : > { %337 = vst.msk [vmem:[#allocation2 + $0xd0] sm:$0xf] %vm312_vm1, %v3815_v5  ;;  %340 = vst.msk [vmem:[#allocation2 + $0xe8] sm:$0xf] %vm312_vm1, %v3815_v5 }
  0x24   : > { %343 = vst.msk [vmem:[#allocation2 + $0x100] sm:$0xf] %vm312_vm1, %v3815_v5  ;;  %346 = vst.msk [vmem:[#allocation2 + $0x118] sm:$0xf] %vm312_vm1, %v3815_v5 }
  0xf1   : > { %v3640_v10 = vpop.f32.mrb[0].mxu0 }
  0xf2   : > { %v450_v11 = vadd.f32 %v3640_v10, %v3456_v9  ;;  %v444_v12 = vpop.f32.mrb[1].mxu0 }
  0xf3   : > { %v445_v13 = vadd.f32 %v3456_v9, %v444_v12 }
  0xf4   : > { %v454_v14 = vmax.f32 %v450_v11, 0.0 }
  0xf5   : > { %v453_v15 = vmax.f32 %v445_v13, 0.0 }
  0xf6   : > { %v456_v16 = vmin.f32 %v454_v14, 6.0 }
  0xf7   : > { %v455_v17 = vmin.f32 %v453_v15, 6.0 }
  0xf8   : > { %458 = vst.msk [vmem:[#allocation2 + $0xa] sm:$0xff] %vm309_vm0, %v456_v16 }
  0xf9   : > { %457 = vst.msk [vmem:[#allocation2 + $0x2] sm:$0xff] %vm309_vm0, %v455_v17 }
  0xfa PF: > { %s459_s22 = sadd.s32 4294967295, %s3889_s8 }
  0xfb   : > { %p460_p10 = scmp.ge.s32.totalorder %s459_s22, 0  ;;  %p461_p11 = scmp.lt.s32.totalorder %s459_s22, 16 }
  0xfd   : > { %p462_p12 = pnand %p461_p11, %p460_p10 }
  0xfe   : > { %v470_v18 = vld [vmem:[%s5530_s1] sm:$0xf] (!%p462_p12)  ;;  %vm485_vm4 = vcmask (!%p462_p12), 1043456   ;;  %s3569_s11 = sshll.u32 (!%p462_p12), %s3797_s24, 7  ;;  %vm478_vm5 = vcmask (!%p462_p12), 31744  }
  0xff   : > { %465 = sbr.rel (%p462_p12) target bundleno = 478 (0x1de), region = 56  ;;  %3641 = vmatprep.subr.msk.mxu0 (!%p462_p12), %vm485_vm4, %v470_v18  ;;  %s3356_s12 = scalar_lea.vmem (!%p462_p12), %s3951_s9, %s3569_s11  ;;  %v3464_v21 = vld [vmem:[%s5531_s2] ss:$0 sm:$0xff] (!%p462_p12) }
 0x100   : > { %3642 = vmatpush3.msk.msra.mxu0 (!%p462_p12), %vm485_vm4, %v470_v18  ;;  %v3462_v19 = vld [vmem:[%s3356_s12 - $0x10] sm:$0xff] (!%p462_p12)  ;;  %v3463_v20 = vld [vmem:[%s3356_s12 - $0x8] sm:$0xff] (!%p462_p12) }
 0x101   : > { %3643 = vmatprep.mubr.msk.f32.mxu0 (!%p462_p12), %vm478_vm5, %v3462_v19 }
 0x102   : > { %3644 = vmatmul.mubr.msk.f32.vlgmr.msra.gmra.mrb[0].mxu0 (!%p462_p12), %vm478_vm5, %v3463_v20 }
 0x1d5   : > { %v3645_v22 = vpop.f32.mrb[0].mxu0 }
 0x1d6   : > { %v561_v23 = vadd.f32 %v3645_v22, %v3464_v21  ;;  %v555_v24 = vpop.f32.mrb[1].mxu0 }
 0x1d7   : > { %v556_v25 = vadd.f32 %v3464_v21, %v555_v24 }
 0x1d8   : > { %v565_v26 = vmax.f32 %v561_v23, 0.0 }
 0x1d9   : > { %v564_v27 = vmax.f32 %v556_v25, 0.0 }
 0x1da   : > { %v567_v28 = vmin.f32 %v565_v26, 6.0 }
 0x1db   : > { %v566_v29 = vmin.f32 %v564_v27, 6.0 }
 0x1dc   : > { %570 = vst.msk [vmem:[#allocation2 + $0x22] sm:$0xff] %vm309_vm0, %v567_v28 }
 0x1dd   : > { %569 = vst.msk [vmem:[#allocation2 + $0x1a] sm:$0xff] %vm309_vm0, %v566_v29 }
 0x1de PF: > { %p571_p13 = scmp.ge.s32.totalorder %s3889_s8, 0  ;;  %p572_p0 = scmp.lt.s32.totalorder %s3889_s8, 16 }
 0x1e0   : > { %p573_p1 = pnand %p572_p0, %p571_p13 }
 0x1e1   : > { %v581_v30 = vld [vmem:[%s5530_s1] sm:$0xf] (!%p573_p1)  ;;  %vm596_vm6 = vcmask (!%p573_p1), 1043456   ;;  %s3570_s25 = sshll.u32 (!%p573_p1), %s3797_s24, 7  ;;  %vm589_vm7 = vcmask (!%p573_p1), 31744  }
 0x1e2   : > { %576 = sbr.rel (%p573_p1) target bundleno = 705 (0x2c1), region = 60  ;;  %3646 = vmatprep.subr.msk.mxu0 (!%p573_p1), %vm596_vm6, %v581_v30  ;;  %s578_s18 = scalar_lea.vmem (!%p573_p1), %s3951_s9, %s3570_s25  ;;  %v3469_v33 = vld [vmem:[%s5531_s2] ss:$0 sm:$0xff] (!%p573_p1) }
 0x1e3   : > { %3647 = vmatpush3.msk.msra.mxu0 (!%p573_p1), %vm596_vm6, %v581_v30  ;;  %v579_v31 = vld [vmem:[%s578_s18] sm:$0xff] (!%p573_p1)  ;;  %v580_v32 = vld [vmem:[%s578_s18 + $0x8] sm:$0xff] (!%p573_p1) }
 0x1e4   : > { %3648 = vmatprep.mubr.msk.f32.mxu0 (!%p573_p1), %vm589_vm7, %v579_v31 }
 0x1e5   : > { %3649 = vmatmul.mubr.msk.f32.vlgmr.msra.gmra.mrb[0].mxu0 (!%p573_p1), %vm589_vm7, %v580_v32 }
 0x2b8   : > { %v3650_v34 = vpop.f32.mrb[0].mxu0 }
 0x2b9   : > { %v672_v35 = vadd.f32 %v3650_v34, %v3469_v33  ;;  %v666_v36 = vpop.f32.mrb[1].mxu0 }
 0x2ba   : > { %v667_v37 = vadd.f32 %v3469_v33, %v666_v36 }
 0x2bb   : > { %v676_v38 = vmax.f32 %v672_v35, 0.0 }
 0x2bc   : > { %v675_v39 = vmax.f32 %v667_v37, 0.0 }
 0x2bd   : > { %v678_v40 = vmin.f32 %v676_v38, 6.0 }
 0x2be   : > { %v677_v41 = vmin.f32 %v675_v39, 6.0 }
 0x2bf   : > { %681 = vst.msk [vmem:[#allocation2 + $0x3a] sm:$0xff] %vm309_vm0, %v678_v40 }
 0x2c0   : > { %680 = vst.msk [vmem:[#allocation2 + $0x32] sm:$0xff] %vm309_vm0, %v677_v41 }
 0x2c1 PF: > { %s682_s21 = sadd.s32 1, %s3889_s8 }
 0x2c2   : > { %p683_p2 = scmp.ge.s32.totalorder %s682_s21, 0  ;;  %p684_p3 = scmp.lt.s32.totalorder %s682_s21, 16 }
 0x2c4   : > { %p685_p4 = pnand %p684_p3, %p683_p2 }
 0x2c5   : > { %v693_v42 = vld [vmem:[%s5530_s1] sm:$0xf] (!%p685_p4)  ;;  %vm708_vm8 = vcmask (!%p685_p4), 1043456   ;;  %s3571_s10 = sshll.u32 (!%p685_p4), %s3797_s24, 7  ;;  %vm701_vm9 = vcmask (!%p685_p4), 31744  }
 0x2c6   : > { %688 = sbr.rel (%p685_p4) target bundleno = 933 (0x3a5), region = 64  ;;  %3651 = vmatprep.subr.msk.mxu0 (!%p685_p4), %vm708_vm8, %v693_v42  ;;  %s3362_s11 = scalar_lea.vmem (!%p685_p4), %s3951_s9, %s3571_s10  ;;  %v3477_v45 = vld [vmem:[%s5531_s2] ss:$0 sm:$0xff] (!%p685_p4) }
 0x2c7   : > { %3652 = vmatpush3.msk.msra.mxu0 (!%p685_p4), %vm708_vm8, %v693_v42  ;;  %v3475_v43 = vld [vmem:[%s3362_s11 + $0x10] sm:$0xff] (!%p685_p4)  ;;  %v3476_v44 = vld [vmem:[%s3362_s11 + $0x18] sm:$0xff] (!%p685_p4) }
 0x2c8   : > { %3653 = vmatprep.mubr.msk.f32.mxu0 (!%p685_p4), %vm701_vm9, %v3475_v43 }
 0x2c9   : > { %3654 = vmatmul.mubr.msk.f32.vlgmr.msra.gmra.mrb[0].mxu0 (!%p685_p4), %vm701_vm9, %v3476_v44 }
 0x39c   : > { %v3655_v46 = vpop.f32.mrb[0].mxu0 }
 0x39d   : > { %v784_v47 = vadd.f32 %v3655_v46, %v3477_v45  ;;  %v778_v48 = vpop.f32.mrb[1].mxu0 }
 0x39e   : > { %v779_v49 = vadd.f32 %v3477_v45, %v778_v48 }
 0x39f   : > { %v788_v50 = vmax.f32 %v784_v47, 0.0 }
 0x3a0   : > { %v787_v51 = vmax.f32 %v779_v49, 0.0 }
 0x3a1   : > { %v790_v52 = vmin.f32 %v788_v50, 6.0 }
 0x3a2   : > { %v789_v53 = vmin.f32 %v787_v51, 6.0 }
 0x3a3   : > { %793 = vst.msk [vmem:[#allocation2 + $0x52] sm:$0xff] %vm309_vm0, %v790_v52 }
 0x3a4   : > { %792 = vst.msk [vmem:[#allocation2 + $0x4a] sm:$0xff] %vm309_vm0, %v789_v53 }
 0x3a5 PF: > { %s794_s14 = sadd.s32 2, %s3889_s8 }
 0x3a6   : > { %p795_p5 = scmp.ge.s32.totalorder %s794_s14, 0  ;;  %p796_p6 = scmp.lt.s32.totalorder %s794_s14, 16 }
 0x3a8   : > { %p797_p7 = pnand %p796_p6, %p795_p5 }
 0x3a9   : > { %v805_v54 = vld [vmem:[%s5530_s1] sm:$0xf] (!%p797_p7)  ;;  %vm820_vm10 = vcmask (!%p797_p7), 1043456   ;;  %s3572_s25 = sshll.u32 (!%p797_p7), %s3797_s24, 7  ;;  %vm813_vm11 = vcmask (!%p797_p7), 31744  }
 0x3aa   : > { %800 = sbr.rel (%p797_p7) target bundleno = 1161 (0x489), region = 68  ;;  %3656 = vmatprep.subr.msk.mxu0 (!%p797_p7), %vm820_vm10, %v805_v54  ;;  %s3366_s18 = scalar_lea.vmem (!%p797_p7), %s3951_s9, %s3572_s25  ;;  %v3485_v57 = vld [vmem:[%s5531_s2] ss:$0 sm:$0xff] (!%p797_p7) }
 0x3ab   : > { %3657 = vmatpush3.msk.msra.mxu0 (!%p797_p7), %vm820_vm10, %v805_v54  ;;  %v3483_v55 = vld [vmem:[%s3366_s18 + $0x20] sm:$0xff] (!%p797_p7)  ;;  %v3484_v56 = vld [vmem:[%s3366_s18 + $0x28] sm:$0xff] (!%p797_p7) }
 0x3ac   : > { %3658 = vmatprep.mubr.msk.f32.mxu0 (!%p797_p7), %vm813_vm11, %v3483_v55 }
 0x3ad   : > { %3659 = vmatmul.mubr.msk.f32.vlgmr.msra.gmra.mrb[0].mxu0 (!%p797_p7), %vm813_vm11, %v3484_v56 }
 0x480   : > { %v3660_v58 = vpop.f32.mrb[0].mxu0 }
 0x481   : > { %v896_v59 = vadd.f32 %v3660_v58, %v3485_v57  ;;  %v890_v60 = vpop.f32.mrb[1].mxu0 }
 0x482   : > { %v891_v61 = vadd.f32 %v3485_v57, %v890_v60 }
 0x483   : > { %v900_v62 = vmax.f32 %v896_v59, 0.0 }
 0x484   : > { %v899_v63 = vmax.f32 %v891_v61, 0.0 }
 0x485   : > { %v902_v5 = vmin.f32 %v900_v62, 6.0 }
 0x486   : > { %v901_v6 = vmin.f32 %v899_v63, 6.0 }
 0x487   : > { %905 = vst.msk [vmem:[#allocation2 + $0x6a] sm:$0xff] %vm309_vm0, %v902_v5 }
 0x488   : > { %904 = vst.msk [vmem:[#allocation2 + $0x62] sm:$0xff] %vm309_vm0, %v901_v6 }
 0x489 PF: > { %s906_s21 = sadd.s32 3, %s3889_s8 }
 0x48a   : > { %p907_p8 = scmp.ge.s32.totalorder %s906_s21, 0  ;;  %p908_p9 = scmp.lt.s32.totalorder %s906_s21, 16 }
 0x48c   : > { %p909_p10 = pnand %p908_p9, %p907_p8 }
 0x48d   : > { %v917_v7 = vld [vmem:[%s5530_s1] sm:$0xf] (!%p909_p10)  ;;  %vm932_vm12 = vcmask (!%p909_p10), 1043456   ;;  %s3573_s10 = sshll.u32 (!%p909_p10), %s3797_s24, 7  ;;  %vm925_vm13 = vcmask (!%p909_p10), 31744  }
 0x48e   : > { %912 = sbr.rel (%p909_p10) target bundleno = 1389 (0x56d), region = 72  ;;  %3661 = vmatprep.subr.msk.mxu0 (!%p909_p10), %vm932_vm12, %v917_v7  ;;  %s3370_s11 = scalar_lea.vmem (!%p909_p10), %s3951_s9, %s3573_s10  ;;  %v3493_v10 = vld [vmem:[%s5531_s2] ss:$0 sm:$0xff] (!%p909_p10) }
 0x48f   : > { %3662 = vmatpush3.msk.msra.mxu0 (!%p909_p10), %vm932_vm12, %v917_v7  ;;  %v3491_v8 = vld [vmem:[%s3370_s11 + $0x30] sm:$0xff] (!%p909_p10)  ;;  %v3492_v9 = vld [vmem:[%s3370_s11 + $0x38] sm:$0xff] (!%p909_p10) }
 0x490   : > { %3663 = vmatprep.mubr.msk.f32.mxu0 (!%p909_p10), %vm925_vm13, %v3491_v8 }
 0x491   : > { %3664 = vmatmul.mubr.msk.f32.vlgmr.msra.gmra.mrb[0].mxu0 (!%p909_p10), %vm925_vm13, %v3492_v9 }
 0x564   : > { %v3665_v11 = vpop.f32.mrb[0].mxu0 }
 0x565   : > { %v1008_v12 = vadd.f32 %v3665_v11, %v3493_v10  ;;  %v1002_v13 = vpop.f32.mrb[1].mxu0 }
 0x566   : > { %v1003_v14 = vadd.f32 %v3493_v10, %v1002_v13 }
 0x567   : > { %v1012_v15 = vmax.f32 %v1008_v12, 0.0 }
 0x568   : > { %v1011_v16 = vmax.f32 %v1003_v14, 0.0 }
 0x569   : > { %v1014_v17 = vmin.f32 %v1012_v15, 6.0 }
 0x56a   : > { %v1013_v18 = vmin.f32 %v1011_v16, 6.0 }
 0x56b   : > { %1017 = vst.msk [vmem:[#allocation2 + $0x82] sm:$0xff] %vm309_vm0, %v1014_v17 }
 0x56c   : > { %1016 = vst.msk [vmem:[#allocation2 + $0x7a] sm:$0xff] %vm309_vm0, %v1013_v18 }
 0x56d PF: > { %s1018_s14 = sadd.s32 4, %s3889_s8 }
 0x56e   : > { %p1019_p11 = scmp.ge.s32.totalorder %s1018_s14, 0  ;;  %p1020_p12 = scmp.lt.s32.totalorder %s1018_s14, 16 }
 0x570   : > { %p1021_p13 = pnand %p1020_p12, %p1019_p11 }
 0x571   : > { %v1029_v19 = vld [vmem:[%s5530_s1] sm:$0xf] (!%p1021_p13)  ;;  %vm1044_vm14 = vcmask (!%p1021_p13), 1043456   ;;  %s3574_s25 = sshll.u32 (!%p1021_p13), %s3797_s24, 7  ;;  %vm1037_vm15 = vcmask (!%p1021_p13), 31744  }
 0x572   : > { %1024 = sbr.rel (%p1021_p13) target bundleno = 1617 (0x651), region = 76  ;;  %3666 = vmatprep.subr.msk.mxu0 (!%p1021_p13), %vm1044_vm14, %v1029_v19  ;;  %s3374_s18 = scalar_lea.vmem (!%p1021_p13), %s3951_s9, %s3574_s25  ;;  %v3501_v22 = vld [vmem:[%s5531_s2] ss:$0 sm:$0xff] (!%p1021_p13) }
 0x573   : > { %3667 = vmatpush3.msk.msra.mxu0 (!%p1021_p13), %vm1044_vm14, %v1029_v19  ;;  %v3499_v20 = vld [vmem:[%s3374_s18 + $0x40] sm:$0xff] (!%p1021_p13)  ;;  %v3500_v21 = vld [vmem:[%s3374_s18 + $0x48] sm:$0xff] (!%p1021_p13) }
 0x574   : > { %3668 = vmatprep.mubr.msk.f32.mxu0 (!%p1021_p13), %vm1037_vm15, %v3499_v20 }
 0x575   : > { %3669 = vmatmul.mubr.msk.f32.vlgmr.msra.gmra.mrb[0].mxu0 (!%p1021_p13), %vm1037_vm15, %v3500_v21 }
 0x648   : > { %v3670_v23 = vpop.f32.mrb[0].mxu0 }
 0x649   : > { %v1120_v24 = vadd.f32 %v3670_v23, %v3501_v22  ;;  %v1114_v25 = vpop.f32.mrb[1].mxu0 }
 0x64a   : > { %v1115_v26 = vadd.f32 %v3501_v22, %v1114_v25 }
 0x64b   : > { %v1124_v27 = vmax.f32 %v1120_v24, 0.0 }
 0x64c   : > { %v1123_v28 = vmax.f32 %v1115_v26, 0.0 }
 0x64d   : > { %v1126_v29 = vmin.f32 %v1124_v27, 6.0 }
 0x64e   : > { %v1125_v30 = vmin.f32 %v1123_v28, 6.0 }
 0x64f   : > { %1129 = vst.msk [vmem:[#allocation2 + $0x9a] sm:$0xff] %vm309_vm0, %v1126_v29 }
 0x650   : > { %1128 = vst.msk [vmem:[#allocation2 + $0x92] sm:$0xff] %vm309_vm0, %v1125_v30 }
 0x651 PF: > { %s1130_s21 = sadd.s32 5, %s3889_s8 }
 0x652   : > { %p1131_p0 = scmp.ge.s32.totalorder %s1130_s21, 0  ;;  %p1132_p1 = scmp.lt.s32.totalorder %s1130_s21, 16 }
 0x654   : > { %p1133_p2 = pnand %p1132_p1, %p1131_p0 }
 0x655   : > { %v1141_v31 = vld [vmem:[%s5530_s1] sm:$0xf] (!%p1133_p2)  ;;  %vm1156_vm1 = vcmask (!%p1133_p2), 1043456   ;;  %s3575_s10 = sshll.u32 (!%p1133_p2), %s3797_s24, 7  ;;  %vm1149_vm2 = vcmask (!%p1133_p2), 31744  }
 0x656   : > { %1136 = sbr.rel (%p1133_p2) target bundleno = 1845 (0x735), region = 80  ;;  %3671 = vmatprep.subr.msk.mxu0 (!%p1133_p2), %vm1156_vm1, %v1141_v31  ;;  %s3378_s11 = scalar_lea.vmem (!%p1133_p2), %s3951_s9, %s3575_s10  ;;  %v3509_v34 = vld [vmem:[%s5531_s2] ss:$0 sm:$0xff] (!%p1133_p2) }
 0x657   : > { %3672 = vmatpush3.msk.msra.mxu0 (!%p1133_p2), %vm1156_vm1, %v1141_v31  ;;  %v3507_v32 = vld [vmem:[%s3378_s11 + $0x50] sm:$0xff] (!%p1133_p2)  ;;  %v3508_v33 = vld [vmem:[%s3378_s11 + $0x58] sm:$0xff] (!%p1133_p2) }
 0x658   : > { %3673 = vmatprep.mubr.msk.f32.mxu0 (!%p1133_p2), %vm1149_vm2, %v3507_v32 }
 0x659   : > { %3674 = vmatmul.mubr.msk.f32.vlgmr.msra.gmra.mrb[0].mxu0 (!%p1133_p2), %vm1149_vm2, %v3508_v33 }
 0x72c   : > { %v3675_v35 = vpop.f32.mrb[0].mxu0 }
 0x72d   : > { %v1232_v36 = vadd.f32 %v3675_v35, %v3509_v34  ;;  %v1226_v37 = vpop.f32.mrb[1].mxu0 }
 0x72e   : > { %v1227_v38 = vadd.f32 %v3509_v34, %v1226_v37 }
 0x72f   : > { %v1236_v39 = vmax.f32 %v1232_v36, 0.0 }
 0x730   : > { %v1235_v40 = vmax.f32 %v1227_v38, 0.0 }
 0x731   : > { %v1238_v41 = vmin.f32 %v1236_v39, 6.0 }
 0x732   : > { %v1237_v42 = vmin.f32 %v1235_v40, 6.0 }
 0x733   : > { %1241 = vst.msk [vmem:[#allocation2 + $0xb2] sm:$0xff] %vm309_vm0, %v1238_v41 }
 0x734   : > { %1240 = vst.msk [vmem:[#allocation2 + $0xaa] sm:$0xff] %vm309_vm0, %v1237_v42 }
 0x735 PF: > { %s1242_s14 = sadd.s32 6, %s3889_s8 }
 0x736   : > { %p1243_p3 = scmp.ge.s32.totalorder %s1242_s14, 0  ;;  %p1244_p4 = scmp.lt.s32.totalorder %s1242_s14, 16 }
 0x738   : > { %p1245_p5 = pnand %p1244_p4, %p1243_p3 }
 0x739   : > { %v1253_v43 = vld [vmem:[%s5530_s1] sm:$0xf] (!%p1245_p5)  ;;  %vm1268_vm3 = vcmask (!%p1245_p5), 1043456   ;;  %s3576_s25 = sshll.u32 (!%p1245_p5), %s3797_s24, 7  ;;  %vm1261_vm4 = vcmask (!%p1245_p5), 31744  }
 0x73a   : > { %1248 = sbr.rel (%p1245_p5) target bundleno = 2073 (0x819), region = 84  ;;  %3676 = vmatprep.subr.msk.mxu0 (!%p1245_p5), %vm1268_vm3, %v1253_v43  ;;  %s3382_s18 = scalar_lea.vmem (!%p1245_p5), %s3951_s9, %s3576_s25  ;;  %v3517_v46 = vld [vmem:[%s5531_s2] ss:$0 sm:$0xff] (!%p1245_p5) }
 0x73b   : > { %3677 = vmatpush3.msk.msra.mxu0 (!%p1245_p5), %vm1268_vm3, %v1253_v43  ;;  %v3515_v44 = vld [vmem:[%s3382_s18 + $0x60] sm:$0xff] (!%p1245_p5)  ;;  %v3516_v45 = vld [vmem:[%s3382_s18 + $0x68] sm:$0xff] (!%p1245_p5) }
 0x73c   : > { %3678 = vmatprep.mubr.msk.f32.mxu0 (!%p1245_p5), %vm1261_vm4, %v3515_v44 }
 0x73d   : > { %3679 = vmatmul.mubr.msk.f32.vlgmr.msra.gmra.mrb[0].mxu0 (!%p1245_p5), %vm1261_vm4, %v3516_v45 }
 0x810   : > { %v3680_v47 = vpop.f32.mrb[0].mxu0 }
 0x811   : > { %v1344_v48 = vadd.f32 %v3680_v47, %v3517_v46  ;;  %v1338_v49 = vpop.f32.mrb[1].mxu0 }
 0x812   : > { %v1339_v50 = vadd.f32 %v3517_v46, %v1338_v49 }
 0x813   : > { %v1348_v51 = vmax.f32 %v1344_v48, 0.0 }
 0x814   : > { %v1347_v52 = vmax.f32 %v1339_v50, 0.0 }
 0x815   : > { %v1350_v53 = vmin.f32 %v1348_v51, 6.0 }
 0x816   : > { %v1349_v54 = vmin.f32 %v1347_v52, 6.0 }
 0x817   : > { %1353 = vst.msk [vmem:[#allocation2 + $0xca] sm:$0xff] %vm309_vm0, %v1350_v53 }
 0x818   : > { %1352 = vst.msk [vmem:[#allocation2 + $0xc2] sm:$0xff] %vm309_vm0, %v1349_v54 }
 0x819 PF: > { %s1354_s21 = sadd.s32 7, %s3889_s8 }
 0x81a   : > { %p1355_p6 = scmp.ge.s32.totalorder %s1354_s21, 0  ;;  %p1356_p7 = scmp.lt.s32.totalorder %s1354_s21, 16 }
 0x81c   : > { %p1357_p8 = pnand %p1356_p7, %p1355_p6 }
 0x81d   : > { %v1365_v55 = vld [vmem:[%s5530_s1] sm:$0xf] (!%p1357_p8)  ;;  %vm1380_vm5 = vcmask (!%p1357_p8), 1043456   ;;  %s3577_s10 = sshll.u32 (!%p1357_p8), %s3797_s24, 7  ;;  %vm1373_vm6 = vcmask (!%p1357_p8), 31744  }
 0x81e   : > { %1360 = sbr.rel (%p1357_p8) target bundleno = 2301 (0x8fd), region = 88  ;;  %3681 = vmatprep.subr.msk.mxu0 (!%p1357_p8), %vm1380_vm5, %v1365_v55  ;;  %s3386_s11 = scalar_lea.vmem (!%p1357_p8), %s3951_s9, %s3577_s10  ;;  %v3525_v58 = vld [vmem:[%s5531_s2] ss:$0 sm:$0xff] (!%p1357_p8) }
 0x81f   : > { %3682 = vmatpush3.msk.msra.mxu0 (!%p1357_p8), %vm1380_vm5, %v1365_v55  ;;  %v3523_v56 = vld [vmem:[%s3386_s11 + $0x70] sm:$0xff] (!%p1357_p8)  ;;  %v3524_v57 = vld [vmem:[%s3386_s11 + $0x78] sm:$0xff] (!%p1357_p8) }
 0x820   : > { %3683 = vmatprep.mubr.msk.f32.mxu0 (!%p1357_p8), %vm1373_vm6, %v3523_v56 }
 0x821   : > { %3684 = vmatmul.mubr.msk.f32.vlgmr.msra.gmra.mrb[0].mxu0 (!%p1357_p8), %vm1373_vm6, %v3524_v57 }
 0x8f4   : > { %v3685_v59 = vpop.f32.mrb[0].mxu0 }
 0x8f5   : > { %v1456_v60 = vadd.f32 %v3685_v59, %v3525_v58  ;;  %v1450_v61 = vpop.f32.mrb[1].mxu0 }
 0x8f6   : > { %v1451_v62 = vadd.f32 %v3525_v58, %v1450_v61 }
 0x8f7   : > { %v1460_v63 = vmax.f32 %v1456_v60, 0.0 }
 0x8f8   : > { %v1459_v5 = vmax.f32 %v1451_v62, 0.0 }
 0x8f9   : > { %v1462_v6 = vmin.f32 %v1460_v63, 6.0 }
 0x8fa   : > { %v1461_v7 = vmin.f32 %v1459_v5, 6.0 }
 0x8fb   : > { %1465 = vst.msk [vmem:[#allocation2 + $0xe2] sm:$0xff] %vm309_vm0, %v1462_v6 }
 0x8fc   : > { %1464 = vst.msk [vmem:[#allocation2 + $0xda] sm:$0xff] %vm309_vm0, %v1461_v7 }
 0x8fd PF: > { %s1466_s14 = sadd.s32 8, %s3889_s8 }
 0x8fe   : > { %p1467_p9 = scmp.ge.s32.totalorder %s1466_s14, 0  ;;  %p1468_p10 = scmp.lt.s32.totalorder %s1466_s14, 16 }
 0x900   : > { %p1469_p11 = pnand %p1468_p10, %p1467_p9 }
 0x901   : > { %v1477_v8 = vld [vmem:[%s5530_s1] sm:$0xf] (!%p1469_p11)  ;;  %vm1492_vm7 = vcmask (!%p1469_p11), 1043456   ;;  %s3578_s25 = sshll.u32 (!%p1469_p11), %s3797_s24, 7  ;;  %vm1485_vm8 = vcmask (!%p1469_p11), 31744  }
 0x902   : > { %1472 = sbr.rel (%p1469_p11) target bundleno = 2529 (0x9e1), region = 92  ;;  %3686 = vmatprep.subr.msk.mxu0 (!%p1469_p11), %vm1492_vm7, %v1477_v8  ;;  %s3390_s18 = scalar_lea.vmem (!%p1469_p11), %s3951_s9, %s3578_s25  ;;  %v3533_v11 = vld [vmem:[%s5531_s2] ss:$0 sm:$0xff] (!%p1469_p11) }
 0x903   : > { %3687 = vmatpush3.msk.msra.mxu0 (!%p1469_p11), %vm1492_vm7, %v1477_v8  ;;  %v3531_v9 = vld [vmem:[%s3390_s18 + $0x80] sm:$0xff] (!%p1469_p11)  ;;  %v3532_v10 = vld [vmem:[%s3390_s18 + $0x88] sm:$0xff] (!%p1469_p11) }
 0x904   : > { %3688 = vmatprep.mubr.msk.f32.mxu0 (!%p1469_p11), %vm1485_vm8, %v3531_v9 }
 0x905   : > { %3689 = vmatmul.mubr.msk.f32.vlgmr.msra.gmra.mrb[0].mxu0 (!%p1469_p11), %vm1485_vm8, %v3532_v10 }
 0x9d8   : > { %v3690_v12 = vpop.f32.mrb[0].mxu0 }
 0x9d9   : > { %v1568_v13 = vadd.f32 %v3690_v12, %v3533_v11  ;;  %v1562_v14 = vpop.f32.mrb[1].mxu0 }
 0x9da   : > { %v1563_v15 = vadd.f32 %v3533_v11, %v1562_v14 }
 0x9db   : > { %v1572_v16 = vmax.f32 %v1568_v13, 0.0 }
 0x9dc   : > { %v1571_v17 = vmax.f32 %v1563_v15, 0.0 }
 0x9dd   : > { %v1574_v18 = vmin.f32 %v1572_v16, 6.0 }
 0x9de   : > { %v1573_v19 = vmin.f32 %v1571_v17, 6.0 }
 0x9df   : > { %1577 = vst.msk [vmem:[#allocation2 + $0xfa] sm:$0xff] %vm309_vm0, %v1574_v18 }
 0x9e0   : > { %1576 = vst.msk [vmem:[#allocation2 + $0xf2] sm:$0xff] %vm309_vm0, %v1573_v19 }
 0x9e1 PF: > { %s1578_s21 = sadd.s32 9, %s3889_s8 }
 0x9e2   : > { %p1579_p12 = scmp.ge.s32.totalorder %s1578_s21, 0  ;;  %p1580_p13 = scmp.lt.s32.totalorder %s1578_s21, 16 }
 0x9e4   : > { %p1581_p0 = pnand %p1580_p13, %p1579_p12 }
 0x9e5   : > { %v1589_v20 = vld [vmem:[%s5530_s1] sm:$0xf] (!%p1581_p0)  ;;  %vm1604_vm9 = vcmask (!%p1581_p0), 1043456   ;;  %s3579_s10 = sshll.u32 (!%p1581_p0), %s3797_s24, 7  ;;  %vm1597_vm10 = vcmask (!%p1581_p0), 31744  }
 0x9e6   : > { %1584 = sbr.rel (%p1581_p0) target bundleno = 2757 (0xac5), region = 96  ;;  %3691 = vmatprep.subr.msk.mxu0 (!%p1581_p0), %vm1604_vm9, %v1589_v20  ;;  %s3394_s11 = scalar_lea.vmem (!%p1581_p0), %s3951_s9, %s3579_s10  ;;  %v3541_v23 = vld [vmem:[%s5531_s2] ss:$0 sm:$0xff] (!%p1581_p0) }
 0x9e7   : > { %3692 = vmatpush3.msk.msra.mxu0 (!%p1581_p0), %vm1604_vm9, %v1589_v20  ;;  %v3539_v21 = vld [vmem:[%s3394_s11 + $0x90] sm:$0xff] (!%p1581_p0)  ;;  %v3540_v22 = vld [vmem:[%s3394_s11 + $0x98] sm:$0xff] (!%p1581_p0) }
 0x9e8   : > { %3693 = vmatprep.mubr.msk.f32.mxu0 (!%p1581_p0), %vm1597_vm10, %v3539_v21 }
 0x9e9   : > { %3694 = vmatmul.mubr.msk.f32.vlgmr.msra.gmra.mrb[0].mxu0 (!%p1581_p0), %vm1597_vm10, %v3540_v22 }
 0xabc   : > { %v3695_v24 = vpop.f32.mrb[0].mxu0 }
 0xabd   : > { %v1680_v25 = vadd.f32 %v3695_v24, %v3541_v23  ;;  %v1674_v26 = vpop.f32.mrb[1].mxu0 }
 0xabe   : > { %v1675_v27 = vadd.f32 %v3541_v23, %v1674_v26 }
 0xabf   : > { %v1684_v28 = vmax.f32 %v1680_v25, 0.0 }
 0xac0   : > { %v1683_v29 = vmax.f32 %v1675_v27, 0.0 }
 0xac1   : > { %v1686_v30 = vmin.f32 %v1684_v28, 6.0 }
 0xac2   : > { %v1685_v31 = vmin.f32 %v1683_v29, 6.0 }
 0xac3   : > { %1689 = vst.msk [vmem:[#allocation2 + $0x112] sm:$0xff] %vm309_vm0, %v1686_v30 }
 0xac4   : > { %1688 = vst.msk [vmem:[#allocation2 + $0x10a] sm:$0xff] %vm309_vm0, %v1685_v31 }
 0xac5 PF: > { %v3048_v32 = vld [vmem:[%s5534_s5] sm:$0xff]  ;;  %v3049_v33 = vld [vmem:[%s5534_s5 + $0x8] sm:$0xff]  ;;  %v1706_v34 = vlaneseq  ;;  %v3050_v36 = vld [vmem:[%s5534_s5 + $0x10] sm:$0xff]  ;;  %s3580_s19 = sshll.u32 %s3797_s24, 7 }
 0xac6   : > { %v3726_v35 = vpack.c.bf16 %v3049_v33, %v3048_v32  ;;  %v1690_v42 = vld [vmem:[#allocation2] sm:$0xff]  ;;  %v4149_v6 = vld [vmem:[#allocation2 + $0x18] sm:$0xff]  ;;  %v4203_v28 = vld [vmem:[#allocation2 + $0x30] sm:$0xff]  ;;  %s5443_s20 = scalar_lea.vmem %s3951_s9, %s3580_s19 }
 0xac7   : > { %v1707_v37 = vshrl.u32 %v1706_v34, 7  ;;  %v1742_v43 = vld [vmem:[#allocation2 + $0x1] sm:$0xff]  ;;  %v4165_v12 = vld [vmem:[#allocation2 + $0x19] sm:$0xff]  ;;  %5713 = vst [vmem:[#allocation9_spill] sm:$0xff] %v4203_v28  ;;  %v4213_v32 = vld [vmem:[#allocation2 + $0x31] sm:$0xff] }
 0xac8   : > { %3727 = vmatprep.subr.bf16.mxu0 %v3726_v35  ;;  %3730 = vmatprep.subr.bf16.mxu1 %v3726_v35  ;;  %v1794_v44 = vld [vmem:[#allocation2 + $0x2] sm:$0xff]  ;;  %v4167_v13 = vld [vmem:[#allocation2 + $0x1a] sm:$0xff]  ;;  %5715 = vst [vmem:[#allocation11_spill] sm:$0xff] %v4213_v32 }
 0xac9   : > { %3729 = vmatpush3.bf16.msra.mxu0 %v3726_v35  ;;  %3732 = vmatpush3.bf16.msra.mxu1 %v3726_v35  ;;  %v4100_v38 = vsub.s32 0, %v1707_v37  ;;  %v4102_v39 = vsub.s32 1, %v1707_v37  ;;  %v4104_v40 = vsub.s32 2, %v1707_v37  ;;  %v4106_v41 = vsub.s32 3, %v1707_v37  ;;  %v1846_v51 = vld [vmem:[#allocation2 + $0x3] sm:$0xff]  ;;  %v4187_v21 = vld [vmem:[#allocation2 + $0x1b] sm:$0xff] }
 0xaca   : > { %3700 = vmatprep.subr.mxu0 %v3050_v36  ;;  %3731 = vmatprep.subr.mxu1 %v3050_v36  ;;  %v4108_v45 = vsub.s32 4, %v1707_v37  ;;  %v4110_v46 = vsub.s32 5, %v1707_v37  ;;  %v4135_v56 = vsub.s32 6, %v1707_v37  ;;  %v1898_v57 = vld [vmem:[#allocation2 + $0x4] sm:$0xff]  ;;  %v4137_v58 = vsub.s32 7, %v1707_v37  ;;  %v4189_v22 = vld [vmem:[#allocation2 + $0x1c] sm:$0xff] }
 0xacb   : > { %v4114_v47 = vrot.slane %v3894_v0, %v4100_v38  ;;  %v4118_v48 = vrot.slane %v3894_v0, %v4102_v39  ;;  %v4122_v49 = vrot.slane %v3894_v0, %v4104_v40  ;;  %v4126_v50 = vrot.slane %v3894_v0, %v4106_v41  ;;  %v4179_v17 = vld [vmem:[#allocation2 + $0x60] sm:$0xff]  ;;  %5712 = vst [vmem:[#allocation8_spill] sm:$0xff] %v4189_v22 }
 0xacc   : > { %v4130_v52 = vrot.slane %v3894_v0, %v4108_v45  ;;  %v4142_v61 = vrot.slane %v3894_v0, %v4110_v46  ;;  %v4147_v5 = vrot.slane %v3894_v0, %v4135_v56  ;;  %v4153_v7 = vrot.slane %v3894_v0, %v4137_v58  ;;  %5709 = vst [vmem:[#allocation5_spill] sm:$0xff] %v4179_v17  ;;  %v4181_v18 = vld [vmem:[#allocation2 + $0x61] sm:$0xff] }
 0xacd   : > { %3701 = vmatpush3.msra.mxu0 %v3050_v36  ;;  %3733 = vmatpush3.msra.mxu1 %v3050_v36  ;;  %v1710_v53 = vmul.f32 %v4114_v47, %v1690_v42  ;;  %v1762_v54 = vmul.f32 %v4118_v48, %v1742_v43  ;;  %v1814_v55 = vmul.f32 %v4122_v49, %v1794_v44  ;;  %v4183_v19 = vld [vmem:[#allocation2 + $0x62] sm:$0xff]  ;;  %v4223_v42 = vld [vmem:[#allocation2 + $0x32] sm:$0xff]  ;;  %v4329_v4 = vld [vmem:[#allocation2 + $0x7a] sm:$0xff] }
 0xace   : > { %v1866_v60 = vmul.f32 %v4126_v50, %v1846_v51  ;;  %v1918_v63 = vmul.f32 %v4130_v52, %v1898_v57  ;;  %v1971_v9 = vmul.f32 %v4142_v61, %v4149_v6  ;;  %v4159_v10 = vrot.slane %v3899_v1, %v4100_v38  ;;  %5710 = vst [vmem:[#allocation6_spill] sm:$0xff] %v4181_v18  ;;  %v4209_v30 = vld [vmem:[#allocation2 + $0x63] sm:$0xff] }
 0xacf   : > { %v1778_v59 = vadd.f32 %v1762_v54, %v1710_v53  ;;  %v4163_v11 = vrot.slane %v3899_v1, %v4102_v39  ;;  %v4171_v0 = vrot.slane %v3899_v1, %v4104_v40  ;;  %v2023_v15 = vmul.f32 %v4147_v5, %v4165_v12  ;;  %5711 = vst [vmem:[#allocation7_spill] sm:$0xff] %v4183_v19  ;;  %v4233_v51 = vld [vmem:[#allocation2 + $0x64] sm:$0xff]  ;;  %v4239_v54 = vld [vmem:[#allocation2 + $0x33] sm:$0xff] }
 0xad0   : > { %v4177_v16 = vrot.slane %v3899_v1, %v4106_v41  ;;  %v2075_v20 = vmul.f32 %v4153_v7, %v4167_v13  ;;  %v4193_v23 = vrot.slane %v3899_v1, %v4108_v45  ;;  %v4197_v24 = vrot.slane %v3899_v1, %v4110_v46  ;;  %5714 = vst [vmem:[#allocation10_spill] sm:$0xff] %v4209_v30 }
 0xad1   : > { %v1830_v62 = vadd.f32 %v1814_v55, %v1778_v59  ;;  %v2127_v26 = vmul.f32 %v4159_v10, %v4187_v21  ;;  %v2179_v27 = vmul.f32 %v4163_v11, %v4189_v22  ;;  %v4207_v29 = vrot.slane %v3899_v1, %v4135_v56  ;;  %5716 = vst [vmem:[#allocation12_spill] sm:$0xff] %v4223_v42 }
 0xad2   : > { %v2232_v31 = vmul.f32 %v4171_v0, %v4203_v28  ;;  %v1718_v33 = vmul.f32 %v4179_v17, %v4114_v47  ;;  %v1770_v34 = vmul.f32 %v4181_v18, %v4118_v48  ;;  %v1822_v35 = vmul.f32 %v4183_v19, %v4122_v49  ;;  %5717 = vst [vmem:[#allocation13_spill] sm:$0xff] %v4233_v51 }
 0xad3   : > { %v1882_v8 = vadd.f32 %v1866_v60, %v1830_v62  ;;  %v2284_v37 = vmul.f32 %v4177_v16, %v4213_v32  ;;  %v4227_v43 = vrot.slane %v3899_v1, %v4137_v58  ;;  %v4231_v44 = vrot.slane %v3904_v2, %v4100_v38  ;;  %5718 = vst [vmem:[#allocation14_spill] sm:$0xff] %v4239_v54  ;;  %v4251_v60 = vld [vmem:[#allocation2 + $0x34] sm:$0xff] }
 0xad4   : > { %v4237_v53 = vmul.f32 %v4193_v23, %v4223_v42  ;;  %v4243_v55 = vrot.slane %v3904_v2, %v4102_v39  ;;  %v1786_v57 = vadd.f32 %v1770_v34, %v1718_v33  ;;  %v1874_v1 = vmul.f32 %v4209_v30, %v4126_v50  ;;  %5719 = vst [vmem:[#allocation15_spill] sm:$0xff] %v4251_v60  ;;  %v4261_v39 = vld [vmem:[#allocation2 + $0x48] sm:$0xff] }
 0xad5   : > { %v1934_v14 = vadd.f32 %v1918_v63, %v1882_v8  ;;  %v4249_v38 = vmul.f32 %v4197_v24, %v4239_v54  ;;  %v4255_v62 = vrot.slane %v3904_v2, %v4104_v40  ;;  %v4259_v63 = vrot.slane %v3904_v2, %v4106_v41  ;;  %5720 = vst [vmem:[#allocation16_spill] sm:$0xff] %v4261_v39  ;;  %v4263_v8 = vld [vmem:[#allocation2 + $0x49] sm:$0xff] }
 0xad6   : > { %5721 = vst [vmem:[#allocation17_spill] sm:$0xff] %v4263_v8  ;;  %v1838_v40 = vadd.f32 %v1822_v35, %v1786_v57  ;;  %v4283_v33 = vmul.f32 %v4227_v43, %v4261_v39  ;;  %v4289_v34 = vld [vmem:[#allocation2 + $0x4b] sm:$0xff]  ;;  %v4293_v35 = vld [vmem:[#allocation2 + $0x78] sm:$0xff]  ;;  %5728 = vst [vmem:[#allocation24_spill] sm:$0xff] %v4329_v4 }
 0xad7   : > { %v1987_v25 = vadd.f32 %v1971_v9, %v1934_v14  ;;  %v4265_v9 = vld [vmem:[#allocation2 + $0x4a] sm:$0xff]  ;;  %v4269_v14 = vrot.slane %v3904_v2, %v4108_v45  ;;  %v4287_v45 = vmul.f32 %v4231_v44, %v4263_v8  ;;  %5724 = vst [vmem:[#allocation20_spill] sm:$0xff] %v4289_v34  ;;  %5726 = vst [vmem:[#allocation22_spill] sm:$0xff] %v4293_v35 }
 0xad8   : > { %5722 = vst [vmem:[#allocation18_spill] sm:$0xff] %v4265_v9  ;;  %v1890_v57 = vadd.f32 %v1874_v1, %v1838_v40  ;;  %v1691_v8 = vld [vmem:[#allocation2 + $0x8] sm:$0xff]  ;;  %v4307_v42 = vmul.f32 %v4255_v62, %v4289_v34  ;;  %v4317_v1 = vld [vmem:[#allocation2 + $0x79] sm:$0xff] }
 0xad9   : > { %v2039_v36 = vadd.f32 %v2023_v15, %v1987_v25  ;;  %5723 = vst [vmem:[#allocation19_spill] sm:$0xff] %v4269_v14  ;;  %v4273_v15 = vrot.slane %v3904_v2, %v4110_v46  ;;  %v4279_v25 = vmul.f32 %v4207_v29, %v4251_v60  ;;  %v4291_v46 = vld [vmem:[#allocation2 + $0x4c] sm:$0xff]  ;;  %5727 = vst [vmem:[#allocation23_spill] sm:$0xff] %v4317_v1 }
 0xada   : > { %5725 = vst [vmem:[#allocation21_spill] sm:$0xff] %v4291_v46  ;;  %v1743_v39 = vld [vmem:[#allocation2 + $0x9] sm:$0xff]  ;;  %v4321_v40 = vmul.f32 %v4269_v14, %v4179_v17  ;;  %v2031_v34 = vmul.f32 %v4147_v5, %v4317_v1 }
 0xadb   : > { %v2091_v59 = vadd.f32 %v2075_v20, %v2039_v36  ;;  %v1926_v20 = vmul.f32 %v4233_v51, %v4130_v52  ;;  %v4301_v36 = vrot.slane %v3904_v2, %v4135_v56  ;;  %v1795_v60 = vld [vmem:[#allocation2 + $0xa] sm:$0xff]  ;;  %v4315_v56 = vrot.slane %v3904_v2, %v4137_v58 }
 0xadc   : > { %v1711_v2 = vmul.f32 %v4114_v47, %v1691_v8  ;;  %v1763_v58 = vmul.f32 %v4118_v48, %v1743_v39  ;;  %v1815_v32 = vmul.f32 %v4122_v49, %v1795_v60  ;;  %v4348_v39 = vld [vmem:[#allocation2 + $0x7b] sm:$0xff] }
 0xadd   : > { %v2143_v41 = vadd.f32 %v2127_v26, %v2091_v59  ;;  %v4297_v26 = vmul.f32 %v4243_v55, %v4265_v9  ;;  %v1979_v59 = vmul.f32 %v4142_v61, %v4293_v35  ;;  %v4311_v9 = vmul.f32 %v4259_v63, %v4291_v46  ;;  %v1847_v46 = vld [vmem:[#allocation2 + $0xb] sm:$0xff]  ;;  %5731 = vst [vmem:[#allocation27_spill] sm:$0xff] %v4348_v39  ;;  %v4350_v60 = vld [vmem:[#allocation2 + $0x7c] sm:$0xff] }
 0xade   : > { %v4336_v17 = vmul.f32 %v4301_v36, %v4183_v19  ;;  %v4346_v8 = vmul.f32 %v4315_v56, %v4209_v30  ;;  %5732 = vst [vmem:[#allocation28_spill] sm:$0xff] %v4350_v60  ;;  %v4352_v19 = vld [vmem:[#allocation2 + $0x90] sm:$0xff]  ;;  %v1779_v1 = vadd.f32 %v1763_v58, %v1711_v2  ;;  %v4372_v58 = vld [vmem:[#allocation2 + $0xa8] sm:$0xff] }
 0xadf   : > { %v2195_v54 = vadd.f32 %v2179_v27, %v2143_v41  ;;  %v4325_v27 = vmul.f32 %v4273_v15, %v4181_v18  ;;  %v1942_v41 = vadd.f32 %v1926_v20, %v1890_v57  ;;  %v4340_v20 = vmul.f32 %v3910_v3, %v4233_v51  ;;  %5733 = vst [vmem:[#allocation29_spill] sm:$0xff] %v4352_v19  ;;  %v4363_v30 = vld [vmem:[#allocation2 + $0x92] sm:$0xff] }
 0xae0   : > { %5730 = vst [vmem:[#allocation26_spill] sm:$0xff] %v4346_v8  ;;  %v1867_v51 = vmul.f32 %v4126_v50, %v1847_v46  ;;  %5735 = vst [vmem:[#allocation31_spill] sm:$0xff] %v4363_v30  ;;  %v4368_v46 = vld [vmem:[#allocation2 + $0x93] sm:$0xff]  ;;  %v4389_v8 = vld [vmem:[#allocation2 + $0x20] sm:$0xff] }
 0xae1   : > { %v2248_v35 = vadd.f32 %v2232_v31, %v2195_v54  ;;  %5729 = vst [vmem:[#allocation25_spill] sm:$0xff] %v4340_v20  ;;  %v1995_v57 = vadd.f32 %v1979_v59, %v1942_v41  ;;  %v2083_v31 = vmul.f32 %v4153_v7, %v4329_v4  ;;  %v1899_v54 = vld [vmem:[#allocation2 + $0xc] sm:$0xff]  ;;  %v2135_v59 = vmul.f32 %v4159_v10, %v4348_v39 }
 0xae2   : > { %v4361_v41 = vld [vmem:[#allocation2 + $0x91] sm:$0xff]  ;;  %5736 = vst [vmem:[#allocation32_spill] sm:$0xff] %v4368_v46  ;;  %5738 = vst [vmem:[#allocation34_spill] sm:$0xff] %v4372_v58  ;;  %v4379_v28 = vmul.f32 %v4197_v24, %v4368_v46  ;;  %v4402_v46 = vld [vmem:[#allocation2 + $0x68] sm:$0xff] }
 0xae3   : > { %v2300_v18 = vadd.f32 %v2284_v37, %v2248_v35  ;;  %v2047_v20 = vadd.f32 %v2031_v34, %v1995_v57  ;;  %v2187_v37 = vmul.f32 %v4163_v11, %v4350_v60  ;;  %v2240_v35 = vmul.f32 %v4171_v0, %v4352_v19  ;;  %5734 = vst [vmem:[#allocation30_spill] sm:$0xff] %v4361_v41  ;;  %v4370_v34 = vld [vmem:[#allocation2 + $0x94] sm:$0xff] }
 0xae4   : > { %v2292_v2 = vmul.f32 %v4177_v16, %v4361_v41  ;;  %5737 = vst [vmem:[#allocation33_spill] sm:$0xff] %v4370_v34  ;;  %v1831_v57 = vadd.f32 %v1815_v32, %v1779_v1  ;;  %v1919_v60 = vmul.f32 %v4130_v52, %v1899_v54  ;;  %v2344_v19 = vmul.f32 %v4193_v23, %v4363_v30  ;;  %v4387_v41 = vld [vmem:[#allocation2 + $0xaa] sm:$0xff] }
 0xae5   : > { %v2352_v4 = vadd.f32 %v4237_v53, %v2300_v18  ;;  %v2099_v39 = vadd.f32 %v2083_v31, %v2047_v20  ;;  %v4383_v18 = vmul.f32 %v4207_v29, %v4370_v34  ;;  %v4385_v53 = vld [vmem:[#allocation2 + $0xa9] sm:$0xff]  ;;  %5740 = vst [vmem:[#allocation36_spill] sm:$0xff] %v4387_v41  ;;  %5741 = vst [vmem:[#allocation37_spill] sm:$0xff] %v4389_v8 }
 0xae6   : > { %5739 = vst [vmem:[#allocation35_spill] sm:$0xff] %v4385_v53  ;;  %v4394_v1 = vmul.f32 %v4227_v43, %v4372_v58  ;;  %v4396_v20 = vld [vmem:[#allocation2 + $0xab] sm:$0xff]  ;;  %v1883_v54 = vadd.f32 %v1867_v51, %v1831_v57  ;;  %v1972_v34 = vmul.f32 %v4142_v61, %v4389_v8  ;;  %5744 = vst [vmem:[#allocation40_spill] sm:$0xff] %v4402_v46  ;;  %v4416_v58 = vld [vmem:[#allocation2 + $0x21] sm:$0xff] }
 0xae7   : > { %v2404_v32 = vadd.f32 %v4249_v38, %v2352_v4  ;;  %5742 = vst [vmem:[#allocation38_spill] sm:$0xff] %v4396_v20  ;;  %v4398_v31 = vld [vmem:[#allocation2 + $0xac] sm:$0xff]  ;;  %v2151_v30 = vadd.f32 %v2135_v59, %v2099_v39  ;;  %v4406_v22 = vmul.f32 %v4231_v44, %v4385_v53  ;;  %v4410_v4 = vmul.f32 %v4243_v55, %v4387_v41  ;;  %v4427_v53 = vld [vmem:[#allocation2 + $0xc0] sm:$0xff] }
 0xae8   : > { %5743 = vst [vmem:[#allocation39_spill] sm:$0xff] %v4398_v31  ;;  %v4414_v38 = vmul.f32 %v4255_v62, %v4396_v20  ;;  %5747 = vst [vmem:[#allocation43_spill] sm:$0xff] %v4416_v58  ;;  %v4418_v51 = vld [vmem:[#allocation2 + $0x69] sm:$0xff]  ;;  %v4425_v59 = vmul.f32 %v4259_v63, %v4398_v31  ;;  %v1935_v41 = vadd.f32 %v1919_v60, %v1883_v54  ;;  %v4444_v54 = vld [vmem:[#allocation2 + $0xc1] sm:$0xff] }
 0xae9   : > { %5745 = vst [vmem:[#allocation41_spill] sm:$0xff] %v4410_v4  ;;  %5748 = vst [vmem:[#allocation44_spill] sm:$0xff] %v4418_v51  ;;  %v4420_v57 = vld [vmem:[#allocation2 + $0x6a] sm:$0xff]  ;;  %v2456_v39 = vadd.f32 %v4279_v25, %v2404_v32  ;;  %v2024_v8 = vmul.f32 %v4147_v5, %v4416_v58  ;;  %v4431_v20 = vld [vmem:[#allocation2 + $0x22] sm:$0xff]  ;;  %v4435_v4 = vmul.f32 %v4269_v14, %v4427_v53 }
 0xaea   : > { %5746 = vst [vmem:[#allocation42_spill] sm:$0xff] %v4414_v38  ;;  %5749 = vst [vmem:[#allocation45_spill] sm:$0xff] %v4420_v57  ;;  %v2203_v38 = vadd.f32 %v2187_v37, %v2151_v30  ;;  %v2076_v25 = vmul.f32 %v4153_v7, %v4431_v20  ;;  %v4439_v32 = vld [vmem:[#allocation2 + $0x6b] sm:$0xff]  ;;  %v1719_v31 = vmul.f32 %v4402_v46, %v4114_v47  ;;  %v4446_v58 = vld [vmem:[#allocation2 + $0xc2] sm:$0xff] }
 0xaeb   : > { %5750 = vst [vmem:[#allocation46_spill] sm:$0xff] %v4425_v59  ;;  %5751 = vst [vmem:[#allocation47_spill] sm:$0xff] %v4427_v53  ;;  %v2509_v60 = vadd.f32 %v4283_v33, %v2456_v39  ;;  %v1988_v59 = vadd.f32 %v1972_v34, %v1935_v41  ;;  %v4448_v30 = vld [vmem:[#allocation2 + $0x23] sm:$0xff]  ;;  %v1771_v37 = vmul.f32 %v4418_v51, %v4118_v48  ;;  %v4464_v34 = vld [vmem:[#allocation2 + $0x6c] sm:$0xff] }
 0xaec   : > { %5752 = vst [vmem:[#allocation48_spill] sm:$0xff] %v4431_v20  ;;  %5753 = vst [vmem:[#allocation49_spill] sm:$0xff] %v4435_v4  ;;  %v1823_v53 = vmul.f32 %v4420_v57, %v4122_v49  ;;  %v2256_v20 = vadd.f32 %v2240_v35, %v2203_v38  ;;  %v4456_v4 = vmul.f32 %v4273_v15, %v4444_v54  ;;  %v4467_v51 = vld [vmem:[#allocation2 + $0xc3] sm:$0xff] }
 0xaed   : > { %5754 = vst [vmem:[#allocation50_spill] sm:$0xff] %v4439_v32  ;;  %5755 = vst [vmem:[#allocation51_spill] sm:$0xff] %v4444_v54  ;;  %v4460_v33 = vmul.f32 %v4301_v36, %v4446_v58  ;;  %v2128_v41 = vmul.f32 %v4159_v10, %v4448_v30  ;;  %v2561_v39 = vadd.f32 %v4287_v45, %v2509_v60  ;;  %v4469_v14 = vld [vmem:[#allocation2 + $0xc4] sm:$0xff]  ;;  %v4486_v60 = vld [vmem:[#allocation2 + $0x38] sm:$0xff] }
 0xaee   : > { %5756 = vst [vmem:[#allocation52_spill] sm:$0xff] %v4446_v58  ;;  %5757 = vst [vmem:[#allocation53_spill] sm:$0xff] %v4448_v30  ;;  %v2040_v35 = vadd.f32 %v2024_v8, %v1988_v59  ;;  %v4471_v38 = vld [vmem:[#allocation2 + $0x24] sm:$0xff]  ;;  %v1787_v54 = vadd.f32 %v1771_v37, %v1719_v31  ;;  %v2308_v58 = vadd.f32 %v2292_v2, %v2256_v20  ;;  %v4488_v31 = vld [vmem:[#allocation2 + $0x39] sm:$0xff] }
 0xaef   : > { %5758 = vst [vmem:[#allocation54_spill] sm:$0xff] %v4456_v4  ;;  %5759 = vst [vmem:[#allocation55_spill] sm:$0xff] %v4460_v33  ;;  %v1875_v4 = vmul.f32 %v4439_v32, %v4126_v50  ;;  %v4477_v33 = vmul.f32 %v4315_v56, %v4467_v51  ;;  %v4481_v30 = vmul.f32 %v3910_v3, %v4469_v14  ;;  %v4490_v37 = vld [vmem:[#allocation2 + $0x3a] sm:$0xff] }
 0xaf0   : > { %5760 = vst [vmem:[#allocation56_spill] sm:$0xff] %v4464_v34  ;;  %5761 = vst [vmem:[#allocation57_spill] sm:$0xff] %v4467_v51  ;;  %v2180_v45 = vmul.f32 %v4163_v11, %v4471_v38  ;;  %v2613_v8 = vadd.f32 %v4297_v26, %v2561_v39  ;;  %v2092_v59 = vadd.f32 %v2076_v25, %v2040_v35  ;;  %v4500_v25 = vld [vmem:[#allocation2 + $0x80] sm:$0xff] }
 0xaf1   : > { %5762 = vst [vmem:[#allocation58_spill] sm:$0xff] %v4469_v14  ;;  %5763 = vst [vmem:[#allocation59_spill] sm:$0xff] %v4471_v38  ;;  %v1839_v2 = vadd.f32 %v1823_v53, %v1787_v54  ;;  %v1927_v20 = vmul.f32 %v4464_v34, %v4130_v52  ;;  %v2360_v51 = vadd.f32 %v2344_v19, %v2308_v58  ;;  %v4505_v53 = vld [vmem:[#allocation2 + $0x3c] sm:$0xff]  ;;  %v4507_v54 = vld [vmem:[#allocation2 + $0x50] sm:$0xff] }
 0xaf2   : > { %5764 = vst [vmem:[#allocation60_spill] sm:$0xff] %v4481_v30  ;;  %5765 = vst [vmem:[#allocation61_spill] sm:$0xff] %v4486_v60  ;;  %v2233_v14 = vmul.f32 %v4171_v0, %v4486_v60  ;;  %v2285_v38 = vmul.f32 %v4177_v16, %v4488_v31  ;;  %v2337_v26 = vmul.f32 %v4193_v23, %v4490_v37  ;;  %v4503_v30 = vld [vmem:[#allocation2 + $0x3b] sm:$0xff] }
 0xaf3   : > { %5766 = vst [vmem:[#allocation62_spill] sm:$0xff] %v4488_v31  ;;  %5767 = vst [vmem:[#allocation63_spill] sm:$0xff] %v4490_v37  ;;  %v2665_v39 = vadd.f32 %v4307_v42, %v2613_v8  ;;  %v2144_v35 = vadd.f32 %v2128_v41, %v2092_v59  ;;  %v1891_v19 = vadd.f32 %v1875_v4, %v1839_v2  ;;  %v4518_v41 = vld [vmem:[#allocation2 + $0x81] sm:$0xff]  ;;  %v4521_v4 = vld [vmem:[#allocation2 + $0x51] sm:$0xff] }
 0xaf4   : > { %5768 = vst [vmem:[#allocation64_spill] sm:$0xff] %v4500_v25  ;;  %5769 = vst [vmem:[#allocation65_spill] sm:$0xff] %v4503_v30  ;;  %v1980_v58 = vmul.f32 %v4142_v61, %v4500_v25  ;;  %v2412_v31 = vadd.f32 %v4379_v28, %v2360_v51  ;;  %v2389_v37 = vmul.f32 %v4197_v24, %v4503_v30  ;;  %v4523_v2 = vld [vmem:[#allocation2 + $0x52] sm:$0xff] }
 0xaf5   : > { %5770 = vst [vmem:[#allocation66_spill] sm:$0xff] %v4505_v53  ;;  %5771 = vst [vmem:[#allocation67_spill] sm:$0xff] %v4507_v54  ;;  %v2441_v60 = vmul.f32 %v4207_v29, %v4505_v53  ;;  %v2494_v42 = vmul.f32 %v4227_v43, %v4507_v54  ;;  %v2717_v8 = vadd.f32 %v4311_v9, %v2665_v39  ;;  %v4525_v25 = vld [vmem:[#allocation2 + $0x53] sm:$0xff] }
 0xaf6   : > { %v2196_v59 = vadd.f32 %v2180_v45, %v2144_v35  ;;  %5772 = vst [vmem:[#allocation68_spill] sm:$0xff] %v4521_v4  ;;  %5773 = vst [vmem:[#allocation69_spill] sm:$0xff] %v4523_v2  ;;  %v1943_v28 = vadd.f32 %v1927_v20, %v1891_v19  ;;  %v2032_v51 = vmul.f32 %v4147_v5, %v4518_v41  ;;  %v4540_v45 = vld [vmem:[#allocation2 + $0x82] sm:$0xff]  ;;  %v4543_v35 = vld [vmem:[#allocation2 + $0x54] sm:$0xff] }
 0xaf7   : > { %5774 = vst [vmem:[#allocation70_spill] sm:$0xff] %v4525_v25  ;;  %v2464_v53 = vadd.f32 %v4383_v18, %v2412_v31  ;;  %v2546_v54 = vmul.f32 %v4231_v44, %v4521_v4  ;;  %v4534_v30 = vmul.f32 %v4243_v55, %v4523_v2  ;;  %v4538_v9 = vmul.f32 %v4255_v62, %v4525_v25  ;;  %v4547_v31 = vld [vmem:[#allocation2 + $0x83] sm:$0xff] }
 0xaf8   : > { %5775 = vst [vmem:[#allocation71_spill] sm:$0xff] %v4540_v45  ;;  %v2770_v20 = vadd.f32 %v4321_v40, %v2717_v8  ;;  %v2249_v39 = vadd.f32 %v2233_v14, %v2196_v59  ;;  %5776 = vst [vmem:[#allocation72_spill] sm:$0xff] %v4543_v35  ;;  %v1996_v19 = vadd.f32 %v1980_v58, %v1943_v28  ;;  %v4559_v59 = vld [vmem:[#allocation2 + $0x84] sm:$0xff] }
 0xaf9   : > { %v2084_v18 = vmul.f32 %v4153_v7, %v4540_v45  ;;  %5777 = vst [vmem:[#allocation73_spill] sm:$0xff] %v4547_v31  ;;  %v2517_v2 = vadd.f32 %v4394_v1, %v2464_v53  ;;  %v4552_v4 = vmul.f32 %v4259_v63, %v4543_v35  ;;  %v2136_v25 = vmul.f32 %v4159_v10, %v4547_v31 }
 0xafa   : > { %v1712_v14 = vmul.f32 %v4149_v6, %v4114_v47  ;;  %v2822_v40 = vadd.f32 %v4325_v27, %v2770_v20  ;;  %v2301_v58 = vadd.f32 %v2285_v38, %v2249_v39  ;;  %v2048_v8 = vadd.f32 %v2032_v51, %v1996_v19  ;;  %5778 = vst [vmem:[#allocation74_spill] sm:$0xff] %v4559_v59  ;;  %v4571_v20 = vld [vmem:[#allocation2 + $0x98] sm:$0xff]  ;;  %v5780_v19 = vld [vmem:[#allocation41_spill] sm:$0xff] }
 0xafb   : > { %v1764_v28 = vmul.f32 %v4165_v12, %v4118_v48  ;;  %v2569_v1 = vadd.f32 %v4406_v22, %v2517_v2  ;;  %v2188_v53 = vmul.f32 %v4163_v11, %v4559_v59  ;;  %v1816_v35 = vmul.f32 %v4167_v13, %v4122_v49  ;;  %5779 = vst [vmem:[#allocation75_spill] sm:$0xff] %v4571_v20  ;;  %v5781_v22 = vld [vmem:[#allocation19_spill] sm:$0xff]  ;;  %v5782_v13 = vld [vmem:[#allocation8_spill] sm:$0xff] }
 0xafc   : > { %v1868_v6 = vmul.f32 %v4187_v21, %v4126_v50  ;;  %v2874_v27 = vadd.f32 %v4336_v17, %v2822_v40  ;;  %v2353_v38 = vadd.f32 %v2337_v26, %v2301_v58  ;;  %v2100_v51 = vadd.f32 %v2084_v18, %v2048_v8  ;;  %v5783_v21 = vld [vmem:[#allocation26_spill] sm:$0xff]  ;;  %v5785_v8 = vld [vmem:[#allocation44_spill] sm:$0xff] }
 0xafd   : > { %v1780_v39 = vadd.f32 %v1764_v28, %v1712_v14  ;;  %v2621_v12 = vadd.f32 %v5780_v19, %v2569_v1  ;;  %v4576_v2 = vmul.f32 %v5781_v22, %v4402_v46  ;;  %v2241_v59 = vmul.f32 %v4171_v0, %v4571_v20  ;;  %v4583_v18 = vld [vmem:[#allocation2 + $0x99] sm:$0xff]  ;;  %v5786_v19 = vld [vmem:[#allocation9_spill] sm:$0xff] }
 0xafe   : > { %v1920_v31 = vmul.f32 %v5782_v13, %v4130_v52  ;;  %v2926_v45 = vadd.f32 %v5783_v21, %v2874_v27  ;;  %v2405_v17 = vadd.f32 %v2389_v37, %v2353_v38  ;;  %v2152_v26 = vadd.f32 %v2136_v25, %v2100_v51  ;;  %v5784_v14 = vld [vmem:[#allocation42_spill] sm:$0xff]  ;;  %v5787_v13 = vld [vmem:[#allocation25_spill] sm:$0xff]  ;;  %v5790_v21 = vld [vmem:[#allocation11_spill] sm:$0xff] }
 0xaff   : > { %v1832_v40 = vadd.f32 %v1816_v35, %v1780_v39  ;;  %v2673_v58 = vadd.f32 %v5784_v14, %v2621_v12  ;;  %v4588_v28 = vmul.f32 %v4273_v15, %v5785_v8  ;;  %v2293_v1 = vmul.f32 %v4177_v16, %v4583_v18  ;;  %v4595_v25 = vld [vmem:[#allocation2 + $0x9a] sm:$0xff] }
 0xb00   : > { %v1973_v46 = vmul.f32 %v5786_v19, %v4142_v61  ;;  %v2978_v20 = vadd.f32 %v5787_v13, %v2926_v45  ;;  %v2457_v27 = vadd.f32 %v2441_v60, %v2405_v17  ;;  %v2204_v37 = vadd.f32 %v2188_v53, %v2152_v26  ;;  %5788 = vst [vmem:[#allocation41_spill] sm:$0xff] %v4595_v25  ;;  %v5789_v35 = vld [vmem:[#allocation46_spill] sm:$0xff]  ;;  %v5791_v19 = vld [vmem:[#allocation4_spill] sm:$0xff] }
 0xb01   : > { %v1884_v38 = vadd.f32 %v1868_v6, %v1832_v40  ;;  %v2725_v51 = vadd.f32 %v5789_v35, %v2673_v58  ;;  %v4600_v39 = vmul.f32 %v4301_v36, %v4420_v57  ;;  %v2345_v12 = vmul.f32 %v4193_v23, %v4595_v25  ;;  %v4607_v53 = vld [vmem:[#allocation2 + $0x9b] sm:$0xff]  ;;  %v5793_v6 = vld [vmem:[#allocation49_spill] sm:$0xff]  ;;  %v5794_v13 = vld [vmem:[#allocation12_spill] sm:$0xff] }
 0xb02   : > { %v2025_v14 = vmul.f32 %v5790_v21, %v4147_v5  ;;  %v3000_v8 = vadd.f32 %v5791_v19, %v2978_v20  ;;  %v2510_v45 = vadd.f32 %v2494_v42, %v2457_v27  ;;  %v2257_v60 = vadd.f32 %v2241_v59, %v2204_v37  ;;  %5792 = vst [vmem:[#allocation19_spill] sm:$0xff] %v4607_v53  ;;  %v4618_v42 = vld [vmem:[#allocation2 + $0x9c] sm:$0xff]  ;;  %v4684_v25 = vld [vmem:[#allocation2 + $0xc9] sm:$0xff] }
 0xb03   : > { %v1936_v17 = vadd.f32 %v1920_v31, %v1884_v38  ;;  %v2778_v26 = vadd.f32 %v5793_v6, %v2725_v51  ;;  %v4612_v40 = vmul.f32 %v4315_v56, %v4439_v32  ;;  %v2397_v58 = vmul.f32 %v4197_v24, %v4607_v53  ;;  %5795 = vst [vmem:[#allocation8_spill] sm:$0xff] %v4618_v42  ;;  %v5796_v27 = vld [vmem:[#allocation54_spill] sm:$0xff] }
 0xb04   : > { %v2077_v35 = vmul.f32 %v5794_v13, %v4153_v7  ;;  %v3016_v21 = vmax.f32 %v3000_v8, 0.0  ;;  %v2562_v57 = vadd.f32 %v2546_v54, %v2510_v45  ;;  %v2309_v20 = vadd.f32 %v2293_v1, %v2257_v60  ;;  %v5797_v51 = vld [vmem:[#allocation14_spill] sm:$0xff]  ;;  %v4630_v1 = vld [vmem:[#allocation2 + $0xb0] sm:$0xff]  ;;  %5816 = vst [vmem:[#allocation4_spill] sm:$0xff] %v4684_v25 }
 0xb05   : > { %v1989_v59 = vadd.f32 %v1973_v46, %v1936_v17  ;;  %v2830_v31 = vadd.f32 %v5796_v27, %v2778_v26  ;;  %v4623_v37 = vmul.f32 %v3910_v3, %v4464_v34  ;;  %v2449_v38 = vmul.f32 %v4207_v29, %v4618_v42  ;;  %5798 = vst [vmem:[#allocation26_spill] sm:$0xff] %v4630_v1  ;;  %v4632_v45 = vld [vmem:[#allocation2 + $0xb1] sm:$0xff]  ;;  %v5801_v17 = vld [vmem:[#allocation55_spill] sm:$0xff] }
 0xb06   : > { %v2129_v6 = vmul.f32 %v5797_v51, %v4159_v10  ;;  %v3032_v32 = vmin.f32 %v3016_v21, 6.0  ;;  %v2614_v8 = vadd.f32 %v4534_v30, %v2562_v57  ;;  %v2361_v54 = vadd.f32 %v2345_v12, %v2309_v20  ;;  %5799 = vst [vmem:[#allocation42_spill] sm:$0xff] %v4632_v45  ;;  %v4634_v46 = vld [vmem:[#allocation2 + $0xb2] sm:$0xff]  ;;  %v5802_v20 = vld [vmem:[#allocation15_spill] sm:$0xff] }
 0xb07   : > { %5800 = vst [vmem:[#allocation9_spill] sm:$0xff] %v4634_v46  ;;  %v2041_v60 = vadd.f32 %v2025_v14, %v1989_v59  ;;  %v2882_v26 = vadd.f32 %v5801_v17, %v2830_v31  ;;  %v2502_v13 = vmul.f32 %v4227_v43, %v4630_v1  ;;  %v2554_v27 = vmul.f32 %v4231_v44, %v4632_v45  ;;  %v5803_v31 = vld [vmem:[#allocation16_spill] sm:$0xff]  ;;  %v5804_v17 = vld [vmem:[#allocation22_spill] sm:$0xff]  ;;  %v5805_v34 = vld [vmem:[#allocation23_spill] sm:$0xff] }
 0xb08   : > { %v2606_v21 = vmul.f32 %v4243_v55, %v4634_v46  ;;  %3702 = vmatprep.mubr.msk.f32.mxu0 %vm309_vm0, %v3032_v32  ;;  %v2666_v57 = vadd.f32 %v4538_v9, %v2614_v8  ;;  %v2413_v30 = vadd.f32 %v2397_v58, %v2361_v54  ;;  %v2181_v14 = vmul.f32 %v5802_v20, %v4163_v11  ;;  %v4655_v9 = vld [vmem:[#allocation2 + $0xb3] sm:$0xff]  ;;  %v5808_v54 = vld [vmem:[#allocation60_spill] sm:$0xff]  ;;  %v5809_v20 = vld [vmem:[#allocation27_spill] sm:$0xff] }
 0xb09   : > { %v2093_v12 = vadd.f32 %v2077_v35, %v2041_v60  ;;  %v2934_v59 = vadd.f32 %v4477_v33, %v2882_v26  ;;  %v2234_v51 = vmul.f32 %v5803_v31, %v4171_v0  ;;  %v1720_v45 = vmul.f32 %v5804_v17, %v4114_v47  ;;  %5806 = vst [vmem:[#allocation25_spill] sm:$0xff] %v4655_v9  ;;  %v5807_v35 = vld [vmem:[#allocation24_spill] sm:$0xff] }
 0xb0a   : > { %v1772_v46 = vmul.f32 %v5805_v34, %v4118_v48  ;;  %v2718_v32 = vadd.f32 %v4552_v4, %v2666_v57  ;;  %v2465_v1 = vadd.f32 %v2449_v38, %v2413_v30  ;;  %v1824_v8 = vmul.f32 %v5807_v35, %v4122_v49  ;;  %v4665_v4 = vld [vmem:[#allocation2 + $0xb4] sm:$0xff] }
 0xb0b   : > { %v2145_v58 = vadd.f32 %v2129_v6, %v2093_v12  ;;  %v2986_v33 = vadd.f32 %v5808_v54, %v2934_v59  ;;  %v2658_v60 = vmul.f32 %v4255_v62, %v4655_v9  ;;  %v1876_v31 = vmul.f32 %v5809_v20, %v4126_v50  ;;  %5810 = vst [vmem:[#allocation46_spill] sm:$0xff] %v4665_v4  ;;  %v5811_v6 = vld [vmem:[#allocation17_spill] sm:$0xff] }
 0xb0c   : > { %v1788_v26 = vadd.f32 %v1772_v46, %v1720_v45  ;;  %v2771_v42 = vadd.f32 %v4576_v2, %v2718_v32  ;;  %v2518_v53 = vadd.f32 %v2502_v13, %v2465_v1  ;;  %v2286_v57 = vmul.f32 %v5811_v6, %v4177_v16  ;;  %v5812_v45 = vld [vmem:[#allocation28_spill] sm:$0xff]  ;;  %v5814_v13 = vld [vmem:[#allocation18_spill] sm:$0xff]  ;;  %v5815_v6 = vld [vmem:[#allocation29_spill] sm:$0xff] }
 0xb0d   : > { %v2197_v38 = vadd.f32 %v2181_v14, %v2145_v58  ;;  %v3008_v30 = vadd.f32 %v5791_v19, %v2986_v33  ;;  %v2710_v12 = vmul.f32 %v4259_v63, %v4665_v4  ;;  %v1928_v46 = vmul.f32 %v5812_v45, %v4130_v52  ;;  %v4675_v2 = vld [vmem:[#allocation2 + $0xc8] sm:$0xff] }
 0xb0e   : > { %v1840_v59 = vadd.f32 %v1824_v8, %v1788_v26  ;;  %v2823_v54 = vadd.f32 %v4588_v28, %v2771_v42  ;;  %v2570_v9 = vadd.f32 %v2554_v27, %v2518_v53  ;;  %5813 = vst [vmem:[#allocation11_spill] sm:$0xff] %v4675_v2  ;;  %v2338_v14 = vmul.f32 %v5814_v13, %v4193_v23  ;;  %v5817_v53 = vld [vmem:[#allocation20_spill] sm:$0xff] }
 0xb0f   : > { %v2250_v1 = vadd.f32 %v2234_v51, %v2197_v38  ;;  %v3024_v32 = vmax.f32 %v3008_v30, 0.0  ;;  %v2763_v58 = vmul.f32 %v5781_v22, %v4675_v2  ;;  %v1981_v8 = vmul.f32 %v5815_v6, %v4142_v61  ;;  %v5818_v30 = vld [vmem:[#allocation30_spill] sm:$0xff]  ;;  %v4693_v6 = vld [vmem:[#allocation2 + $0xca] sm:$0xff] }
 0xb10   : > { %v1892_v33 = vadd.f32 %v1876_v31, %v1840_v59  ;;  %v2875_v26 = vadd.f32 %v4600_v39, %v2823_v54  ;;  %v2622_v4 = vadd.f32 %v2606_v21, %v2570_v9  ;;  %v2390_v42 = vmul.f32 %v5817_v53, %v4197_v24  ;;  %5819 = vst [vmem:[#allocation49_spill] sm:$0xff] %v4693_v6  ;;  %v4695_v39 = vld [vmem:[#allocation2 + $0xcb] sm:$0xff] }
 0xb11   : > { %v2302_v28 = vadd.f32 %v2286_v57, %v2250_v1  ;;  %v3040_v27 = vmin.f32 %v3024_v32, 6.0  ;;  %v2815_v51 = vmul.f32 %v4273_v15, %v4684_v25  ;;  %v2033_v31 = vmul.f32 %v5818_v30, %v4147_v5  ;;  %5820 = vst [vmem:[#allocation12_spill] sm:$0xff] %v4695_v39  ;;  %v5821_v9 = vld [vmem:[#allocation21_spill] sm:$0xff] }
 0xb12   : > { %v1944_v38 = vadd.f32 %v1928_v46, %v1892_v33  ;;  %v2927_v59 = vadd.f32 %v4612_v40, %v2875_v26  ;;  %v2674_v13 = vadd.f32 %v2658_v60, %v2622_v4  ;;  %v2442_v57 = vmul.f32 %v5821_v9, %v4207_v29  ;;  %v5822_v40 = vld [vmem:[#allocation31_spill] sm:$0xff]  ;;  %v4707_v33 = vld [vmem:[#allocation2 + $0xcc] sm:$0xff] }
 0xb13   : > { %v2354_v21 = vadd.f32 %v2338_v14, %v2302_v28  ;;  %3714 = vmatprep.mubr.msk.f32.mxu1 %vm309_vm0, %v3040_v27  ;;  %v2867_v54 = vmul.f32 %v4301_v36, %v4693_v6  ;;  %v2919_v46 = vmul.f32 %v4315_v56, %v4695_v39  ;;  %v2085_v60 = vmul.f32 %v5822_v40, %v4153_v7  ;;  %v5824_v26 = vld [vmem:[#allocation5_spill] sm:$0xff]  ;;  %v5825_v27 = vld [vmem:[#allocation6_spill] sm:$0xff] }
 0xb14   : > { %v1997_v1 = vadd.f32 %v1981_v8, %v1944_v38  ;;  %v2979_v4 = vadd.f32 %v4623_v37, %v2927_v59  ;;  %v2726_v32 = vadd.f32 %v2710_v12, %v2674_v13  ;;  %5823 = vst [vmem:[#allocation54_spill] sm:$0xff] %v4707_v33  ;;  %v2495_v28 = vmul.f32 %v5824_v26, %v4227_v43  ;;  %v5826_v8 = vld [vmem:[#allocation32_spill] sm:$0xff]  ;;  %v5827_v59 = vld [vmem:[#allocation7_spill] sm:$0xff]  ;;  %v5828_v13 = vld [vmem:[#allocation10_spill] sm:$0xff] }
 0xb15   : > { %v2406_v14 = vadd.f32 %v2390_v42, %v2354_v21  ;;  %v2971_v53 = vmul.f32 %v3910_v3, %v4707_v33  ;;  %v2547_v30 = vmul.f32 %v5825_v27, %v4231_v44  ;;  %v2137_v38 = vmul.f32 %v5826_v8, %v4159_v10  ;;  %v5829_v33 = vld [vmem:[#allocation33_spill] sm:$0xff] }
 0xb16   : > { %v2049_v9 = vadd.f32 %v2033_v31, %v1997_v1  ;;  %v3001_v40 = vadd.f32 %v5791_v19, %v2979_v4  ;;  %v2779_v37 = vadd.f32 %v2763_v58, %v2726_v32  ;;  %v2599_v42 = vmul.f32 %v5827_v59, %v4243_v55  ;;  %v5830_v27 = vld [vmem:[#allocation37_spill] sm:$0xff]  ;;  %v5831_v4 = vld [vmem:[#allocation43_spill] sm:$0xff]  ;;  %v5832_v32 = vld [vmem:[#allocation34_spill] sm:$0xff] }
 0xb17   : > { %v2458_v12 = vadd.f32 %v2442_v57, %v2406_v14  ;;  %v2651_v21 = vmul.f32 %v5828_v13, %v4255_v62  ;;  %v2189_v39 = vmul.f32 %v5829_v33, %v4163_v11  ;;  %v1713_v31 = vmul.f32 %v5830_v27, %v4114_v47  ;;  %v5833_v59 = vld [vmem:[#allocation48_spill] sm:$0xff] }
 0xb18   : > { %v2101_v26 = vadd.f32 %v2085_v60, %v2049_v9  ;;  %v3017_v1 = vmax.f32 %v3001_v40, 0.0  ;;  %v2831_v6 = vadd.f32 %v2815_v51, %v2779_v37  ;;  %v1765_v58 = vmul.f32 %v5831_v4, %v4118_v48  ;;  %v5834_v60 = vld [vmem:[#allocation53_spill] sm:$0xff]  ;;  %v5836_v37 = vld [vmem:[#allocation35_spill] sm:$0xff] }
 0xb19   : > { %v2511_v8 = vadd.f32 %v2495_v28, %v2458_v12  ;;  %v2242_v14 = vmul.f32 %v5832_v32, %v4171_v0  ;;  %v1817_v13 = vmul.f32 %v5833_v59, %v4122_v49  ;;  %v1869_v9 = vmul.f32 %v5834_v60, %v4126_v50  ;;  %v5835_v51 = vld [vmem:[#allocation13_spill] sm:$0xff]  ;;  %v5837_v32 = vld [vmem:[#allocation59_spill] sm:$0xff]  ;;  %v5841_v60 = vld [vmem:[#allocation62_spill] sm:$0xff] }
 0xb1a   : > { %v2153_v57 = vadd.f32 %v2137_v38, %v2101_v26  ;;  %v3033_v33 = vmin.f32 %v3017_v1, 6.0  ;;  %v2883_v25 = vadd.f32 %v2867_v54, %v2831_v6  ;;  %v1781_v27 = vadd.f32 %v1765_v58, %v1713_v31  ;;  %v5839_v58 = vld [vmem:[#allocation61_spill] sm:$0xff] }
 0xb1b   : > { %v2563_v2 = vadd.f32 %v2547_v30, %v2511_v8  ;;  %v2703_v28 = vmul.f32 %v5835_v51, %v4259_v63  ;;  %v2294_v38 = vmul.f32 %v5836_v37, %v4177_v16  ;;  %v1921_v59 = vmul.f32 %v5837_v32, %v4130_v52  ;;  %v5838_v30 = vld [vmem:[#allocation36_spill] sm:$0xff]  ;;  %v5843_v37 = vld [vmem:[#allocation63_spill] sm:$0xff] }
 0xb1c   : > { %v2205_v40 = vadd.f32 %v2189_v39, %v2153_v57  ;;  %3703 = vmatmul.mubr.msk.f32.vlgmr.msra.gmra.mrb[0].mxu0 %vm309_vm0, %v3033_v33  ;;  %v2935_v12 = vadd.f32 %v2919_v46, %v2883_v25  ;;  %v1833_v4 = vadd.f32 %v1817_v13, %v1781_v27  ;;  %v2756_v6 = vmul.f32 %v5781_v22, %v5804_v17  ;;  %v5840_v46 = vld [vmem:[#allocation38_spill] sm:$0xff]  ;;  %v5845_v32 = vld [vmem:[#allocation51_spill] sm:$0xff] }
 0xb1d   : > { %v2615_v26 = vadd.f32 %v2599_v42, %v2563_v2  ;;  %v2346_v31 = vmul.f32 %v5838_v30, %v4193_v23  ;;  %v1974_v57 = vmul.f32 %v5839_v58, %v4142_v61  ;;  %v2808_v25 = vmul.f32 %v4273_v15, %v5805_v34  ;;  %v5848_v58 = vld [vmem:[#allocation71_spill] sm:$0xff] }
 0xb1e   : > { %v2258_v54 = vadd.f32 %v2242_v14, %v2205_v40  ;;  %v2987_v1 = vadd.f32 %v2971_v53, %v2935_v12  ;;  %v1885_v8 = vadd.f32 %v1869_v9, %v1833_v4  ;;  %v2398_v42 = vmul.f32 %v5840_v46, %v4197_v24  ;;  %v5842_v9 = vld [vmem:[#allocation39_spill] sm:$0xff] }
 0xb1f   : > { %v2667_v39 = vadd.f32 %v2651_v21, %v2615_v26  ;;  %v2026_v33 = vmul.f32 %v5841_v60, %v4147_v5  ;;  %v2860_v53 = vmul.f32 %v4301_v36, %v5807_v35  ;;  %v2450_v27 = vmul.f32 %v5842_v9, %v4207_v29  ;;  %v5844_v26 = vld [vmem:[#allocation47_spill] sm:$0xff] }
 0xb20   : > { %v2310_v2 = vadd.f32 %v2294_v38, %v2258_v54  ;;  %v3009_v13 = vadd.f32 %v5791_v19, %v2987_v1  ;;  %v1937_v14 = vadd.f32 %v1921_v59, %v1885_v8  ;;  %v2078_v38 = vmul.f32 %v5843_v37, %v4153_v7 }
 0xb21   : > { %v2719_v17 = vadd.f32 %v2703_v28, %v2667_v39  ;;  %v2912_v28 = vmul.f32 %v4315_v56, %v5809_v20  ;;  %v2503_v4 = vmul.f32 %v5844_v26, %v4227_v43  ;;  %v2555_v35 = vmul.f32 %v5845_v32, %v4231_v44  ;;  %v5847_v39 = vld [vmem:[#allocation64_spill] sm:$0xff]  ;;  %v4789_v26 = vld [vmem:[#allocation2 + $0xd8] sm:$0xff] }
 0xb22   : > { %v2362_v21 = vadd.f32 %v2346_v31, %v2310_v2  ;;  %v3025_v51 = vmax.f32 %v3009_v13, 0.0  ;;  %v1990_v40 = vadd.f32 %v1974_v57, %v1937_v14  ;;  %v5846_v31 = vld [vmem:[#allocation65_spill] sm:$0xff]  ;;  %v1721_v8 = vmul.f32 %v5847_v39, %v4114_v47  ;;  %v5850_v14 = vld [vmem:[#allocation52_spill] sm:$0xff]  ;;  %5855 = vst [vmem:[#allocation14_spill] sm:$0xff] %v4789_v26  ;;  %v5856_v32 = vld [vmem:[#allocation74_spill] sm:$0xff] }
 0xb23   : > { %v2772_v34 = vadd.f32 %v2756_v6, %v2719_v17  ;;  %v2130_v6 = vmul.f32 %v5846_v31, %v4159_v10  ;;  %v1773_v20 = vmul.f32 %v4518_v41, %v4118_v48  ;;  %v1825_v57 = vmul.f32 %v5848_v58, %v4122_v49 }
 0xb24   : > { %v2414_v12 = vadd.f32 %v2398_v42, %v2362_v21  ;;  %v3041_v59 = vmin.f32 %v3025_v51, 6.0  ;;  %v2042_v30 = vadd.f32 %v2026_v33, %v1990_v40  ;;  %v5849_v42 = vld [vmem:[#allocation66_spill] sm:$0xff]  ;;  %v2607_v60 = vmul.f32 %v5850_v14, %v4243_v55  ;;  %v5851_v21 = vld [vmem:[#allocation73_spill] sm:$0xff]  ;;  %v5853_v40 = vld [vmem:[#allocation67_spill] sm:$0xff] }
 0xb25   : > { %v2824_v54 = vadd.f32 %v2808_v25, %v2772_v34  ;;  %v2964_v25 = vmul.f32 %v3910_v3, %v5812_v45  ;;  %v2182_v13 = vmul.f32 %v5849_v42, %v4163_v11  ;;  %v1789_v33 = vadd.f32 %v1773_v20, %v1721_v8  ;;  %v5852_v51 = vld [vmem:[#allocation57_spill] sm:$0xff]  ;;  %v4801_v20 = vld [vmem:[#allocation2 + $0xda] sm:$0xff] }
 0xb26   : > { %v2466_v1 = vadd.f32 %v2450_v27, %v2414_v12  ;;  %3715 = vmatmul.mubr.msk.f32.vlgmr.msra.gmra.mrb[0].mxu1 %vm309_vm0, %v3041_v59  ;;  %v2094_v46 = vadd.f32 %v2078_v38, %v2042_v30  ;;  %v1877_v9 = vmul.f32 %v5851_v21, %v4126_v50  ;;  %v2659_v34 = vmul.f32 %v5852_v51, %v4255_v62  ;;  %v5854_v38 = vld [vmem:[#allocation58_spill] sm:$0xff]  ;;  %v5862_v14 = vld [vmem:[#allocation69_spill] sm:$0xff] }
 0xb27   : > { %v2876_v2 = vadd.f32 %v2860_v53, %v2824_v54  ;;  %v2235_v45 = vmul.f32 %v5853_v40, %v4171_v0  ;;  %v2711_v12 = vmul.f32 %v5854_v38, %v4259_v63  ;;  %v1929_v59 = vmul.f32 %v5856_v32, %v4130_v52  ;;  %v4795_v30 = vld [vmem:[#allocation2 + $0xd9] sm:$0xff]  ;;  %5859 = vst [vmem:[#allocation15_spill] sm:$0xff] %v4801_v20 }
 0xb28   : > { %v2519_v17 = vadd.f32 %v2503_v4, %v2466_v1  ;;  %v2146_v53 = vadd.f32 %v2130_v6, %v2094_v46  ;;  %v1841_v4 = vadd.f32 %v1825_v57, %v1789_v33  ;;  %5857 = vst [vmem:[#allocation55_spill] sm:$0xff] %v4795_v30  ;;  %v5858_v6 = vld [vmem:[#allocation68_spill] sm:$0xff]  ;;  %v2816_v8 = vmul.f32 %v4273_v15, %v4795_v30  ;;  %v4814_v51 = vld [vmem:[#allocation2 + $0xdc] sm:$0xff] }
 0xb29   : > { %v2928_v27 = vadd.f32 %v2912_v28, %v2876_v2  ;;  %v2764_v28 = vmul.f32 %v5781_v22, %v4789_v26  ;;  %v2287_v1 = vmul.f32 %v5858_v6, %v4177_v16  ;;  %v5860_v2 = vld [vmem:[#allocation75_spill] sm:$0xff]  ;;  %v2868_v42 = vmul.f32 %v4301_v36, %v4801_v20  ;;  %5863 = vst [vmem:[#allocation22_spill] sm:$0xff] %v4814_v51  ;;  %v5865_v6 = vld [vmem:[#allocation72_spill] sm:$0xff] }
 0xb2a   : > { %v2571_v37 = vadd.f32 %v2555_v35, %v2519_v17  ;;  %v2198_v31 = vadd.f32 %v2182_v13, %v2146_v53  ;;  %v1893_v57 = vadd.f32 %v1877_v9, %v1841_v4  ;;  %v1982_v46 = vmul.f32 %v5860_v2, %v4142_v61  ;;  %v4808_v17 = vld [vmem:[#allocation2 + $0xdb] sm:$0xff] }
 0xb2b   : > { %v2980_v54 = vadd.f32 %v2964_v25, %v2928_v27  ;;  %5861 = vst [vmem:[#allocation16_spill] sm:$0xff] %v4808_v17  ;;  %v2920_v27 = vmul.f32 %v4315_v56, %v4808_v17  ;;  %v2034_v53 = vmul.f32 %v4583_v18, %v4147_v5  ;;  %v5867_v17 = vld [vmem:[#allocation40_spill] sm:$0xff] }
 0xb2c   : > { %v2623_v35 = vadd.f32 %v2607_v60, %v2571_v37  ;;  %v2251_v13 = vadd.f32 %v2235_v45, %v2198_v31  ;;  %v2339_v60 = vmul.f32 %v5862_v14, %v4193_v23  ;;  %v1945_v9 = vadd.f32 %v1929_v59, %v1893_v57  ;;  %v5864_v45 = vld [vmem:[#allocation70_spill] sm:$0xff]  ;;  %v5866_v59 = vld [vmem:[#allocation41_spill] sm:$0xff] }
 0xb2d   : > { %v3002_v25 = vadd.f32 %v5791_v19, %v2980_v54  ;;  %v2972_v37 = vmul.f32 %v3910_v3, %v4814_v51  ;;  %v2391_v4 = vmul.f32 %v5864_v45, %v4197_v24  ;;  %v1694_v54 = vld [vmem:[#allocation2 + $0x30] sm:$0xff]  ;;  %v2086_v57 = vmul.f32 %v5866_v59, %v4153_v7 }
 0xb2e   : > { %v2675_v33 = vadd.f32 %v2659_v34, %v2623_v35  ;;  %v2303_v38 = vadd.f32 %v2287_v1, %v2251_v13  ;;  %v1746_v31 = vld [vmem:[#allocation2 + $0x31] sm:$0xff]  ;;  %v2443_v35 = vmul.f32 %v5865_v6, %v4207_v29  ;;  %v1998_v2 = vadd.f32 %v1982_v46, %v1945_v9  ;;  %v5868_v1 = vld [vmem:[#allocation19_spill] sm:$0xff]  ;;  %v5869_v9 = vld [vmem:[#allocation44_spill] sm:$0xff] }
 0xb2f   : > { %v3018_v40 = vmax.f32 %v3002_v25, 0.0  ;;  %v1798_v14 = vld [vmem:[#allocation2 + $0x32] sm:$0xff]  ;;  %v2496_v51 = vmul.f32 %v5867_v17, %v4227_v43  ;;  %v2138_v13 = vmul.f32 %v5868_v1, %v4159_v10 }
 0xb30   : > { %v2727_v34 = vadd.f32 %v2711_v12, %v2675_v33  ;;  %v2355_v25 = vadd.f32 %v2339_v60, %v2303_v38  ;;  %v1850_v45 = vld [vmem:[#allocation2 + $0x33] sm:$0xff]  ;;  %v2050_v30 = vadd.f32 %v2034_v53, %v1998_v2  ;;  %v1714_v12 = vmul.f32 %v4114_v47, %v1694_v54  ;;  %v5870_v60 = vld [vmem:[#allocation8_spill] sm:$0xff] }
 0xb31   : > { %v3034_v18 = vmin.f32 %v3018_v40, 6.0  ;;  %v1766_v33 = vmul.f32 %v4118_v48, %v1746_v31  ;;  %v2548_v40 = vmul.f32 %v5869_v9, %v4231_v44  ;;  %v2190_v38 = vmul.f32 %v5870_v60, %v4163_v11  ;;  %v1902_v6 = vld [vmem:[#allocation2 + $0x34] sm:$0xff] }
 0xb32   : > { %v2780_v20 = vadd.f32 %v2764_v28, %v2727_v34  ;;  %v2407_v46 = vadd.f32 %v2391_v4, %v2355_v25  ;;  %v1818_v17 = vmul.f32 %v4122_v49, %v1798_v14  ;;  %v2102_v1 = vadd.f32 %v2086_v57, %v2050_v30  ;;  %v5871_v31 = vld [vmem:[#allocation45_spill] sm:$0xff]  ;;  %v5872_v4 = vld [vmem:[#allocation50_spill] sm:$0xff]  ;;  %v5874_v30 = vld [vmem:[#allocation56_spill] sm:$0xff] }
 0xb33   : > { %3705 = vmatprep.mubr.msk.f32.mxu0 %vm309_vm0, %v3034_v18  ;;  %v1782_v28 = vadd.f32 %v1766_v33, %v1714_v12  ;;  %v1870_v53 = vmul.f32 %v4126_v50, %v1850_v45  ;;  %v2600_v34 = vmul.f32 %v5871_v31, %v4243_v55  ;;  %v2652_v2 = vmul.f32 %v5872_v4, %v4255_v62  ;;  %v5873_v18 = vld [vmem:[#allocation26_spill] sm:$0xff]  ;;  %v4852_v12 = vld [vmem:[#allocation2 + $0x48] sm:$0xff] }
 0xb34   : > { %v2832_v59 = vadd.f32 %v2816_v8, %v2780_v20  ;;  %v2459_v54 = vadd.f32 %v2443_v35, %v2407_v46  ;;  %v2243_v25 = vmul.f32 %v5873_v18, %v4171_v0  ;;  %v2154_v60 = vadd.f32 %v2138_v13, %v2102_v1  ;;  %v5875_v57 = vld [vmem:[#allocation42_spill] sm:$0xff]  ;;  %5876 = vst [vmem:[#allocation23_spill] sm:$0xff] %v4852_v12 }
 0xb35   : > { %v1834_v26 = vadd.f32 %v1818_v17, %v1782_v28  ;;  %v1922_v14 = vmul.f32 %v4130_v52, %v1902_v6  ;;  %v2704_v20 = vmul.f32 %v5874_v30, %v4259_v63  ;;  %v2757_v35 = vmul.f32 %v5781_v22, %v5847_v39  ;;  %v5877_v39 = vld [vmem:[#allocation9_spill] sm:$0xff]  ;;  %v5886_v30 = vld [vmem:[#allocation11_spill] sm:$0xff] }
 0xb36   : > { %v2884_v9 = vadd.f32 %v2868_v42, %v2832_v59  ;;  %v2512_v8 = vadd.f32 %v2496_v51, %v2459_v54  ;;  %v2295_v45 = vmul.f32 %v5875_v57, %v4177_v16  ;;  %v2206_v46 = vadd.f32 %v2190_v38, %v2154_v60  ;;  %v4862_v59 = vld [vmem:[#allocation2 + $0x49] sm:$0xff] }
 0xb37   : > { %v1886_v31 = vadd.f32 %v1870_v53, %v1834_v26  ;;  %v1975_v42 = vmul.f32 %v4142_v61, %v4852_v12  ;;  %v2809_v51 = vmul.f32 %v4273_v15, %v4518_v41  ;;  %v2861_v17 = vmul.f32 %v4301_v36, %v5848_v58  ;;  %5878 = vst [vmem:[#allocation24_spill] sm:$0xff] %v4862_v59  ;;  %v5879_v58 = vld [vmem:[#allocation25_spill] sm:$0xff] }
 0xb38   : > { %v2936_v33 = vadd.f32 %v2920_v27, %v2884_v9  ;;  %v2564_v13 = vadd.f32 %v2548_v40, %v2512_v8  ;;  %v2347_v6 = vmul.f32 %v5877_v39, %v4193_v23  ;;  %v2259_v28 = vadd.f32 %v2243_v25, %v2206_v46  ;;  %v4876_v54 = vld [vmem:[#allocation2 + $0x4a] sm:$0xff] }
 0xb39   : > { %v1938_v27 = vadd.f32 %v1922_v14, %v1886_v31  ;;  %v2027_v26 = vmul.f32 %v4147_v5, %v4862_v59  ;;  %v4868_v40 = vmul.f32 %v4315_v56, %v5851_v21  ;;  %v4872_v41 = vmul.f32 %v3910_v3, %v5856_v32  ;;  %5880 = vst [vmem:[#allocation60_spill] sm:$0xff] %v4876_v54  ;;  %v4883_v21 = vld [vmem:[#allocation2 + $0x4b] sm:$0xff]  ;;  %v5885_v14 = vld [vmem:[#allocation46_spill] sm:$0xff] }
 0xb3a   : > { %v2988_v1 = vadd.f32 %v2972_v37, %v2936_v33  ;;  %v2616_v38 = vadd.f32 %v2600_v34, %v2564_v13  ;;  %v2399_v53 = vmul.f32 %v5879_v58, %v4197_v24  ;;  %v4878_v37 = vld [vmem:[#allocation2 + $0x90] sm:$0xff]  ;;  %v2311_v18 = vadd.f32 %v2295_v45, %v2259_v28  ;;  %5882 = vst [vmem:[#allocation17_spill] sm:$0xff] %v4883_v21 }
 0xb3b   : > { %5881 = vst [vmem:[#allocation27_spill] sm:$0xff] %v4878_v37  ;;  %v1991_v25 = vadd.f32 %v1975_v42, %v1938_v27  ;;  %v2079_v34 = vmul.f32 %v4153_v7, %v4876_v54  ;;  %v4885_v9 = vld [vmem:[#allocation2 + $0x91] sm:$0xff]  ;;  %v2451_v8 = vmul.f32 %v5885_v14, %v4207_v29  ;;  %v2504_v57 = vmul.f32 %v5886_v30, %v4227_v43  ;;  %v4913_v14 = vld [vmem:[#allocation2 + $0x60] sm:$0xff] }
 0xb3c   : > { %v3010_v4 = vadd.f32 %v5791_v19, %v2988_v1  ;;  %5883 = vst [vmem:[#allocation28_spill] sm:$0xff] %v4885_v9  ;;  %v4887_v32 = vld [vmem:[#allocation2 + $0x92] sm:$0xff]  ;;  %v2668_v60 = vadd.f32 %v2652_v2, %v2616_v38  ;;  %v2131_v45 = vmul.f32 %v4159_v10, %v4883_v21  ;;  %v2363_v46 = vadd.f32 %v2347_v6, %v2311_v18  ;;  %v5888_v2 = vld [vmem:[#allocation4_spill] sm:$0xff] }
 0xb3d   : > { %5884 = vst [vmem:[#allocation18_spill] sm:$0xff] %v4887_v32  ;;  %v2043_v31 = vadd.f32 %v2027_v26, %v1991_v25  ;;  %v4895_v42 = vld [vmem:[#allocation2 + $0x93] sm:$0xff]  ;;  %v1722_v13 = vmul.f32 %v4878_v37, %v4114_v47  ;;  %v2556_v1 = vmul.f32 %v5888_v2, %v4231_v44  ;;  %v1774_v27 = vmul.f32 %v4885_v9, %v4118_v48 }
 0xb3e   : > { %v3026_v33 = vmax.f32 %v3010_v4, 0.0  ;;  %5887 = vst [vmem:[#allocation29_spill] sm:$0xff] %v4895_v42  ;;  %v2720_v39 = vadd.f32 %v2704_v20, %v2668_v60  ;;  %v4901_v28 = vld [vmem:[#allocation2 + $0x4c] sm:$0xff]  ;;  %v1826_v38 = vmul.f32 %v4887_v32, %v4122_v49  ;;  %v2415_v6 = vadd.f32 %v2399_v53, %v2363_v46  ;;  %v4909_v18 = vld [vmem:[#allocation2 + $0x94] sm:$0xff]  ;;  %5892 = vst [vmem:[#allocation21_spill] sm:$0xff] %v4913_v14 }
 0xb3f   : > { %5889 = vst [vmem:[#allocation20_spill] sm:$0xff] %v4901_v28  ;;  %v2095_v26 = vadd.f32 %v2079_v34, %v2043_v31  ;;  %v2183_v4 = vmul.f32 %v4163_v11, %v4901_v28  ;;  %5890 = vst [vmem:[#allocation30_spill] sm:$0xff] %v4909_v18  ;;  %v5891_v25 = vld [vmem:[#allocation49_spill] sm:$0xff]  ;;  %v1790_v30 = vadd.f32 %v1774_v27, %v1722_v13  ;;  %v5893_v53 = vld [vmem:[#allocation12_spill] sm:$0xff] }
 0xb40   : > { %v3042_v58 = vmin.f32 %v3026_v33, 6.0  ;;  %v2773_v20 = vadd.f32 %v2757_v35, %v2720_v39  ;;  %v2608_v60 = vmul.f32 %v5891_v25, %v4243_v55  ;;  %v1878_v2 = vmul.f32 %v4895_v42, %v4126_v50  ;;  %v5894_v39 = vld [vmem:[#allocation54_spill] sm:$0xff]  ;;  %v4924_v28 = vld [vmem:[#allocation2 + $0xe0] sm:$0xff]  ;;  %v4993_v59 = vld [vmem:[#allocation2 + $0xac] sm:$0xff] }
 0xb41   : > { %v2467_v33 = vadd.f32 %v2451_v8, %v2415_v6  ;;  %v2660_v34 = vmul.f32 %v5893_v53, %v4255_v62  ;;  %v2147_v46 = vadd.f32 %v2131_v45, %v2095_v26  ;;  %v2236_v31 = vmul.f32 %v4171_v0, %v4913_v14  ;;  %5895 = vst [vmem:[#allocation31_spill] sm:$0xff] %v4924_v28  ;;  %v4926_v13 = vld [vmem:[#allocation2 + $0x61] sm:$0xff]  ;;  %v1747_v14 = vld [vmem:[#allocation2 + $0x39] sm:$0xff] }
 0xb42   : > { %3717 = vmatprep.mubr.msk.f32.mxu1 %vm309_vm0, %v3042_v58  ;;  %v2825_v35 = vadd.f32 %v2809_v51, %v2773_v20  ;;  %v2712_v25 = vmul.f32 %v5894_v39, %v4259_v63  ;;  %5896 = vst [vmem:[#allocation5_spill] sm:$0xff] %v4926_v13  ;;  %v1842_v27 = vadd.f32 %v1826_v38, %v1790_v30  ;;  %v4932_v45 = vld [vmem:[#allocation2 + $0xe1] sm:$0xff] }
 0xb43   : > { %v1930_v58 = vmul.f32 %v4909_v18, %v4130_v52  ;;  %v2520_v8 = vadd.f32 %v2504_v57, %v2467_v33  ;;  %v2765_v6 = vmul.f32 %v5781_v22, %v4924_v28  ;;  %5897 = vst [vmem:[#allocation6_spill] sm:$0xff] %v4932_v45  ;;  %v2199_v26 = vadd.f32 %v2183_v4, %v2147_v46  ;;  %v4936_v20 = vld [vmem:[#allocation2 + $0xa8] sm:$0xff] }
 0xb44   : > { %v2288_v51 = vmul.f32 %v4177_v16, %v4926_v13  ;;  %5898 = vst [vmem:[#allocation32_spill] sm:$0xff] %v4936_v20  ;;  %v2877_v53 = vadd.f32 %v2861_v17, %v2825_v35  ;;  %v4940_v39 = vmul.f32 %v4273_v15, %v4932_v45  ;;  %v4942_v38 = vld [vmem:[#allocation2 + $0xe2] sm:$0xff]  ;;  %v1894_v57 = vadd.f32 %v1878_v2, %v1842_v27 }
 0xb45   : > { %5899 = vst [vmem:[#allocation7_spill] sm:$0xff] %v4942_v38  ;;  %v4944_v30 = vld [vmem:[#allocation2 + $0x62] sm:$0xff]  ;;  %v1983_v33 = vmul.f32 %v4142_v61, %v4936_v20  ;;  %v2572_v28 = vadd.f32 %v2556_v1, %v2520_v8  ;;  %v4950_v4 = vmul.f32 %v4301_v36, %v4942_v38  ;;  %v2252_v17 = vadd.f32 %v2236_v31, %v2199_v26 }
 0xb46   : > { %5900 = vst [vmem:[#allocation10_spill] sm:$0xff] %v4944_v30  ;;  %v4952_v46 = vld [vmem:[#allocation2 + $0xe3] sm:$0xff]  ;;  %v2340_v35 = vmul.f32 %v4193_v23, %v4944_v30  ;;  %v2929_v13 = vadd.f32 %v4868_v40, %v2877_v53  ;;  %v1946_v38 = vadd.f32 %v1930_v58, %v1894_v57  ;;  %v1695_v30 = vld [vmem:[#allocation2 + $0x38] sm:$0xff] }
 0xb47   : > { %5901 = vst [vmem:[#allocation33_spill] sm:$0xff] %v4952_v46  ;;  %v4956_v45 = vld [vmem:[#allocation2 + $0xa9] sm:$0xff]  ;;  %v4961_v2 = vmul.f32 %v4315_v56, %v4952_v46  ;;  %v2624_v26 = vadd.f32 %v2608_v60, %v2572_v28  ;;  %v2304_v40 = vadd.f32 %v2288_v51, %v2252_v17  ;;  %v4982_v57 = vld [vmem:[#allocation2 + $0x78] sm:$0xff] }
 0xb48   : > { %5902 = vst [vmem:[#allocation37_spill] sm:$0xff] %v4956_v45  ;;  %v4963_v27 = vld [vmem:[#allocation2 + $0xe4] sm:$0xff]  ;;  %v2035_v31 = vmul.f32 %v4147_v5, %v4956_v45  ;;  %v2981_v21 = vadd.f32 %v4872_v41, %v2929_v13  ;;  %5907 = vst [vmem:[#allocation13_spill] sm:$0xff] %v4982_v57  ;;  %v1999_v28 = vadd.f32 %v1983_v33, %v1946_v38  ;;  %v1799_v51 = vld [vmem:[#allocation2 + $0x3a] sm:$0xff] }
 0xb49   : > { %5903 = vst [vmem:[#allocation43_spill] sm:$0xff] %v4963_v27  ;;  %v4965_v1 = vld [vmem:[#allocation2 + $0x63] sm:$0xff]  ;;  %v4973_v20 = vmul.f32 %v3910_v3, %v4963_v27  ;;  %v4986_v27 = vld [vmem:[#allocation2 + $0xab] sm:$0xff]  ;;  %v2676_v17 = vadd.f32 %v2660_v34, %v2624_v26  ;;  %v2356_v45 = vadd.f32 %v2340_v35, %v2304_v40  ;;  %v1851_v13 = vld [vmem:[#allocation2 + $0x3b] sm:$0xff]  ;;  %v1715_v38 = vmul.f32 %v4114_v47, %v1695_v30 }
 0xb4a   : > { %5904 = vst [vmem:[#allocation34_spill] sm:$0xff] %v4965_v1  ;;  %v4967_v8 = vld [vmem:[#allocation2 + $0x64] sm:$0xff]  ;;  %v2392_v53 = vmul.f32 %v4197_v24, %v4965_v1  ;;  %5908 = vst [vmem:[#allocation35_spill] sm:$0xff] %v4986_v27  ;;  %v2497_v1 = vmul.f32 %v4227_v43, %v4982_v57  ;;  %v2139_v41 = vmul.f32 %v4159_v10, %v4986_v27  ;;  %v1903_v26 = vld [vmem:[#allocation2 + $0x3c] sm:$0xff] }
 0xb4b   : > { %5905 = vst [vmem:[#allocation48_spill] sm:$0xff] %v4967_v8  ;;  %v4977_v46 = vld [vmem:[#allocation2 + $0xaa] sm:$0xff]  ;;  %v2444_v58 = vmul.f32 %v4207_v29, %v4967_v8  ;;  %v3003_v8 = vadd.f32 %v5791_v19, %v2981_v21  ;;  %v2051_v54 = vadd.f32 %v2035_v31, %v1999_v28  ;;  %v1767_v33 = vmul.f32 %v4118_v48, %v1747_v14  ;;  %v5000_v57 = vld [vmem:[#allocation2 + $0x79] sm:$0xff] }
 0xb4c   : > { %5906 = vst [vmem:[#allocation53_spill] sm:$0xff] %v4977_v46  ;;  %v2087_v60 = vmul.f32 %v4153_v7, %v4977_v46  ;;  %v2728_v46 = vadd.f32 %v2712_v25, %v2676_v17  ;;  %v2408_v12 = vadd.f32 %v2392_v53, %v2356_v45  ;;  %v2191_v34 = vmul.f32 %v4163_v11, %v4993_v59  ;;  %v5002_v21 = vld [vmem:[#allocation2 + $0xc0] sm:$0xff] }
 0xb4d   : > { %v1819_v35 = vmul.f32 %v4122_v49, %v1799_v51  ;;  %v3019_v40 = vmax.f32 %v3003_v8, 0.0  ;;  %v1783_v31 = vadd.f32 %v1767_v33, %v1715_v38  ;;  %v1871_v28 = vmul.f32 %v4126_v50, %v1851_v13  ;;  %v5009_v53 = vld [vmem:[#allocation2 + $0x7a] sm:$0xff] }
 0xb4e   : > { %v2103_v27 = vadd.f32 %v2087_v60, %v2051_v54  ;;  %v2781_v30 = vadd.f32 %v2765_v6, %v2728_v46  ;;  %v2460_v3 = vadd.f32 %v2444_v58, %v2408_v12  ;;  %v2549_v14 = vmul.f32 %v4231_v44, %v5000_v57  ;;  %5909 = vst [vmem:[#allocation59_spill] sm:$0xff] %v5009_v53  ;;  %v5011_v8 = vld [vmem:[#allocation2 + $0x7b] sm:$0xff]  ;;  %v5021_v58 = vld [vmem:[#allocation2 + $0x50] sm:$0xff] }
 0xb4f   : > { %v2244_v25 = vmul.f32 %v4171_v0, %v5002_v21  ;;  %v3035_v45 = vmin.f32 %v3019_v40, 6.0  ;;  %5910 = vst [vmem:[#allocation36_spill] sm:$0xff] %v5011_v8  ;;  %v1835_v54 = vadd.f32 %v1819_v35, %v1783_v31  ;;  %v1923_v60 = vmul.f32 %v4130_v52, %v1903_v26  ;;  %v5019_v46 = vld [vmem:[#allocation2 + $0xc1] sm:$0xff]  ;;  %5912 = vst [vmem:[#allocation38_spill] sm:$0xff] %v5021_v58  ;;  %v5037_v31 = vld [vmem:[#allocation2 + $0x51] sm:$0xff] }
 0xb50   : > { %v2155_v51 = vadd.f32 %v2139_v41, %v2103_v27  ;;  %v2833_v17 = vadd.f32 %v4940_v39, %v2781_v30  ;;  %v2513_v13 = vadd.f32 %v2497_v1, %v2460_v3  ;;  %v2601_v12 = vmul.f32 %v4243_v55, %v5009_v53  ;;  %5911 = vst [vmem:[#allocation61_spill] sm:$0xff] %v5019_v46  ;;  %v5024_v38 = vld [vmem:[#allocation2 + $0x7c] sm:$0xff] }
 0xb51   : > { %v2653_v6 = vmul.f32 %v4255_v62, %v5011_v8  ;;  %3706 = vmatmul.mubr.msk.f32.gmra.mrb[2].mxu0 %vm309_vm0, %v3035_v45  ;;  %5913 = vst [vmem:[#allocation62_spill] sm:$0xff] %v5024_v38  ;;  %v2296_v41 = vmul.f32 %v4177_v16, %v5019_v46  ;;  %v1887_v39 = vadd.f32 %v1871_v28, %v1835_v54  ;;  %v5035_v40 = vld [vmem:[#allocation2 + $0xc2] sm:$0xff]  ;;  %5915 = vst [vmem:[#allocation63_spill] sm:$0xff] %v5037_v31  ;;  %v5104_v46 = vld [vmem:[#allocation2 + $0x6a] sm:$0xff] }
 0xb52   : > { %v2207_v27 = vadd.f32 %v2191_v34, %v2155_v51  ;;  %v1976_v3 = vmul.f32 %v4142_v61, %v5021_v58  ;;  %v2885_v1 = vadd.f32 %v4950_v4, %v2833_v17  ;;  %v2565_v33 = vadd.f32 %v2549_v14, %v2513_v13  ;;  %5914 = vst [vmem:[#allocation39_spill] sm:$0xff] %v5035_v40  ;;  %v5048_v17 = vld [vmem:[#allocation2 + $0xc3] sm:$0xff]  ;;  %v5050_v13 = vld [vmem:[#allocation2 + $0x52] sm:$0xff] }
 0xb53   : > { %v2705_v35 = vmul.f32 %v4259_v63, %v5024_v38  ;;  %v2758_v26 = vmul.f32 %v5781_v22, %v4878_v37  ;;  %v2348_v28 = vmul.f32 %v4193_v23, %v5035_v40  ;;  %v1939_v30 = vadd.f32 %v1923_v60, %v1887_v39  ;;  %5916 = vst [vmem:[#allocation47_spill] sm:$0xff] %v5048_v17  ;;  %v5094_v37 = vld [vmem:[#allocation2 + $0x9c] sm:$0xff] }
 0xb54   : > { %v2260_v34 = vadd.f32 %v2244_v25, %v2207_v27  ;;  %v2028_v45 = vmul.f32 %v4147_v5, %v5037_v31  ;;  %v2937_v4 = vadd.f32 %v4961_v2, %v2885_v1  ;;  %v2617_v14 = vadd.f32 %v2601_v12, %v2565_v33  ;;  %5917 = vst [vmem:[#allocation51_spill] sm:$0xff] %v5050_v13  ;;  %v5054_v27 = vld [vmem:[#allocation2 + $0xc4] sm:$0xff]  ;;  %v5058_v12 = vld [vmem:[#allocation2 + $0x98] sm:$0xff] }
 0xb55   : > { %v2810_v51 = vmul.f32 %v4273_v15, %v4885_v9  ;;  %v2862_v54 = vmul.f32 %v4301_v36, %v4887_v32  ;;  %v2400_v60 = vmul.f32 %v4197_v24, %v5048_v17  ;;  %5918 = vst [vmem:[#allocation65_spill] sm:$0xff] %v5054_v27  ;;  %v1992_v39 = vadd.f32 %v1976_v3, %v1939_v30  ;;  %v5067_v9 = vld [vmem:[#allocation2 + $0x99] sm:$0xff] }
 0xb56   : > { %v2312_v25 = vadd.f32 %v2296_v41, %v2260_v34  ;;  %v2080_v2 = vmul.f32 %v4153_v7, %v5050_v13  ;;  %5919 = vst [vmem:[#allocation64_spill] sm:$0xff] %v5058_v12  ;;  %v2989_v1 = vadd.f32 %v4973_v20, %v2937_v4  ;;  %v2669_v33 = vadd.f32 %v2653_v6, %v2617_v14  ;;  %v5065_v34 = vld [vmem:[#allocation2 + $0x53] sm:$0xff] }
 0xb57   : > { %v2914_v32 = vmul.f32 %v4315_v56, %v4895_v42  ;;  %v2452_v41 = vmul.f32 %v4207_v29, %v5054_v27  ;;  %5920 = vst [vmem:[#allocation71_spill] sm:$0xff] %v5065_v34  ;;  %5921 = vst [vmem:[#allocation66_spill] sm:$0xff] %v5067_v9  ;;  %v5069_v31 = vld [vmem:[#allocation2 + $0x9a] sm:$0xff]  ;;  %v2044_v58 = vadd.f32 %v2028_v45, %v1992_v39 }
 0xb58   : > { %5922 = vst [vmem:[#allocation52_spill] sm:$0xff] %v5069_v31  ;;  %v2364_v3 = vadd.f32 %v2348_v28, %v2312_v25  ;;  %v5923_v30 = vld [vmem:[#allocation14_spill] sm:$0xff]  ;;  %v2132_v20 = vmul.f32 %v4159_v10, %v5065_v34  ;;  %v3011_v4 = vadd.f32 %v5791_v19, %v2989_v1  ;;  %v2721_v14 = vadd.f32 %v2705_v35, %v2669_v33  ;;  %v5927_v33 = vld [vmem:[#allocation55_spill] sm:$0xff] }
 0xb59   : > { %v2505_v13 = vmul.f32 %v5923_v30, %v4227_v43  ;;  %v5075_v6 = vld [vmem:[#allocation2 + $0x54] sm:$0xff]  ;;  %v1723_v28 = vmul.f32 %v5058_v12, %v4114_v47  ;;  %v2096_v17 = vadd.f32 %v2080_v2, %v2044_v58  ;;  %v5084_v30 = vld [vmem:[#allocation2 + $0x68] sm:$0xff]  ;;  %v1775_v45 = vmul.f32 %v5067_v9, %v4118_v48  ;;  %5930 = vst [vmem:[#allocation74_spill] sm:$0xff] %v5104_v46 }
 0xb5a   : > { %5924 = vst [vmem:[#allocation73_spill] sm:$0xff] %v5075_v6  ;;  %v2184_v42 = vmul.f32 %v4163_v11, %v5075_v6  ;;  %v5080_v27 = vld [vmem:[#allocation2 + $0x9b] sm:$0xff]  ;;  %v2416_v25 = vadd.f32 %v2400_v60, %v2364_v3  ;;  %5926 = vst [vmem:[#allocation67_spill] sm:$0xff] %v5084_v30  ;;  %v1827_v39 = vmul.f32 %v5069_v31, %v4122_v49  ;;  %v3027_v1 = vmax.f32 %v3011_v4, 0.0  ;;  %v5096_v2 = vld [vmem:[#allocation2 + $0x69] sm:$0xff] }
 0xb5b   : > { %5925 = vst [vmem:[#allocation57_spill] sm:$0xff] %v5080_v27  ;;  %v2774_v35 = vadd.f32 %v2758_v26, %v2721_v14  ;;  %v2557_v6 = vmul.f32 %v5927_v33, %v4231_v44  ;;  %v2237_v34 = vmul.f32 %v4171_v0, %v5084_v30  ;;  %v2148_v58 = vadd.f32 %v2132_v20, %v2096_v17  ;;  %v5929_v26 = vld [vmem:[#allocation15_spill] sm:$0xff] }
 0xb5c   : > { %v2468_v60 = vadd.f32 %v2452_v41, %v2416_v25  ;;  %5928 = vst [vmem:[#allocation58_spill] sm:$0xff] %v5096_v2  ;;  %v1791_v3 = vadd.f32 %v1775_v45, %v1723_v28  ;;  %v1879_v38 = vmul.f32 %v5080_v27, %v4126_v50  ;;  %v3043_v40 = vmin.f32 %v3027_v1, 6.0  ;;  %v5931_v28 = vld [vmem:[#allocation3_spill] sm:$0xff]  ;;  %v5932_v25 = vld [vmem:[#allocation16_spill] sm:$0xff] }
 0xb5d   : > { %v2826_v8 = vadd.f32 %v2810_v51, %v2774_v35  ;;  %v2609_v4 = vmul.f32 %v5929_v26, %v4243_v55  ;;  %v2289_v14 = vmul.f32 %v4177_v16, %v5096_v2  ;;  %v2200_v30 = vadd.f32 %v2184_v42, %v2148_v58  ;;  %v5117_v35 = vld [vmem:[#allocation2 + $0xf0] sm:$0xff]  ;;  %v5948_v2 = vld [vmem:[#allocation60_spill] sm:$0xff] }
 0xb5e   : > { %v2521_v33 = vadd.f32 %v2505_v13, %v2468_v60  ;;  %v1843_v41 = vadd.f32 %v1827_v39, %v1791_v3  ;;  %v1931_v17 = vmul.f32 %v5094_v37, %v4130_v52  ;;  %3718 = vmatmul.mubr.msk.f32.gmra.mrb[2].mxu1 %vm309_vm0, %v3043_v40  ;;  %v2966_v51 = vmul.f32 %v5931_v28, %v4909_v18  ;;  %v5115_v13 = vld [vmem:[#allocation2 + $0xb0] sm:$0xff] }
 0xb5f   : > { %v2878_v20 = vadd.f32 %v2862_v54, %v2826_v8  ;;  %v2661_v45 = vmul.f32 %v5932_v25, %v4255_v62  ;;  %v2341_v1 = vmul.f32 %v4193_v23, %v5104_v46  ;;  %5933 = vst [vmem:[#allocation68_spill] sm:$0xff] %v5115_v13  ;;  %5934 = vst [vmem:[#allocation75_spill] sm:$0xff] %v5117_v35  ;;  %v5119_v60 = vld [vmem:[#allocation2 + $0x6b] sm:$0xff]  ;;  %v5936_v54 = vld [vmem:[#allocation22_spill] sm:$0xff] }
 0xb60   : > { %v2573_v42 = vadd.f32 %v2557_v6, %v2521_v33  ;;  %v2253_v39 = vadd.f32 %v2237_v34, %v2200_v30  ;;  %5935 = vst [vmem:[#allocation69_spill] sm:$0xff] %v5119_v60  ;;  %v1895_v58 = vadd.f32 %v1879_v38, %v1843_v41  ;;  %v1984_v8 = vmul.f32 %v4142_v61, %v5115_v13  ;;  %v5129_v6 = vld [vmem:[#allocation2 + $0xb1] sm:$0xff]  ;;  %v5947_v46 = vld [vmem:[#allocation24_spill] sm:$0xff] }
 0xb61   : > { %v2930_v40 = vadd.f32 %v2914_v32, %v2878_v20  ;;  %v2713_v3 = vmul.f32 %v5936_v54, %v4259_v63  ;;  %v2766_v26 = vmul.f32 %v5781_v22, %v5117_v35  ;;  %v2393_v25 = vmul.f32 %v4197_v24, %v5119_v60  ;;  %5937 = vst [vmem:[#allocation70_spill] sm:$0xff] %v5129_v6  ;;  %v5131_v34 = vld [vmem:[#allocation2 + $0xf1] sm:$0xff] }
 0xb62   : > { %v2625_v33 = vadd.f32 %v2609_v4, %v2573_v42  ;;  %5938 = vst [vmem:[#allocation72_spill] sm:$0xff] %v5131_v34  ;;  %v5133_v30 = vld [vmem:[#allocation2 + $0xf2] sm:$0xff]  ;;  %v2305_v38 = vadd.f32 %v2289_v14, %v2253_v39  ;;  %v1947_v32 = vadd.f32 %v1931_v17, %v1895_v58  ;;  %v2036_v20 = vmul.f32 %v4147_v5, %v5129_v6  ;;  %v5149_v17 = vld [vmem:[#allocation2 + $0x80] sm:$0xff] }
 0xb63   : > { %5939 = vst [vmem:[#allocation41_spill] sm:$0xff] %v5133_v30  ;;  %v5135_v41 = vld [vmem:[#allocation2 + $0x6c] sm:$0xff]  ;;  %v2982_v54 = vadd.f32 %v2966_v51, %v2930_v40  ;;  %v2818_v13 = vmul.f32 %v4273_v15, %v5131_v34  ;;  %v2870_v60 = vmul.f32 %v4301_v36, %v5133_v30  ;;  %5943 = vst [vmem:[#allocation8_spill] sm:$0xff] %v5149_v17  ;;  %v5151_v58 = vld [vmem:[#allocation2 + $0x81] sm:$0xff] }
 0xb64   : > { %5940 = vst [vmem:[#allocation40_spill] sm:$0xff] %v5135_v41  ;;  %v2445_v4 = vmul.f32 %v4207_v29, %v5135_v41  ;;  %v5145_v42 = vld [vmem:[#allocation2 + $0xb2] sm:$0xff]  ;;  %v2677_v35 = vadd.f32 %v2661_v45, %v2625_v33  ;;  %v2357_v39 = vadd.f32 %v2341_v1, %v2305_v38  ;;  %5944 = vst [vmem:[#allocation45_spill] sm:$0xff] %v5151_v58 }
 0xb65   : > { %5941 = vst [vmem:[#allocation19_spill] sm:$0xff] %v5145_v42  ;;  %v5147_v14 = vld [vmem:[#allocation2 + $0xf3] sm:$0xff]  ;;  %v2000_v51 = vadd.f32 %v1984_v8, %v1947_v32  ;;  %v2088_v40 = vmul.f32 %v4153_v7, %v5145_v42  ;;  %v3004_v34 = vadd.f32 %v5791_v19, %v2982_v54  ;;  %v2498_v41 = vmul.f32 %v4227_v43, %v5149_v17  ;;  %v5946_v54 = vld [vmem:[#allocation23_spill] sm:$0xff] }
 0xb66   : > { %5942 = vst [vmem:[#allocation44_spill] sm:$0xff] %v5147_v14  ;;  %v2922_v30 = vmul.f32 %v4315_v56, %v5147_v14  ;;  %v2550_v45 = vmul.f32 %v4231_v44, %v5151_v58  ;;  %v5162_v1 = vld [vmem:[#allocation2 + $0xb3] sm:$0xff]  ;;  %v2729_v33 = vadd.f32 %v2713_v3, %v2677_v35  ;;  %v2409_v38 = vadd.f32 %v2393_v25, %v2357_v39  ;;  %v5174_v35 = vld [vmem:[#allocation2 + $0x82] sm:$0xff] }
 0xb67   : > { %5945 = vst [vmem:[#allocation50_spill] sm:$0xff] %v5162_v1  ;;  %v2052_v6 = vadd.f32 %v2036_v20, %v2000_v51  ;;  %v2140_v8 = vmul.f32 %v4159_v10, %v5162_v1  ;;  %v3020_v32 = vmax.f32 %v3004_v34, 0.0  ;;  %v5166_v42 = vld [vmem:[#allocation2 + $0xb4] sm:$0xff]  ;;  %v1716_v14 = vmul.f32 %v5946_v54, %v4114_v47  ;;  %5949 = vst [vmem:[#allocation26_spill] sm:$0xff] %v5174_v35  ;;  %v5180_v39 = vld [vmem:[#allocation2 + $0xc8] sm:$0xff] }
 0xb68   : > { %v1768_v17 = vmul.f32 %v5947_v46, %v4118_v48  ;;  %v1820_v58 = vmul.f32 %v5948_v2, %v4122_v49  ;;  %v2782_v18 = vadd.f32 %v2766_v26, %v2729_v33  ;;  %v2461_v53 = vadd.f32 %v2445_v4, %v2409_v38  ;;  %5950 = vst [vmem:[#allocation56_spill] sm:$0xff] %v5180_v39  ;;  %v5951_v46 = vld [vmem:[#allocation17_spill] sm:$0xff]  ;;  %v5186_v4 = vld [vmem:[#allocation2 + $0x83] sm:$0xff] }
 0xb69   : > { %v2104_v3 = vadd.f32 %v2088_v40, %v2052_v6  ;;  %v2192_v25 = vmul.f32 %v4163_v11, %v5166_v42  ;;  %v3036_v34 = vmin.f32 %v3020_v32, 6.0  ;;  %v2602_v20 = vmul.f32 %v4243_v55, %v5174_v35  ;;  %v5184_v2 = vld [vmem:[#allocation2 + $0xf4] sm:$0xff]  ;;  %5953 = vst [vmem:[#allocation9_spill] sm:$0xff] %v5186_v4 }
 0xb6a   : > { %v1784_v51 = vadd.f32 %v1768_v17, %v1716_v14  ;;  %v1872_v54 = vmul.f32 %v5951_v46, %v4126_v50  ;;  %v2834_v1 = vadd.f32 %v2818_v13, %v2782_v18  ;;  %5952 = vst [vmem:[#allocation42_spill] sm:$0xff] %v5184_v2  ;;  %v2514_v26 = vadd.f32 %v2498_v41, %v2461_v53  ;;  %v5195_v17 = vld [vmem:[#allocation2 + $0xc9] sm:$0xff] }
 0xb6b   : > { %v2156_v6 = vadd.f32 %v2140_v8, %v2104_v3  ;;  %v2245_v40 = vmul.f32 %v4171_v0, %v5180_v39  ;;  %3708 = vmatprep.mubr.msk.f32.mxu0 %vm309_vm0, %v3036_v34  ;;  %v2974_v33 = vmul.f32 %v5931_v28, %v5184_v2  ;;  %v2654_v14 = vmul.f32 %v4255_v62, %v5186_v4  ;;  %v5955_v13 = vld [vmem:[#allocation20_spill] sm:$0xff] }
 0xb6c   : > { %5954 = vst [vmem:[#allocation25_spill] sm:$0xff] %v5195_v17  ;;  %v1836_v18 = vadd.f32 %v1820_v58, %v1784_v51  ;;  %v1924_v53 = vmul.f32 %v5955_v13, %v4130_v52  ;;  %v2886_v41 = vadd.f32 %v2870_v60, %v2834_v1  ;;  %v2566_v38 = vadd.f32 %v2550_v45, %v2514_v26  ;;  %v5199_v8 = vld [vmem:[#allocation2 + $0x84] sm:$0xff]  ;;  %v5958_v51 = vld [vmem:[#allocation21_spill] sm:$0xff] }
 0xb6d   : > { %5956 = vst [vmem:[#allocation46_spill] sm:$0xff] %v5199_v8  ;;  %v2208_v32 = vadd.f32 %v2192_v25, %v2156_v6  ;;  %v2297_v3 = vmul.f32 %v4177_v16, %v5195_v17  ;;  %v2706_v34 = vmul.f32 %v4259_v63, %v5199_v8  ;;  %v2759_v46 = vmul.f32 %v5781_v22, %v5058_v12  ;;  %v5207_v4 = vld [vmem:[#allocation2 + $0xca] sm:$0xff] }
 0xb6e   : > { %5957 = vst [vmem:[#allocation11_spill] sm:$0xff] %v5207_v4  ;;  %v1888_v58 = vadd.f32 %v1872_v54, %v1836_v18  ;;  %v1977_v13 = vmul.f32 %v5958_v51, %v4142_v61  ;;  %v2938_v60 = vadd.f32 %v2922_v30, %v2886_v41  ;;  %v2618_v45 = vadd.f32 %v2602_v20, %v2566_v38  ;;  %v5217_v8 = vld [vmem:[#allocation2 + $0xcb] sm:$0xff] }
 0xb6f   : > { %v2261_v1 = vadd.f32 %v2245_v40, %v2208_v32  ;;  %v2349_v25 = vmul.f32 %v4193_v23, %v5207_v4  ;;  %v2811_v26 = vmul.f32 %v4273_v15, %v5067_v9  ;;  %v2863_v6 = vmul.f32 %v4301_v36, %v5069_v31  ;;  %5959 = vst [vmem:[#allocation4_spill] sm:$0xff] %v5217_v8  ;;  %v5960_v54 = vld [vmem:[#allocation5_spill] sm:$0xff] }
 0xb70   : > { %v1940_v12 = vadd.f32 %v1924_v53, %v1888_v58  ;;  %v2029_v18 = vmul.f32 %v5960_v54, %v4147_v5  ;;  %v2990_v17 = vadd.f32 %v2974_v33, %v2938_v60  ;;  %v2670_v51 = vadd.f32 %v2654_v14, %v2618_v45  ;;  %v5223_v40 = vld [vmem:[#allocation2 + $0xcc] sm:$0xff]  ;;  %v5962_v53 = vld [vmem:[#allocation10_spill] sm:$0xff] }
 0xb71   : > { %v2313_v30 = vadd.f32 %v2297_v3, %v2261_v1  ;;  %v2401_v20 = vmul.f32 %v4197_v24, %v5217_v8  ;;  %5961 = vst [vmem:[#allocation49_spill] sm:$0xff] %v5223_v40  ;;  %v2915_v41 = vmul.f32 %v4315_v56, %v5080_v27  ;;  %v2453_v38 = vmul.f32 %v4207_v29, %v5223_v40  ;;  %v5963_v3 = vld [vmem:[#allocation31_spill] sm:$0xff]  ;;  %v5964_v45 = vld [vmem:[#allocation6_spill] sm:$0xff]  ;;  %v5966_v40 = vld [vmem:[#allocation32_spill] sm:$0xff] }
 0xb72   : > { %v1993_v32 = vadd.f32 %v1977_v13, %v1940_v12  ;;  %v2081_v58 = vmul.f32 %v5962_v53, %v4153_v7  ;;  %v3012_v54 = vadd.f32 %v5791_v19, %v2990_v17  ;;  %v2722_v33 = vadd.f32 %v2706_v34, %v2670_v51  ;;  %v5965_v27 = vld [vmem:[#allocation34_spill] sm:$0xff]  ;;  %v5967_v17 = vld [vmem:[#allocation37_spill] sm:$0xff]  ;;  %v5968_v51 = vld [vmem:[#allocation48_spill] sm:$0xff] }
 0xb73   : > { %v2365_v14 = vadd.f32 %v2349_v25, %v2313_v30  ;;  %v2506_v60 = vmul.f32 %v5963_v3, %v4227_v43  ;;  %v2558_v1 = vmul.f32 %v5964_v45, %v4231_v44  ;;  %v2133_v9 = vmul.f32 %v5965_v27, %v4159_v10  ;;  %v5969_v3 = vld [vmem:[#allocation53_spill] sm:$0xff] }
 0xb74   : > { %v2045_v31 = vadd.f32 %v2029_v18, %v1993_v32  ;;  %v1724_v12 = vmul.f32 %v5966_v40, %v4114_v47  ;;  %v3028_v13 = vmax.f32 %v3012_v54, 0.0  ;;  %v2775_v8 = vadd.f32 %v2759_v46, %v2722_v33  ;;  %v5970_v18 = vld [vmem:[#allocation35_spill] sm:$0xff] }
 0xb75   : > { %v2417_v53 = vadd.f32 %v2401_v20, %v2365_v14  ;;  %v1776_v34 = vmul.f32 %v5967_v17, %v4118_v48  ;;  %v2185_v30 = vmul.f32 %v5968_v51, %v4163_v11  ;;  %v1828_v45 = vmul.f32 %v5969_v3, %v4122_v49  ;;  %v5971_v20 = vld [vmem:[#allocation7_spill] sm:$0xff] }
 0xb76   : > { %v2097_v25 = vadd.f32 %v2081_v58, %v2045_v31  ;;  %v1880_v32 = vmul.f32 %v5970_v18, %v4126_v50  ;;  %v3044_v27 = vmin.f32 %v3028_v13, 6.0  ;;  %v2827_v4 = vadd.f32 %v2811_v26, %v2775_v8  ;;  %v5972_v58 = vld [vmem:[#allocation13_spill] sm:$0xff] }
 0xb77   : > { %v2469_v2 = vadd.f32 %v2453_v38, %v2417_v53  ;;  %v1792_v35 = vadd.f32 %v1776_v34, %v1724_v12  ;;  %v2967_v46 = vmul.f32 %v5931_v28, %v5094_v37  ;;  %v2610_v54 = vmul.f32 %v5971_v20, %v4243_v55  ;;  %v5973_v26 = vld [vmem:[#allocation33_spill] sm:$0xff]  ;;  %v5267_v20 = vld [vmem:[#allocation2 + $0xf8] sm:$0xff] }
 0xb78   : > { %v2149_v31 = vadd.f32 %v2133_v9, %v2097_v25  ;;  %v2238_v33 = vmul.f32 %v5972_v58, %v4171_v0  ;;  %3720 = vmatprep.mubr.msk.f32.mxu1 %vm309_vm0, %v3044_v27  ;;  %v2879_v14 = vadd.f32 %v2863_v6, %v2827_v4  ;;  %v1932_v8 = vmul.f32 %v4993_v59, %v4130_v52  ;;  %v5974_v4 = vld [vmem:[#allocation43_spill] sm:$0xff] }
 0xb79   : > { %v2522_v51 = vadd.f32 %v2506_v60, %v2469_v2  ;;  %v1844_v39 = vadd.f32 %v1828_v45, %v1792_v35  ;;  %v2662_v38 = vmul.f32 %v5973_v26, %v4255_v62  ;;  %v2290_v13 = vmul.f32 %v5000_v57, %v4177_v16  ;;  %v5975_v6 = vld [vmem:[#allocation59_spill] sm:$0xff] }
 0xb7a   : > { %v2201_v12 = vadd.f32 %v2185_v30, %v2149_v31  ;;  %v2931_v53 = vadd.f32 %v2915_v41, %v2879_v14  ;;  %v1985_v25 = vmul.f32 %v5002_v21, %v4142_v61  ;;  %v2714_v2 = vmul.f32 %v5974_v4, %v4259_v63  ;;  %v5269_v30 = vld [vmem:[#allocation2 + $0xf9] sm:$0xff]  ;;  %v5976_v41 = vld [vmem:[#allocation61_spill] sm:$0xff]  ;;  %v5977_v31 = vld [vmem:[#allocation36_spill] sm:$0xff] }
 0xb7b   : > { %v2574_v9 = vadd.f32 %v2558_v1, %v2522_v51  ;;  %v1896_v34 = vadd.f32 %v1880_v32, %v1844_v39  ;;  %v2342_v60 = vmul.f32 %v5975_v6, %v4193_v23  ;;  %v2037_v39 = vmul.f32 %v5976_v41, %v4147_v5  ;;  %v5979_v51 = vld [vmem:[#allocation39_spill] sm:$0xff] }
 0xb7c   : > { %v2254_v35 = vadd.f32 %v2238_v33, %v2201_v12  ;;  %v2983_v45 = vadd.f32 %v2967_v46, %v2931_v53  ;;  %v2767_v21 = vmul.f32 %v5781_v22, %v5267_v20  ;;  %v2819_v1 = vmul.f32 %v4273_v15, %v5269_v30  ;;  %v5280_v33 = vld [vmem:[#allocation2 + $0xfa] sm:$0xff] }
 0xb7d   : > { %v2626_v27 = vadd.f32 %v2610_v54, %v2574_v9  ;;  %v1948_v57 = vadd.f32 %v1932_v8, %v1896_v34  ;;  %v2394_v58 = vmul.f32 %v5977_v31, %v4197_v24  ;;  %5978 = vst [vmem:[#allocation12_spill] sm:$0xff] %v5280_v33  ;;  %v2089_v8 = vmul.f32 %v5979_v51, %v4153_v7  ;;  %v5980_v53 = vld [vmem:[#allocation62_spill] sm:$0xff]  ;;  %v5984_v31 = vld [vmem:[#allocation63_spill] sm:$0xff] }
 0xb7e   : > { %v2306_v32 = vadd.f32 %v2290_v13, %v2254_v35  ;;  %v3005_v46 = vadd.f32 %v5791_v19, %v2983_v45  ;;  %v2871_v26 = vmul.f32 %v4301_v36, %v5280_v33  ;;  %v2446_v9 = vmul.f32 %v5980_v53, %v4207_v29  ;;  %v5981_v13 = vld [vmem:[#allocation27_spill] sm:$0xff] }
 0xb7f   : > { %v2678_v54 = vadd.f32 %v2662_v38, %v2626_v27  ;;  %v2001_v14 = vadd.f32 %v1985_v25, %v1948_v57  ;;  %v2499_v34 = vmul.f32 %v5981_v13, %v4227_v43  ;;  %v5982_v38 = vld [vmem:[#allocation47_spill] sm:$0xff]  ;;  %v2226_v27 = vld [vmem:[#allocation2 + $0xd8] sm:$0xff] }
 0xb80   : > { %v2358_v12 = vadd.f32 %v2342_v60, %v2306_v32  ;;  %v3021_v4 = vmax.f32 %v3005_v46, 0.0  ;;  %v2141_v45 = vmul.f32 %v5982_v38, %v4159_v10  ;;  %v5983_v57 = vld [vmem:[#allocation38_spill] sm:$0xff]  ;;  %v1769_v60 = vmul.f32 %v5984_v31, %v4118_v48  ;;  %v5985_v32 = vld [vmem:[#allocation51_spill] sm:$0xff] }
 0xb81   : > { %v2730_v35 = vadd.f32 %v2714_v2, %v2678_v54  ;;  %v2053_v6 = vadd.f32 %v2037_v39, %v2001_v14  ;;  %v1717_v41 = vmul.f32 %v5983_v57, %v4114_v47  ;;  %v1821_v51 = vmul.f32 %v5985_v32, %v4122_v49  ;;  %v5986_v2 = vld [vmem:[#allocation65_spill] sm:$0xff]  ;;  %v5300_v46 = vld [vmem:[#allocation2 + $0xfb] sm:$0xff] }
 0xb82   : > { %v2410_v25 = vadd.f32 %v2394_v58, %v2358_v12  ;;  %v3037_v53 = vmin.f32 %v3021_v4, 6.0  ;;  %v2193_v39 = vmul.f32 %v5986_v2, %v4163_v11  ;;  %5987 = vst [vmem:[#allocation54_spill] sm:$0xff] %v5300_v46  ;;  %v5988_v58 = vld [vmem:[#allocation28_spill] sm:$0xff]  ;;  %v2278_v12 = vld [vmem:[#allocation2 + $0xd9] sm:$0xff]  ;;  %v2246_v4 = vmul.f32 %v4171_v0, %v2226_v27  ;;  %v5993_v27 = vld [vmem:[#allocation29_spill] sm:$0xff] }
 0xb83   : > { %v2783_v33 = vadd.f32 %v2767_v21, %v2730_v35  ;;  %v2105_v13 = vadd.f32 %v2089_v8, %v2053_v6  ;;  %v2551_v14 = vmul.f32 %v5988_v58, %v4231_v44  ;;  %v1785_v38 = vadd.f32 %v1769_v60, %v1717_v41  ;;  %v5989_v57 = vld [vmem:[#allocation71_spill] sm:$0xff]  ;;  %v5991_v6 = vld [vmem:[#allocation18_spill] sm:$0xff]  ;;  %v5992_v60 = vld [vmem:[#allocation73_spill] sm:$0xff] }
 0xb84   : > { %v2462_v54 = vadd.f32 %v2446_v9, %v2410_v25  ;;  %v1873_v31 = vmul.f32 %v5989_v57, %v4126_v50  ;;  %3709 = vmatmul.mubr.msk.f32.gmra.mrb[4].mxu0 %vm309_vm0, %v3037_v53  ;;  %v2923_v21 = vmul.f32 %v4315_v56, %v5300_v46  ;;  %v5310_v35 = vld [vmem:[#allocation2 + $0xfc] sm:$0xff]  ;;  %v2603_v25 = vmul.f32 %v5991_v6, %v4243_v55 }
 0xb85   : > { %v2835_v32 = vadd.f32 %v2819_v1, %v2783_v33  ;;  %v2157_v8 = vadd.f32 %v2141_v45, %v2105_v13  ;;  %5990 = vst [vmem:[#allocation14_spill] sm:$0xff] %v5310_v35  ;;  %v2330_v2 = vld [vmem:[#allocation2 + $0xda] sm:$0xff]  ;;  %v1837_v41 = vadd.f32 %v1821_v51, %v1785_v38  ;;  %v1925_v58 = vmul.f32 %v5992_v60, %v4130_v52 }
 0xb86   : > { %v2515_v9 = vadd.f32 %v2499_v34, %v2462_v54  ;;  %v2975_v1 = vmul.f32 %v5931_v28, %v5310_v35  ;;  %v2298_v45 = vmul.f32 %v4177_v16, %v2278_v12  ;;  %v2655_v13 = vmul.f32 %v5993_v27, %v4255_v62  ;;  %v2382_v34 = vld [vmem:[#allocation2 + $0xdb] sm:$0xff] }
 0xb87   : > { %v2887_v57 = vadd.f32 %v2871_v26, %v2835_v32  ;;  %v2209_v33 = vadd.f32 %v2193_v39, %v2157_v8  ;;  %v1889_v54 = vadd.f32 %v1873_v31, %v1837_v41  ;;  %v5994_v6 = vld [vmem:[#allocation67_spill] sm:$0xff]  ;;  %v5995_v38 = vld [vmem:[#allocation30_spill] sm:$0xff]  ;;  %v2350_v32 = vmul.f32 %v4193_v23, %v2330_v2 }
 0xb88   : > { %v2567_v53 = vadd.f32 %v2551_v14, %v2515_v9  ;;  %v1978_v46 = vmul.f32 %v5994_v6, %v4142_v61  ;;  %v2707_v60 = vmul.f32 %v5995_v38, %v4259_v63  ;;  %v2760_v39 = vmul.f32 %v5781_v22, %v5966_v40  ;;  %v2434_v14 = vld [vmem:[#allocation2 + $0xdc] sm:$0xff] }
 0xb89   : > { %v2939_v51 = vadd.f32 %v2923_v21, %v2887_v57  ;;  %v2262_v26 = vadd.f32 %v2246_v4, %v2209_v33  ;;  %v1941_v12 = vadd.f32 %v1925_v58, %v1889_v54  ;;  %v5996_v8 = vld [vmem:[#allocation58_spill] sm:$0xff]  ;;  %v2812_v41 = vmul.f32 %v4273_v15, %v5967_v17 }
 0xb8a   : > { %v2619_v35 = vadd.f32 %v2603_v25, %v2567_v53  ;;  %v2030_v9 = vmul.f32 %v5996_v8, %v4147_v5  ;;  %v2402_v57 = vmul.f32 %v4197_v24, %v2382_v34  ;;  %v2864_v4 = vmul.f32 %v4301_v36, %v5969_v3  ;;  %v5997_v2 = vld [vmem:[#allocation74_spill] sm:$0xff]  ;;  %v5999_v34 = vld [vmem:[#allocation69_spill] sm:$0xff] }
 0xb8b   : > { %v2991_v31 = vadd.f32 %v2975_v1, %v2939_v51  ;;  %v2314_v21 = vadd.f32 %v2298_v45, %v2262_v26  ;;  %v1994_v25 = vadd.f32 %v1978_v46, %v1941_v12  ;;  %v2082_v40 = vmul.f32 %v5997_v2, %v4153_v7  ;;  %v5998_v1 = vld [vmem:[#allocation75_spill] sm:$0xff]  ;;  %v6001_v51 = vld [vmem:[#allocation70_spill] sm:$0xff]  ;;  %v6003_v12 = vld [vmem:[#allocation72_spill] sm:$0xff] }
 0xb8c   : > { %v2671_v27 = vadd.f32 %v2655_v13, %v2619_v35  ;;  %v2454_v53 = vmul.f32 %v4207_v29, %v2434_v14  ;;  %v2507_v54 = vmul.f32 %v5998_v1, %v4227_v43  ;;  %v2134_v35 = vmul.f32 %v5999_v34, %v4159_v10  ;;  %v6000_v13 = vld [vmem:[#allocation68_spill] sm:$0xff]  ;;  %v6002_v26 = vld [vmem:[#allocation19_spill] sm:$0xff] }
 0xb8d   : > { %v3013_v58 = vadd.f32 %v5791_v19, %v2991_v31  ;;  %v2366_v33 = vadd.f32 %v2350_v32, %v2314_v21  ;;  %v2046_v45 = vadd.f32 %v2030_v9, %v1994_v25  ;;  %v1725_v3 = vmul.f32 %v6000_v13, %v4114_v47  ;;  %v6004_v9 = vld [vmem:[#allocation40_spill] sm:$0xff]  ;;  %v6005_v47 = vld [vmem:[#allocation50_spill] sm:$0xff] }
 0xb8e   : > { %v2723_v17 = vadd.f32 %v2707_v60, %v2671_v27  ;;  %v1777_v38 = vmul.f32 %v6001_v51, %v4118_v48  ;;  %v1829_v32 = vmul.f32 %v6002_v26, %v4122_v49  ;;  %v2559_v8 = vmul.f32 %v6003_v12, %v4231_v44  ;;  %v6006_v49 = vld [vmem:[#allocation8_spill] sm:$0xff] }
 0xb8f   : > { %v3029_v46 = vmax.f32 %v3013_v58, 0.0  ;;  %v2418_v6 = vadd.f32 %v2402_v57, %v2366_v33  ;;  %v2098_v60 = vadd.f32 %v2082_v40, %v2046_v45  ;;  %v2186_v31 = vmul.f32 %v6004_v9, %v4163_v11  ;;  %v6007_v33 = vld [vmem:[#allocation41_spill] sm:$0xff] }
 0xb90   : > { %v2776_v14 = vadd.f32 %v2760_v39, %v2723_v17  ;;  %v1793_v25 = vadd.f32 %v1777_v38, %v1725_v3  ;;  %v1881_v57 = vmul.f32 %v6005_v47, %v4126_v50  ;;  %v2916_v48 = vmul.f32 %v4315_v56, %v5970_v18  ;;  %v6008_v18 = vld [vmem:[#allocation45_spill] sm:$0xff]  ;;  %v6009_v3 = vld [vmem:[#allocation44_spill] sm:$0xff] }
 0xb91   : > { %v3045_v21 = vmin.f32 %v3029_v46, 6.0  ;;  %v2470_v27 = vadd.f32 %v2454_v53, %v2418_v6  ;;  %v2150_v58 = vadd.f32 %v2134_v35, %v2098_v60  ;;  %v2239_v39 = vmul.f32 %v6006_v49, %v4171_v0  ;;  %v6010_v6 = vld [vmem:[#allocation56_spill] sm:$0xff] }
 0xb92   : > { %v2828_v2 = vadd.f32 %v2812_v41, %v2776_v14  ;;  %v2611_v1 = vmul.f32 %v6007_v33, %v4243_v55  ;;  %v1845_v17 = vadd.f32 %v1829_v32, %v1793_v25  ;;  %v1933_v53 = vmul.f32 %v5166_v42, %v4130_v52  ;;  %v2748_v14 = vld [vmem:[#allocation2 + $0x108] sm:$0xff]  ;;  %v6011_v52 = vld [vmem:[#allocation26_spill] sm:$0xff] }
 0xb93   : > { %3721 = vmatmul.mubr.msk.f32.gmra.mrb[4].mxu1 %vm309_vm0, %v3045_v21  ;;  %v2523_v40 = vadd.f32 %v2507_v54, %v2470_v27  ;;  %v2968_v50 = vmul.f32 %v5931_v28, %v4993_v59  ;;  %v2202_v41 = vadd.f32 %v2186_v31, %v2150_v58  ;;  %v2291_v34 = vmul.f32 %v6008_v18, %v4177_v16  ;;  %v6012_v59 = vld [vmem:[#allocation42_spill] sm:$0xff]  ;;  %v2800_v25 = vld [vmem:[#allocation2 + $0x109] sm:$0xff] }
 0xb94   : > { %v2880_v45 = vadd.f32 %v2864_v4, %v2828_v2  ;;  %v2663_v46 = vmul.f32 %v6009_v3, %v4255_v62  ;;  %v1897_v54 = vadd.f32 %v1881_v57, %v1845_v17  ;;  %v1986_v38 = vmul.f32 %v6010_v6, %v4142_v61  ;;  %v6014_v2 = vld [vmem:[#allocation9_spill] sm:$0xff]  ;;  %v6017_v18 = vld [vmem:[#allocation4_spill] sm:$0xff]  ;;  %v2227_v6 = vld [vmem:[#allocation2 + $0xe0] sm:$0xff] }
 0xb95   : > { %v2575_v35 = vadd.f32 %v2559_v8, %v2523_v40  ;;  %v2255_v12 = vadd.f32 %v2239_v39, %v2202_v41  ;;  %v2343_v4 = vmul.f32 %v6011_v52, %v4193_v23  ;;  %v2715_v9 = vmul.f32 %v6012_v59, %v4259_v63  ;;  %v6013_v8 = vld [vmem:[#allocation25_spill] sm:$0xff]  ;;  %v6015_v39 = vld [vmem:[#allocation11_spill] sm:$0xff] }
 0xb96   : > { %v2932_v32 = vadd.f32 %v2916_v48, %v2880_v45  ;;  %v1949_v31 = vadd.f32 %v1933_v53, %v1897_v54  ;;  %v2038_v21 = vmul.f32 %v6013_v8, %v4147_v5  ;;  %v2395_v61 = vmul.f32 %v6014_v2, %v4197_v24  ;;  %v6016_v53 = vld [vmem:[#allocation46_spill] sm:$0xff]  ;;  %v2904_v3 = vld [vmem:[#allocation2 + $0x10b] sm:$0xff] }
 0xb97   : > { %v2627_v60 = vadd.f32 %v2611_v1, %v2575_v35  ;;  %v2307_v57 = vadd.f32 %v2291_v34, %v2255_v12  ;;  %v2768_v58 = vmul.f32 %v5781_v22, %v2748_v14  ;;  %v2090_v40 = vmul.f32 %v6015_v39, %v4153_v7  ;;  %v2852_v1 = vld [vmem:[#allocation2 + $0x10a] sm:$0xff] }
 0xb98   : > { %v2984_v27 = vadd.f32 %v2968_v50, %v2932_v32  ;;  %v2002_v49 = vadd.f32 %v1986_v38, %v1949_v31  ;;  %v2447_v5 = vmul.f32 %v6016_v53, %v4207_v29  ;;  %v2820_v50 = vmul.f32 %v4273_v15, %v2800_v25  ;;  %v6018_v54 = vld [vmem:[#allocation64_spill] sm:$0xff]  ;;  %v6019_v12 = vld [vmem:[#allocation49_spill] sm:$0xff] }
 0xb99   : > { %v2679_v48 = vadd.f32 %v2663_v46, %v2627_v60  ;;  %v2359_v17 = vadd.f32 %v2343_v4, %v2307_v57  ;;  %v2142_v34 = vmul.f32 %v6017_v18, %v4159_v10  ;;  %v2500_v7 = vmul.f32 %v6018_v54, %v4227_v43  ;;  %v2956_v60 = vld [vmem:[#allocation2 + $0x10c] sm:$0xff]  ;;  %v2279_v31 = vld [vmem:[#allocation2 + $0xe1] sm:$0xff] }
 0xb9a   : > { %v3006_v33 = vadd.f32 %v5791_v19, %v2984_v27  ;;  %v2054_v41 = vadd.f32 %v2038_v21, %v2002_v49  ;;  %v2872_v32 = vmul.f32 %v4301_v36, %v2852_v1  ;;  %v2194_v52 = vmul.f32 %v6019_v12, %v4163_v11  ;;  %v6021_v2 = vld [vmem:[#allocation52_spill] sm:$0xff] }
 0xb9b   : > { %v2731_v45 = vadd.f32 %v2715_v9, %v2679_v48  ;;  %v2411_v46 = vadd.f32 %v2395_v61, %v2359_v17  ;;  %v6020_v9 = vld [vmem:[#allocation66_spill] sm:$0xff]  ;;  %v2924_v21 = vmul.f32 %v4315_v56, %v2904_v3  ;;  %v2247_v25 = vmul.f32 %v4171_v0, %v2227_v6  ;;  %v2331_v11 = vld [vmem:[#allocation2 + $0xe2] sm:$0xff] }
 0xb9c   : > { %v3022_v35 = vmax.f32 %v3006_v33, 0.0  ;;  %v2106_v14 = vadd.f32 %v2090_v40, %v2054_v41  ;;  %v2552_v10 = vmul.f32 %v6020_v9, %v4231_v44  ;;  %v2604_v61 = vmul.f32 %v6021_v2, %v4243_v55  ;;  %v6022_v33 = vld [vmem:[#allocation57_spill] sm:$0xff]  ;;  %v2383_v17 = vld [vmem:[#allocation2 + $0xe3] sm:$0xff]  ;;  %v6024_v9 = vld [vmem:[#allocation54_spill] sm:$0xff] }
 0xb9d   : > { %v2784_v38 = vadd.f32 %v2768_v58, %v2731_v45  ;;  %v2463_v59 = vadd.f32 %v2447_v5, %v2411_v46  ;;  %v2976_v58 = vmul.f32 %v5931_v28, %v2956_v60  ;;  %v2299_v39 = vmul.f32 %v4177_v16, %v2279_v31  ;;  %v2435_v41 = vld [vmem:[#allocation2 + $0xe4] sm:$0xff]  ;;  %v2853_v2 = vld [vmem:[#allocation2 + $0x112] sm:$0xff] }
 0xb9e   : > { %v3038_v4 = vmin.f32 %v3022_v35, 6.0  ;;  %v2158_v27 = vadd.f32 %v2142_v34, %v2106_v14  ;;  %v2656_v1 = vmul.f32 %v6022_v33, %v4255_v62  ;;  %v2351_v5 = vmul.f32 %v4193_v23, %v2331_v11  ;;  %v6023_v60 = vld [vmem:[#allocation12_spill] sm:$0xff] }
 0xb9f   : > { %v2836_v8 = vadd.f32 %v2820_v50, %v2784_v38  ;;  %v2516_v57 = vadd.f32 %v2500_v7, %v2463_v59  ;;  %v2708_v50 = vmul.f32 %v5094_v37, %v4259_v63  ;;  %v2403_v35 = vmul.f32 %v4197_v24, %v2383_v17 }
 0xba0   : > { %3711 = vmatprep.mubr.msk.f32.mxu0 %vm309_vm0, %v3038_v4  ;;  %v2210_v49 = vadd.f32 %v2194_v52, %v2158_v27  ;;  %v2761_v16 = vmul.f32 %v5781_v22, %v6000_v13  ;;  %v2455_v7 = vmul.f32 %v4207_v29, %v2435_v41  ;;  %v2813_v23 = vmul.f32 %v4273_v15, %v6001_v51  ;;  %v2801_v27 = vld [vmem:[#allocation2 + $0x111] sm:$0xff] }
 0xba1   : > { %v2888_v48 = vadd.f32 %v2872_v32, %v2836_v8  ;;  %v2568_v40 = vadd.f32 %v2552_v10, %v2516_v57  ;;  %v2508_v32 = vmul.f32 %v5267_v20, %v4227_v43  ;;  %v2865_v24 = vmul.f32 %v4301_v36, %v6002_v26  ;;  %v6025_v8 = vld [vmem:[#allocation14_spill] sm:$0xff] }
 0xba2   : > { %v2263_v0 = vadd.f32 %v2247_v25, %v2210_v49  ;;  %v2560_v52 = vmul.f32 %v5269_v30, %v4231_v44  ;;  %v2917_v29 = vmul.f32 %v4315_v56, %v6005_v47  ;;  %v2612_v59 = vmul.f32 %v6023_v60, %v4243_v55  ;;  %v2749_v44 = vld [vmem:[#allocation2 + $0x110] sm:$0xff] }
 0xba3   : > { %v2940_v53 = vadd.f32 %v2924_v21, %v2888_v48  ;;  %v2620_v45 = vadd.f32 %v2604_v61, %v2568_v40  ;;  %v2969_v20 = vmul.f32 %v5931_v28, %v5166_v42  ;;  %v2664_v10 = vmul.f32 %v6024_v9, %v4255_v62  ;;  %v2905_v48 = vld [vmem:[#allocation2 + $0x113] sm:$0xff]  ;;  %v3258_v9 = vld [vmem:[%s5443_s20 + $0x28] sm:$0xff] }
 0xba4   : > { %v2315_v34 = vadd.f32 %v2299_v39, %v2263_v0  ;;  %v2716_v47 = vmul.f32 %v6025_v8, %v4259_v63  ;;  %v2769_v57 = vmul.f32 %v5781_v22, %v2749_v44  ;;  %v2821_v42 = vmul.f32 %v4273_v15, %v2801_v27  ;;  %v2957_v63 = vld [vmem:[#allocation2 + $0x114] sm:$0xff]  ;;  %v3257_v44 = vld [vmem:[%s5443_s20 + $0x20] sm:$0xff]  ;;  %v3266_v27 = vld [vmem:[%s5443_s20 + $0x68] sm:$0xff] }
 0xba5   : > { %v2992_v18 = vadd.f32 %v2976_v58, %v2940_v53  ;;  %v2672_v3 = vadd.f32 %v2656_v1, %v2620_v45  ;;  %v2873_v58 = vmul.f32 %v4301_v36, %v2853_v2  ;;  %v2925_v40 = vmul.f32 %v4315_v56, %v2905_v48  ;;  %v5448_v36 = vld [vmem:[%s5535_s6] ss:$0 sm:$0xff]  ;;  %v3263_v60 = vld [vmem:[%s5443_s20 + $0x50] sm:$0xff]  ;;  %v3260_v48 = vld [vmem:[%s5443_s20 + $0x38] sm:$0xff] }
 0xba6   : > { %v2367_v54 = vadd.f32 %v2351_v5, %v2315_v34  ;;  %v2977_v33 = vmul.f32 %v5931_v28, %v2957_v63  ;;  %v3253_v45 = vld [vmem:[%s5443_s20] sm:$0xff] }
 0xba7   : > { %v3014_v46 = vadd.f32 %v5791_v19, %v2992_v18  ;;  %v2724_v6 = vadd.f32 %v2708_v50, %v2672_v3 }
 0xba8   : > { %v2419_v37 = vadd.f32 %v2403_v35, %v2367_v54  ;;  %v3262_v35 = vld [vmem:[%s5443_s20 + $0x48] sm:$0xff] }
 0xba9   : > { %v3030_v38 = vmax.f32 %v3014_v46, 0.0  ;;  %v2777_v14 = vadd.f32 %v2761_v16, %v2724_v6  ;;  %v3261_v46 = vld [vmem:[%s5443_s20 + $0x40] sm:$0xff] }
 0xbaa   : > { %v2471_v13 = vadd.f32 %v2455_v7, %v2419_v37 }
 0xbab   : > { %v3046_v12 = vmin.f32 %v3030_v38, 6.0  ;;  %v2829_v4 = vadd.f32 %v2813_v23, %v2777_v14  ;;  %v3256_v38 = vld [vmem:[%s5443_s20 + $0x18] sm:$0xff]  ;;  %v3255_v14 = vld [vmem:[%s5443_s20 + $0x10] sm:$0xff] }
 0xbac   : > { %v2524_v51 = vadd.f32 %v2508_v32, %v2471_v13 }
 0xbad   : > { %3723 = vmatprep.mubr.msk.f32.mxu1 %vm309_vm0, %v3046_v12  ;;  %v2881_v43 = vadd.f32 %v2865_v24, %v2829_v4  ;;  %v3264_v4 = vld [vmem:[%s5443_s20 + $0x58] sm:$0xff] }
 0xbae   : > { %v2576_v26 = vadd.f32 %v2560_v52, %v2524_v51 }
 0xbaf   : > { %v2933_v31 = vadd.f32 %v2917_v29, %v2881_v43 }
 0xbb0   : > { %v2628_v30 = vadd.f32 %v2612_v59, %v2576_v26 }
 0xbb1   : > { %v2985_v21 = vadd.f32 %v2969_v20, %v2933_v31 }
 0xbb2   : > { %v2680_v25 = vadd.f32 %v2664_v10, %v2628_v30 }
 0xbb3   : > { %v3007_v55 = vadd.f32 %v5791_v19, %v2985_v21 }
 0xbb4   : > { %v2732_v61 = vadd.f32 %v2716_v47, %v2680_v25 }
 0xbb5   : > { %v3023_v11 = vmax.f32 %v3007_v55, 0.0  ;;  %v3265_v55 = vld [vmem:[%s5443_s20 + $0x60] sm:$0xff] }
 0xbb6   : > { %v2785_v62 = vadd.f32 %v2769_v57, %v2732_v61 }
 0xbb7   : > { %v3039_v49 = vmin.f32 %v3023_v11, 6.0 }
 0xbb8   : > { %v2837_v39 = vadd.f32 %v2821_v42, %v2785_v62 }
 0xbb9   : > { %3712 = vmatmul.mubr.msk.f32.gmra.mrb[6].mxu0 %vm309_vm0, %v3039_v49  ;;  %v3259_v49 = vld [vmem:[%s5443_s20 + $0x30] sm:$0xff] }
 0xbba   : > { %v2889_v22 = vadd.f32 %v2873_v58, %v2837_v39 }
 0xbbc   : > { %v2941_v1 = vadd.f32 %v2925_v40, %v2889_v22 }
 0xbbe   : > { %v2993_v17 = vadd.f32 %v2977_v33, %v2941_v1  ;;  %v3268_v33 = vld [vmem:[%s5443_s20 + $0x78] sm:$0xff] }
 0xbc0   : > { %v3015_v15 = vadd.f32 %v5791_v19, %v2993_v17  ;;  %v3254_v19 = vld [vmem:[%s5443_s20 + $0x8] sm:$0xff] }
 0xbc2   : > { %v3031_v53 = vmax.f32 %v3015_v15, 0.0  ;;  %v3267_v15 = vld [vmem:[%s5443_s20 + $0x70] sm:$0xff] }
 0xbc4   : > { %v3047_v0 = vmin.f32 %v3031_v53, 6.0 }
 0xbc6   : > { %3724 = vmatmul.mubr.msk.f32.gmra.mrb[6].mxu1 %vm309_vm0, %v3047_v0  ;;  %vm3285_vm0 = vcmask 31744  }
 0xbef   : > { %v3704_v56 = vpop.f32.mrb[0].mxu0 }
 0xbf0   : > { %v3178_v28 = vadd.f32 %v3704_v56, %v5448_v36  ;;  %v3172_v5 = vpop.f32.mrb[1].mxu0 }
 0xbf1   : > { %v3173_v50 = vadd.f32 %v5448_v36, %v3172_v5 }
 0xbf2   : > { %v3270_v41 = vadd.f32 %v3254_v19, %v3178_v28 }
 0xbf3   : > { %v3269_v18 = vadd.f32 %v3253_v45, %v3173_v50 }
 0xbf4   : > { %3287 = vst.msk [vmem:[%s3957_s16 + $0x8] sm:$0xff] %vm3285_vm0, %v3270_v41 }
 0xbf5   : > { %3286 = vst.msk [vmem:[%s3957_s16] sm:$0xff] %vm3285_vm0, %v3269_v18 }
 0xbf9   : > { %v3716_v34 = vpop.f32.mrb[0].mxu1 }
 0xbfa   : > { %v3218_v3 = vadd.f32 %v3716_v34, %v5448_v36  ;;  %v3212_v16 = vpop.f32.mrb[1].mxu1 }
 0xbfb   : > { %v3213_v54 = vadd.f32 %v5448_v36, %v3212_v16 }
 0xbfc   : > { %v3278_v7 = vadd.f32 %v3262_v35, %v3218_v3 }
 0xbfd   : > { %v3277_v6 = vadd.f32 %v3261_v46, %v3213_v54 }
 0xbfe   : > { %3295 = vst.msk [vmem:[%s3957_s16 + $0x48] sm:$0xff] %vm3285_vm0, %v3278_v7 }
 0xbff   : > { %3294 = vst.msk [vmem:[%s3957_s16 + $0x40] sm:$0xff] %vm3285_vm0, %v3277_v6 }
 0xc24   : > { %v3707_v23 = vpop.f32.mrb[2].mxu0 }
 0xc25   : > { %v3188_v37 = vadd.f32 %v3707_v23, %v5448_v36  ;;  %v3182_v32 = vpop.f32.mrb[3].mxu0 }
 0xc26   : > { %v3183_v24 = vadd.f32 %v5448_v36, %v3182_v32 }
 0xc27   : > { %v3272_v12 = vadd.f32 %v3256_v38, %v3188_v37 }
 0xc28   : > { %v3271_v13 = vadd.f32 %v3255_v14, %v3183_v24 }
 0xc29   : > { %3289 = vst.msk [vmem:[%s3957_s16 + $0x18] sm:$0xff] %vm3285_vm0, %v3272_v12 }
 0xc2a   : > { %3288 = vst.msk [vmem:[%s3957_s16 + $0x10] sm:$0xff] %vm3285_vm0, %v3271_v13 }
 0xc31   : > { %v3719_v52 = vpop.f32.mrb[2].mxu1 }
 0xc32   : > { %v3228_v29 = vadd.f32 %v3719_v52, %v5448_v36  ;;  %v3222_v51 = vpop.f32.mrb[3].mxu1 }
 0xc33   : > { %v3223_v59 = vadd.f32 %v5448_v36, %v3222_v51 }
 0xc34   : > { %v3280_v43 = vadd.f32 %v3264_v4, %v3228_v29 }
 0xc35   : > { %v3279_v20 = vadd.f32 %v3263_v60, %v3223_v59 }
 0xc36   : > { %3297 = vst.msk [vmem:[%s3957_s16 + $0x58] sm:$0xff] %vm3285_vm0, %v3280_v43 }
 0xc37   : > { %3296 = vst.msk [vmem:[%s3957_s16 + $0x50] sm:$0xff] %vm3285_vm0, %v3279_v20 }
 0xc57   : > { %v3710_v26 = vpop.f32.mrb[4].mxu0 }
 0xc58   : > { %v3198_v10 = vadd.f32 %v3710_v26, %v5448_v36  ;;  %v3192_v31 = vpop.f32.mrb[5].mxu0 }
 0xc59   : > { %v3193_v30 = vadd.f32 %v5448_v36, %v3192_v31 }
 0xc5a   : > { %v3274_v8 = vadd.f32 %v3258_v9, %v3198_v10 }
 0xc5b   : > { %v3273_v47 = vadd.f32 %v3257_v44, %v3193_v30 }
 0xc5c   : > { %3291 = vst.msk [vmem:[%s3957_s16 + $0x28] sm:$0xff] %vm3285_vm0, %v3274_v8 }
 0xc5d   : > { %3290 = vst.msk [vmem:[%s3957_s16 + $0x20] sm:$0xff] %vm3285_vm0, %v3273_v47 }
 0xc66   : > { %v3722_v21 = vpop.f32.mrb[4].mxu1 }
 0xc67   : > { %v3238_v25 = vadd.f32 %v3722_v21, %v5448_v36  ;;  %v3232_v57 = vpop.f32.mrb[5].mxu1 }
 0xc68   : > { %v3233_v2 = vadd.f32 %v5448_v36, %v3232_v57 }
 0xc69   : > { %v3282_v61 = vadd.f32 %v3266_v27, %v3238_v25 }
 0xc6a   : > { %v3281_v42 = vadd.f32 %v3265_v55, %v3233_v2 }
 0xc6b   : > { %3299 = vst.msk [vmem:[%s3957_s16 + $0x68] sm:$0xff] %vm3285_vm0, %v3282_v61 }
 0xc6c   : > { %3298 = vst.msk [vmem:[%s3957_s16 + $0x60] sm:$0xff] %vm3285_vm0, %v3281_v42 }
 0xc8c   : > { %v3713_v11 = vpop.f32.mrb[6].mxu0 }
 0xc8d   : > { %v3208_v62 = vadd.f32 %v3713_v11, %v5448_v36  ;;  %v3202_v58 = vpop.f32.mrb[7].mxu0 }
 0xc8e   : > { %v3203_v63 = vadd.f32 %v5448_v36, %v3202_v58 }
 0xc8f   : > { %v3276_v39 = vadd.f32 %v3260_v48, %v3208_v62 }
 0xc90   : > { %v3275_v40 = vadd.f32 %v3259_v49, %v3203_v63 }
 0xc91   : > { %3293 = vst.msk [vmem:[%s3957_s16 + $0x38] sm:$0xff] %vm3285_vm0, %v3276_v39 }
 0xc92   : > { %3292 = vst.msk [vmem:[%s3957_s16 + $0x30] sm:$0xff] %vm3285_vm0, %v3275_v40 }
 0xc99   : > { %v3725_v22 = vpop.f32.mrb[6].mxu1 }
 0xc9a   : > { %v3248_v1 = vadd.f32 %v3725_v22, %v5448_v36  ;;  %v3242_v17 = vpop.f32.mrb[7].mxu1 }
 0xc9b   : > { %v3243_v53 = vadd.f32 %v5448_v36, %v3242_v17 }
 0xc9c   : > { %v3284_v0 = vadd.f32 %v3268_v33, %v3248_v1 }
 0xc9d   : > { %v3283_v56 = vadd.f32 %v3267_v15, %v3243_v53 }
 0xc9e   : > { %3301 = vst.msk [vmem:[%s3957_s16 + $0x78] sm:$0xff] %vm3285_vm0, %v3284_v0 }
 0xc9f   : > { %3300 = vst.msk [vmem:[%s3957_s16 + $0x70] sm:$0xff] %vm3285_vm0, %v3283_v56 }
 0xca0 PF: > { %s17_s28 = sadd.s32 1, %s3813_s28   ;;  %s6026_s24 = smov %s3805_s26 }
 0xca1   : > { %p14_p1 = scmp.ge.s32.totalorder %s17_s28, 6   ;;  %s6027_s25 = smov %s3809_s27 }
 0xca2   : > { %s6028_s26 = smov %s6031_s29  ;;  %s6029_s27 = smov %s6035_s30 }
 0xca3   :  { %16 = sbr.rel (!%p14_p1) target bundleno = 3 (0x3), region = 154 }

</bundles_post_ra>
